<compile_context>
chip_gen: v5e
topology: v5e:2x2
jax: 0.10.0
libtpu: 0.0.40
codegen_flags: <defaults>
</compile_context>

<pallas_src>
import jax
import jax.numpy as jnp
import numpy as np
from jax.experimental import pallas as pl
from jax.experimental.pallas import tpu as pltpu

D_IN = 784          # full-dim block -> no lane padding needed
D_HID = 400
LATENT = 20

# Lane-padded ("_P") sizes for the dims that are NOT full-dim blocks.
D_HID_P = 512       # 4 * 128
LAT_P = 128         # mu -> lanes [0,128), logvar -> lanes [128,256)


def vae_kernel(x_ref, eps_ref,
               w1_ref, b1_ref, wml_ref, bml_ref,
               w3_ref, b3_ref, w4_ref, b4_ref,
               recon_ref, mulogvar_ref):
    # ---- encode ----
    x = x_ref[...].astype(jnp.bfloat16)
    h1 = jnp.maximum(
        jnp.dot(x, w1_ref[...], preferred_element_type=jnp.float32) + b1_ref[...],
        0.0)
    # fc21 & fc22 fused into one lane-dense (bm, 256) bf16 matmul:
    #   lanes [0, 128)   -> mu     (real data in cols [0, 20))
    #   lanes [128, 256) -> logvar (real data in cols [128, 148))
    ml = (jnp.dot(h1.astype(jnp.bfloat16), wml_ref[...],
                  preferred_element_type=jnp.float32) + bml_ref[...])
    mu = ml[:, :LAT_P]
    logvar = ml[:, LAT_P:]

    # ---- reparameterize: z = mu + eps * exp(0.5 * logvar) (f32 elementwise) ----
    # Padded lanes carry mu = 0, logvar = 0, eps = 0  ->  z = 0 there.
    z = mu + eps_ref[...] * jnp.exp(0.5 * logvar)

    # ---- decode ----
    h3 = jnp.maximum(
        jnp.dot(z.astype(jnp.bfloat16), w3_ref[...],
                preferred_element_type=jnp.float32) + b3_ref[...],
        0.0)
    logits = (jnp.dot(h3.astype(jnp.bfloat16), w4_ref[...],
                      preferred_element_type=jnp.float32) + b4_ref[...])

    recon_ref[...] = jax.nn.sigmoid(logits)
    # Single lane-dense output slab for (mu | logvar): one writeback DMA,
    # no masked vst. The wrapper slices the 20 real lanes back out.
    mulogvar_ref[...] = ml


def pack_params(params):
    """One-time weight packing: zero-pad to lane-aligned shapes, fuse fc21|fc22,
    and store weights as bf16 (biases stay f32). Call once, outside the hot path."""
    (w1, b1, w21, b21, w22, b22, w3, b3, w4, b4) = params
    f32 = jnp.float32

    w1_p = jnp.pad(w1.astype(f32), ((0, 0), (0, D_HID_P - D_HID))).astype(jnp.bfloat16)
    b1_p = jnp.pad(b1.astype(f32), ((0, 0), (0, D_HID_P - D_HID)))

    wml = jnp.zeros((D_HID_P, 2 * LAT_P), f32)
    wml = wml.at[:D_HID, :LATENT].set(w21.astype(f32))
    wml = wml.at[:D_HID, LAT_P:LAT_P + LATENT].set(w22.astype(f32))
    wml = wml.astype(jnp.bfloat16)
    bml = jnp.zeros((1, 2 * LAT_P), f32)
    bml = bml.at[:, :LATENT].set(b21.astype(f32))
    bml = bml.at[:, LAT_P:LAT_P + LATENT].set(b22.astype(f32))

    w3_p = jnp.pad(w3.astype(f32),
                   ((0, LAT_P - LATENT), (0, D_HID_P - D_HID))).astype(jnp.bfloat16)
    b3_p = jnp.pad(b3.astype(f32), ((0, 0), (0, D_HID_P - D_HID)))
    w4_p = jnp.pad(w4.astype(f32), ((0, D_HID_P - D_HID), (0, 0))).astype(jnp.bfloat16)
    b4_p = b4.astype(f32)
    return (w1_p, b1_p, wml, bml, w3_p, b3_p, w4_p, b4_p)


def vae_forward(x_nchw, eps, packed_params, *, bm=512):
    """Full VAE forward on TPU via one pallas_call, tiled over the batch.

    `packed_params` must come from pack_params() (hoisted out of the hot path)."""
    B = x_nchw.shape[0]

    # Batch tile: as large as possible (amortizes per-step overhead, keeps the
    # MXU fed). Small batches run as a single grid step: v5e/v6e have one
    # TensorCore (grid is a serial loop) and on v7x splitting tiny batches just
    # duplicates the weight DMA per core. Per-step VMEM at bm=512 (bf16 weights
    # single-buffered + f32 activations double-buffered) is ~11 MiB, under the
    # 16 MiB v5e scoped default, so no vmem_limit_bytes override is needed.
    bm = min(bm, ((B + 7) // 8) * 8)  # one step when the whole batch fits
    bm = ((bm + 7) // 8) * 8          # sublane-align
    grid_b = -(-B // bm)              # ceil(B / bm)
    B_pad = grid_b * bm

    x = x_nchw.reshape(B, -1).astype(jnp.float32)     # x.view(-1, 784); no lane pad
    if B_pad != B:
        x = jnp.pad(x, ((0, B_pad - B), (0, 0)))
    eps_p = jnp.pad(eps.astype(jnp.float32),
                    ((0, B_pad - B), (0, LAT_P - LATENT)))

    def rep(shape):
        # Weights/biases replicated across batch tiles. Constant index map ->
        # fetched once; Buffered(1) drops the dead second pipeline buffer.
        return pl.BlockSpec(shape, lambda i: (0, 0), pipeline_mode=pl.Buffered(1))

    grid_spec = pltpu.PrefetchScalarGridSpec(
        num_scalar_prefetch=0,
        grid=(grid_b,),
        in_specs=[
            pl.BlockSpec((bm, D_IN), lambda i: (i, 0)),        # x tile (full-dim lanes)
            pl.BlockSpec((bm, LAT_P), lambda i: (i, 0)),       # eps tile
            rep((D_IN, D_HID_P)), rep((1, D_HID_P)),           # fc1 (bf16 W, f32 b)
            rep((D_HID_P, 2 * LAT_P)), rep((1, 2 * LAT_P)),    # fc21|fc22 fused
            rep((LAT_P, D_HID_P)), rep((1, D_HID_P)),          # fc3
            rep((D_HID_P, D_IN)), rep((1, D_IN)),              # fc4
        ],
        out_specs=[
            pl.BlockSpec((bm, D_IN), lambda i: (i, 0)),        # recon (width 784)
            pl.BlockSpec((bm, 2 * LAT_P), lambda i: (i, 0)),   # mu|logvar slab
        ],
    )

    out_shape = (
        jax.ShapeDtypeStruct((B_pad, D_IN), jnp.float32),
        jax.ShapeDtypeStruct((B_pad, 2 * LAT_P), jnp.float32),
    )

    recon_p, ml = pl.pallas_call(
        vae_kernel,
        out_shape=out_shape,
        grid_spec=grid_spec,
        compiler_params=pltpu.CompilerParams(
            dimension_semantics=("parallel",)),
    )(x, eps_p, *packed_params)

    recon = recon_p[:B]
    mu = ml[:B, :LATENT]
    logvar = ml[:B, LAT_P:LAT_P + LATENT]
    return recon, mu, logvar


def init_linear(key, fan_in, fan_out):
    """Mimics torch.nn.Linear default init: U(-1/sqrt(fan_in), 1/sqrt(fan_in)).
    Weight stored transposed as (fan_in, fan_out); bias as (1, fan_out)."""
    kw, kb = jax.random.split(key)
    bound = 1.0 / np.sqrt(fan_in)
    w = jax.random.uniform(kw, (fan_in, fan_out), jnp.float32, -bound, bound)
    b = jax.random.uniform(kb, (1, fan_out), jnp.float32, -bound, bound)
    return w, b


def init_params(key):
    k1, k21, k22, k3, k4 = jax.random.split(key, 5)
    w1, b1 = init_linear(k1, D_IN, D_HID)
    w21, b21 = init_linear(k21, D_HID, LATENT)
    w22, b22 = init_linear(k22, D_HID, LATENT)
    w3, b3 = init_linear(k3, LATENT, D_HID)
    w4, b4 = init_linear(k4, D_HID, D_IN)
    return (w1, b1, w21, b21, w22, b22, w3, b3, w4, b4)


def vae_forward_ref(x_nchw, eps, params):
    """Pure-JAX f32 reference for correctness checking."""
    (w1, b1, w21, b21, w22, b22, w3, b3, w4, b4) = params
    x = x_nchw.reshape(x_nchw.shape[0], D_IN).astype(jnp.float32)
    h1 = jax.nn.relu(x @ w1 + b1)
    mu = h1 @ w21 + b21
    logvar = h1 @ w22 + b22
    z = mu + eps * jnp.exp(0.5 * logvar)
    h3 = jax.nn.relu(z @ w3 + b3)
    recon = jax.nn.sigmoid(h3 @ w4 + b4)
    return recon, mu, logvar


if __name__ == "__main__":
    key = jax.random.PRNGKey(0)
    k_x, k_eps, k_params = jax.random.split(key, 3)

    B = 16  # small test batch; bm clamps to 16 -> single grid step
    # MNIST-like input in NCHW, values in [0, 1)
    x = jax.random.uniform(k_x, (B, 1, 28, 28), jnp.float32)
    eps = jax.random.normal(k_eps, (B, LATENT), jnp.float32)
    params = init_params(k_params)
    packed = pack_params(params)   # one-time packing, outside the forward path

    recon, mu, logvar = vae_forward(x, eps, packed)
    jax.block_until_ready((recon, mu, logvar))

    recon_ref, mu_ref, logvar_ref = vae_forward_ref(x, eps, params)
    # Tolerance loosened vs the previous all-f32 version: matmuls now run with
    # bf16 operands (f32 accumulation), an intentional precision trade-off.
    np.testing.assert_allclose(np.asarray(recon), np.asarray(recon_ref), atol=2e-2, rtol=2e-2)
    np.testing.assert_allclose(np.asarray(mu), np.asarray(mu_ref), atol=2e-2, rtol=2e-2)
    np.testing.assert_allclose(np.asarray(logvar), np.asarray(logvar_ref), atol=2e-2, rtol=2e-2)

    print("KERNEL_OK")
</pallas_src>

<mosaic_0001>
module attributes {stable_mosaic.version = 11 : i64} {
  func.func @vae_kernel(%arg0: i32, %arg1: memref<16x784xf32, #tpu.memory_space<vmem>>, %arg2: memref<16x128xf32, #tpu.memory_space<vmem>>, %arg3: memref<784x512xbf16, #tpu.memory_space<vmem>>, %arg4: memref<1x512xf32, #tpu.memory_space<vmem>>, %arg5: memref<512x256xbf16, #tpu.memory_space<vmem>>, %arg6: memref<1x256xf32, #tpu.memory_space<vmem>>, %arg7: memref<128x512xbf16, #tpu.memory_space<vmem>>, %arg8: memref<1x512xf32, #tpu.memory_space<vmem>>, %arg9: memref<512x784xbf16, #tpu.memory_space<vmem>>, %arg10: memref<1x784xf32, #tpu.memory_space<vmem>>, %arg11: memref<16x784xf32, #tpu.memory_space<vmem>>, %arg12: memref<16x256xf32, #tpu.memory_space<vmem>>) attributes {dimension_semantics = [#tpu.dimension_semantics<parallel>], iteration_bounds = array<i64: 1>, scalar_prefetch = 0 : i64, scratch_operands = 0 : i64, tpu.core_type = #tpu.core_type<tc>, window_params = [{transform_indices = @transform_0, window_bounds = array<i64: 16, 784>}, {transform_indices = @transform_1, window_bounds = array<i64: 16, 128>}, {pipeline_mode = #tpu.pipeline_mode<synchronous>, transform_indices = @transform_2, window_bounds = array<i64: 784, 512>}, {pipeline_mode = #tpu.pipeline_mode<synchronous>, transform_indices = @transform_3, window_bounds = array<i64: 1, 512>}, {pipeline_mode = #tpu.pipeline_mode<synchronous>, transform_indices = @transform_4, window_bounds = array<i64: 512, 256>}, {pipeline_mode = #tpu.pipeline_mode<synchronous>, transform_indices = @transform_5, window_bounds = array<i64: 1, 256>}, {pipeline_mode = #tpu.pipeline_mode<synchronous>, transform_indices = @transform_6, window_bounds = array<i64: 128, 512>}, {pipeline_mode = #tpu.pipeline_mode<synchronous>, transform_indices = @transform_7, window_bounds = array<i64: 1, 512>}, {pipeline_mode = #tpu.pipeline_mode<synchronous>, transform_indices = @transform_8, window_bounds = array<i64: 512, 784>}, {pipeline_mode = #tpu.pipeline_mode<synchronous>, transform_indices = @transform_9, window_bounds = array<i64: 1, 784>}, {transform_indices = @transform_10, window_bounds = array<i64: 16, 784>}, {transform_indices = @transform_11, window_bounds = array<i64: 16, 256>}]} {
    %c0 = arith.constant 0 : index
    %c0_0 = arith.constant 0 : index
    %0 = vector.load %arg1[%c0, %c0_0] : memref<16x784xf32, #tpu.memory_space<vmem>>, vector<16x784xf32>
    %1 = arith.truncf %0 : vector<16x784xf32> to vector<16x784xbf16>
    %c0_1 = arith.constant 0 : index
    %c0_2 = arith.constant 0 : index
    %2 = vector.load %arg3[%c0_1, %c0_2] : memref<784x512xbf16, #tpu.memory_space<vmem>>, vector<784x512xbf16>
    %cst = arith.constant dense<0.000000e+00> : vector<16x512xf32>
    %3 = tpu.matmul %1, %2, %cst {dimension_numbers = #tpu.dot_dimension_numbers<[1], [0], [0], [1], [0, 0, 1, 1], [], []>} : vector<16x784xbf16>, vector<784x512xbf16>, vector<16x512xf32> -> vector<16x512xf32>
    %c0_3 = arith.constant 0 : index
    %c0_4 = arith.constant 0 : index
    %4 = vector.load %arg4[%c0_3, %c0_4] : memref<1x512xf32, #tpu.memory_space<vmem>>, vector<1x512xf32>
    %5 = vector.broadcast %4 : vector<1x512xf32> to vector<16x512xf32>
    %6 = arith.addf %3, %5 : vector<16x512xf32>
    %cst_5 = arith.constant 0.000000e+00 : f32
    %7 = vector.broadcast %cst_5 : f32 to vector<16x512xf32>
    %8 = arith.maximumf %6, %7 : vector<16x512xf32>
    %9 = arith.truncf %8 : vector<16x512xf32> to vector<16x512xbf16>
    %c0_6 = arith.constant 0 : index
    %c0_7 = arith.constant 0 : index
    %10 = vector.load %arg5[%c0_6, %c0_7] : memref<512x256xbf16, #tpu.memory_space<vmem>>, vector<512x256xbf16>
    %cst_8 = arith.constant dense<0.000000e+00> : vector<16x256xf32>
    %11 = tpu.matmul %9, %10, %cst_8 {dimension_numbers = #tpu.dot_dimension_numbers<[1], [0], [0], [1], [0, 0, 1, 1], [], []>} : vector<16x512xbf16>, vector<512x256xbf16>, vector<16x256xf32> -> vector<16x256xf32>
    %c0_9 = arith.constant 0 : index
    %c0_10 = arith.constant 0 : index
    %12 = vector.load %arg6[%c0_9, %c0_10] : memref<1x256xf32, #tpu.memory_space<vmem>>, vector<1x256xf32>
    %13 = vector.broadcast %12 : vector<1x256xf32> to vector<16x256xf32>
    %14 = arith.addf %11, %13 : vector<16x256xf32>
    %15 = vector.extract_strided_slice %14 {offsets = [0, 0], sizes = [16, 128], strides = [1, 1]} : vector<16x256xf32> to vector<16x128xf32>
    %16 = vector.extract_strided_slice %14 {offsets = [0, 128], sizes = [16, 128], strides = [1, 1]} : vector<16x256xf32> to vector<16x128xf32>
    %c0_11 = arith.constant 0 : index
    %c0_12 = arith.constant 0 : index
    %17 = vector.load %arg2[%c0_11, %c0_12] : memref<16x128xf32, #tpu.memory_space<vmem>>, vector<16x128xf32>
    %cst_13 = arith.constant 5.000000e-01 : f32
    %18 = vector.broadcast %cst_13 : f32 to vector<16x128xf32>
    %19 = arith.mulf %18, %16 : vector<16x128xf32>
    %20 = math.exp %19 : vector<16x128xf32>
    %21 = arith.mulf %17, %20 : vector<16x128xf32>
    %22 = arith.addf %15, %21 : vector<16x128xf32>
    %23 = arith.truncf %22 : vector<16x128xf32> to vector<16x128xbf16>
    %c0_14 = arith.constant 0 : index
    %c0_15 = arith.constant 0 : index
    %24 = vector.load %arg7[%c0_14, %c0_15] : memref<128x512xbf16, #tpu.memory_space<vmem>>, vector<128x512xbf16>
    %cst_16 = arith.constant dense<0.000000e+00> : vector<16x512xf32>
    %25 = tpu.matmul %23, %24, %cst_16 {dimension_numbers = #tpu.dot_dimension_numbers<[1], [0], [0], [1], [0, 0, 1, 1], [], []>} : vector<16x128xbf16>, vector<128x512xbf16>, vector<16x512xf32> -> vector<16x512xf32>
    %c0_17 = arith.constant 0 : index
    %c0_18 = arith.constant 0 : index
    %26 = vector.load %arg8[%c0_17, %c0_18] : memref<1x512xf32, #tpu.memory_space<vmem>>, vector<1x512xf32>
    %27 = vector.broadcast %26 : vector<1x512xf32> to vector<16x512xf32>
    %28 = arith.addf %25, %27 : vector<16x512xf32>
    %cst_19 = arith.constant 0.000000e+00 : f32
    %29 = vector.broadcast %cst_19 : f32 to vector<16x512xf32>
    %30 = arith.maximumf %28, %29 : vector<16x512xf32>
    %31 = arith.truncf %30 : vector<16x512xf32> to vector<16x512xbf16>
    %c0_20 = arith.constant 0 : index
    %c0_21 = arith.constant 0 : index
    %32 = vector.load %arg9[%c0_20, %c0_21] : memref<512x784xbf16, #tpu.memory_space<vmem>>, vector<512x784xbf16>
    %cst_22 = arith.constant dense<0.000000e+00> : vector<16x784xf32>
    %33 = tpu.matmul %31, %32, %cst_22 {dimension_numbers = #tpu.dot_dimension_numbers<[1], [0], [0], [1], [0, 0, 1, 1], [], []>} : vector<16x512xbf16>, vector<512x784xbf16>, vector<16x784xf32> -> vector<16x784xf32>
    %c0_23 = arith.constant 0 : index
    %c0_24 = arith.constant 0 : index
    %34 = vector.load %arg10[%c0_23, %c0_24] : memref<1x784xf32, #tpu.memory_space<vmem>>, vector<1x784xf32>
    %35 = vector.broadcast %34 : vector<1x784xf32> to vector<16x784xf32>
    %36 = arith.addf %33, %35 : vector<16x784xf32>
    %37 = arith.negf %36 : vector<16x784xf32>
    %38 = math.exp %37 : vector<16x784xf32>
    %cst_25 = arith.constant 1.000000e+00 : f32
    %39 = vector.broadcast %cst_25 : f32 to vector<16x784xf32>
    %40 = arith.addf %39, %38 : vector<16x784xf32>
    %41 = arith.divf %39, %40 : vector<16x784xf32>
    %c0_26 = arith.constant 0 : index
    %c0_27 = arith.constant 0 : index
    %42 = vector.load %arg11[%c0_26, %c0_27] : memref<16x784xf32, #tpu.memory_space<vmem>>, vector<16x784xf32>
    tpu.vector_store %arg11[%c0_26, %c0_27], %41 {strides = array<i32>} : memref<16x784xf32, #tpu.memory_space<vmem>>, vector<16x784xf32>,
    %c0_28 = arith.constant 0 : index
    %c0_29 = arith.constant 0 : index
    %43 = vector.load %arg12[%c0_28, %c0_29] : memref<16x256xf32, #tpu.memory_space<vmem>>, vector<16x256xf32>
    tpu.vector_store %arg12[%c0_28, %c0_29], %14 {strides = array<i32>} : memref<16x256xf32, #tpu.memory_space<vmem>>, vector<16x256xf32>,
    return
  }
  func.func @transform_0(%arg0: i32) -> (i32, i32) {
    %c0_i32 = arith.constant 0 : i32
    %c0_i32_0 = arith.constant 0 : i32
    return %arg0, %c0_i32 : i32, i32
  }
  func.func @transform_1(%arg0: i32) -> (i32, i32) {
    %c0_i32 = arith.constant 0 : i32
    %c0_i32_0 = arith.constant 0 : i32
    return %arg0, %c0_i32 : i32, i32
  }
  func.func @transform_2(%arg0: i32) -> (i32, i32) {
    %c0_i32 = arith.constant 0 : i32
    %c0_i32_0 = arith.constant 0 : i32
    %c0_i32_1 = arith.constant 0 : i32
    return %c0_i32, %c0_i32_0 : i32, i32
  }
  func.func @transform_3(%arg0: i32) -> (i32, i32) {
    %c0_i32 = arith.constant 0 : i32
    %c0_i32_0 = arith.constant 0 : i32
    %c0_i32_1 = arith.constant 0 : i32
    return %c0_i32, %c0_i32_0 : i32, i32
  }
  func.func @transform_4(%arg0: i32) -> (i32, i32) {
    %c0_i32 = arith.constant 0 : i32
    %c0_i32_0 = arith.constant 0 : i32
    %c0_i32_1 = arith.constant 0 : i32
    return %c0_i32, %c0_i32_0 : i32, i32
  }
  func.func @transform_5(%arg0: i32) -> (i32, i32) {
    %c0_i32 = arith.constant 0 : i32
    %c0_i32_0 = arith.constant 0 : i32
    %c0_i32_1 = arith.constant 0 : i32
    return %c0_i32, %c0_i32_0 : i32, i32
  }
  func.func @transform_6(%arg0: i32) -> (i32, i32) {
    %c0_i32 = arith.constant 0 : i32
    %c0_i32_0 = arith.constant 0 : i32
    %c0_i32_1 = arith.constant 0 : i32
    return %c0_i32, %c0_i32_0 : i32, i32
  }
  func.func @transform_7(%arg0: i32) -> (i32, i32) {
    %c0_i32 = arith.constant 0 : i32
    %c0_i32_0 = arith.constant 0 : i32
    %c0_i32_1 = arith.constant 0 : i32
    return %c0_i32, %c0_i32_0 : i32, i32
  }
  func.func @transform_8(%arg0: i32) -> (i32, i32) {
    %c0_i32 = arith.constant 0 : i32
    %c0_i32_0 = arith.constant 0 : i32
    %c0_i32_1 = arith.constant 0 : i32
    return %c0_i32, %c0_i32_0 : i32, i32
  }
  func.func @transform_9(%arg0: i32) -> (i32, i32) {
    %c0_i32 = arith.constant 0 : i32
    %c0_i32_0 = arith.constant 0 : i32
    %c0_i32_1 = arith.constant 0 : i32
    return %c0_i32, %c0_i32_0 : i32, i32
  }
  func.func @transform_10(%arg0: i32) -> (i32, i32) {
    %c0_i32 = arith.constant 0 : i32
    %c0_i32_0 = arith.constant 0 : i32
    return %arg0, %c0_i32 : i32, i32
  }
  func.func @transform_11(%arg0: i32) -> (i32, i32) {
    %c0_i32 = arith.constant 0 : i32
    %c0_i32_0 = arith.constant 0 : i32
    return %arg0, %c0_i32 : i32, i32
  }
}

</mosaic_0001>

<bundles_post_ra>
// kernel: tpu_custom_call.1
= control target key start
LH: loop header
LB: loop body
LE: loop exit
PB: predicated region body
PF: predicated region fallthrough
CT: control target
= control target key end

     0   :  { %17 = vsyncpa [#allocation3], 0  ;;  %vm1247_vm0 = vcmask 130048   ;;  %s10648_s0 = inlined_call_operand.vmem [shape: f32[16,784], index: 0, kind: input, shape index: {}]   ;;  %s10649_s1 = inlined_call_operand.vmem [shape: f32[16,128], index: 1, kind: input, shape index: {}]   ;;  %s10650_s2 = inlined_call_operand.vmem [shape: bf16[784,512], index: 2, kind: input, shape index: {}]   ;;  %s10651_s3 = inlined_call_operand.vmem [shape: f32[1,512], index: 3, kind: input, shape index: {}]   ;;  %s10652_s4 = inlined_call_operand.vmem [shape: bf16[512,256], index: 4, kind: input, shape index: {}]   ;;  %s10653_s5 = inlined_call_operand.vmem [shape: f32[1,256], index: 5, kind: input, shape index: {}]   ;;  %s10654_s6 = inlined_call_operand.vmem [shape: bf16[128,512], index: 6, kind: input, shape index: {}]   ;;  %s10655_s7 = inlined_call_operand.vmem [shape: f32[1,512], index: 7, kind: input, shape index: {}]   ;;  %s10656_s8 = inlined_call_operand.vmem [shape: bf16[512,784], index: 8, kind: input, shape index: {}]   ;;  %s10657_s9 = inlined_call_operand.vmem [shape: f32[1,784], index: 9, kind: input, shape index: {}]   ;;  %s10658_s10 = inlined_call_operand.hbm [shape: f32[16,784], index: 10, kind: output, shape index: {0}]   ;;  %s10659_s11 = inlined_call_operand.hbm [shape: f32[16,256], index: 11, kind: output, shape index: {1}]  }
   0x1   :  { %v4690_v0 = vld [vmem:[%s10650_s2 + $0xe0] sm:$0xf]  ;;  %v6688_v1 = vld [vmem:[%s10650_s2 + $0xec] sm:$0xf0] }
   0x2   :  { %v4818_v2 = vld [vmem:[%s10650_s2 + $0x1e0] sm:$0xf]  ;;  %v4691_v3 = vor.u32 %v6688_v1, %v4690_v0  ;;  %v6720_v4 = vld [vmem:[%s10650_s2 + $0x1ec] sm:$0xf0] }
   0x3   :  { %v4946_v5 = vld [vmem:[%s10650_s2 + $0x2e0] sm:$0xf]  ;;  %v6752_v6 = vld [vmem:[%s10650_s2 + $0x2ec] sm:$0xf0]  ;;  %v4819_v7 = vor.u32 %v6720_v4, %v4818_v2 }
   0x4   :  { %v4947_v8 = vor.u32 %v6752_v6, %v4946_v5  ;;  %v5074_v9 = vld [vmem:[%s10650_s2 + $0x3e0] sm:$0xf]  ;;  %v6784_v10 = vld [vmem:[%s10650_s2 + $0x3ec] sm:$0xf0]  ;;  %1251 = vmatpush.bf16.msra.mxu0 %v4691_v3 }
   0x5   :  { %v4674_v11 = vld [vmem:[%s10650_s2 + $0xc0] sm:$0xf]  ;;  %v5075_v12 = vor.u32 %v6784_v10, %v5074_v9  ;;  %v6684_v13 = vld [vmem:[%s10650_s2 + $0xcc] sm:$0xf0]  ;;  %1265 = vmatpush.bf16.msra.mxu1 %v4819_v7 }
   0x6   :  { %v4802_v14 = vld [vmem:[%s10650_s2 + $0x1c0] sm:$0xf]  ;;  %v6716_v15 = vld [vmem:[%s10650_s2 + $0x1cc] sm:$0xf0]  ;;  %1279 = vmatpush.bf16.msra.mxu2 %v4947_v8  ;;  %v4675_v16 = vor.u32 %v6684_v13, %v4674_v11 }
   0x7   :  { %v4803_v17 = vor.u32 %v6716_v15, %v4802_v14  ;;  %v4930_v18 = vld [vmem:[%s10650_s2 + $0x2c0] sm:$0xf]  ;;  %v6748_v19 = vld [vmem:[%s10650_s2 + $0x2cc] sm:$0xf0]  ;;  %1293 = vmatpush.bf16.msra.mxu3 %v5075_v12 }
   0x8   :  { %v5058_v20 = vld [vmem:[%s10650_s2 + $0x3c0] sm:$0xf]  ;;  %v4931_v21 = vor.u32 %v6748_v19, %v4930_v18  ;;  %v6780_v22 = vld [vmem:[%s10650_s2 + $0x3cc] sm:$0xf0]  ;;  %1252 = vmatpush.bf16.msra.mxu0 %v4675_v16 }
   0x9   :  { %v4658_v23 = vld [vmem:[%s10650_s2 + $0xa0] sm:$0xf]  ;;  %v6680_v24 = vld [vmem:[%s10650_s2 + $0xac] sm:$0xf0]  ;;  %v5059_v25 = vor.u32 %v6780_v22, %v5058_v20  ;;  %1266 = vmatpush.bf16.msra.mxu1 %v4803_v17 }
   0xa   :  { %v4786_v26 = vld [vmem:[%s10650_s2 + $0x1a0] sm:$0xf]  ;;  %v6712_v27 = vld [vmem:[%s10650_s2 + $0x1ac] sm:$0xf0]  ;;  %v4659_v29 = vor.u32 %v6680_v24, %v4658_v23  ;;  %1280 = vmatpush.bf16.msra.mxu2 %v4931_v21 }
   0xb   :  { %v4914_v28 = vld [vmem:[%s10650_s2 + $0x2a0] sm:$0xf]  ;;  %v6744_v30 = vld [vmem:[%s10650_s2 + $0x2ac] sm:$0xf0]  ;;  %v4787_v33 = vor.u32 %v6712_v27, %v4786_v26  ;;  %1294 = vmatpush.bf16.msra.mxu3 %v5059_v25 }
   0xc   :  { %v5042_v31 = vld [vmem:[%s10650_s2 + $0x3a0] sm:$0xf]  ;;  %v6776_v32 = vld [vmem:[%s10650_s2 + $0x3ac] sm:$0xf0]  ;;  %v4915_v34 = vor.u32 %v6744_v30, %v4914_v28  ;;  %1253 = vmatpush.bf16.msra.mxu0 %v4659_v29 }
   0xd   :  { %v4642_v35 = vld [vmem:[%s10650_s2 + $0x80] sm:$0xf]  ;;  %v6676_v36 = vld [vmem:[%s10650_s2 + $0x8c] sm:$0xf0]  ;;  %v5043_v38 = vor.u32 %v6776_v32, %v5042_v31  ;;  %1267 = vmatpush.bf16.msra.mxu1 %v4787_v33  ;;  %v6686_v32 = vld [vmem:[%s10650_s2 + $0xe4] sm:$0xf] }
   0xe   :  { %v4770_v37 = vld [vmem:[%s10650_s2 + $0x180] sm:$0xf]  ;;  %v6708_v39 = vld [vmem:[%s10650_s2 + $0x18c] sm:$0xf0]  ;;  %v4643_v44 = vor.u32 %v6676_v36, %v4642_v35  ;;  %1281 = vmatpush.bf16.msra.mxu2 %v4915_v34  ;;  %v4692_v33 = vld [vmem:[%s10650_s2 + $0xf0] sm:$0xf0] }
   0xf   :  { %v4898_v40 = vld [vmem:[%s10650_s2 + $0x280] sm:$0xf]  ;;  %v6740_v41 = vld [vmem:[%s10650_s2 + $0x28c] sm:$0xf0]  ;;  %v4771_v45 = vor.u32 %v6708_v39, %v4770_v37  ;;  %1295 = vmatpush.bf16.msra.mxu3 %v5043_v38  ;;  %v49_v36 = vld [vmem:[%s10648_s0 + $0x48] sm:$0xff] }
  0x10   :  { %v5026_v42 = vld [vmem:[%s10650_s2 + $0x380] sm:$0xf]  ;;  %v6772_v43 = vld [vmem:[%s10650_s2 + $0x38c] sm:$0xf0]  ;;  %v4899_v46 = vor.u32 %v6740_v41, %v4898_v40  ;;  %1254 = vmatpush.bf16.msra.mxu0 %v4643_v44  ;;  %v6718_v41 = vld [vmem:[%s10650_s2 + $0x1e4] sm:$0xf] }
  0x11   :  { %v4626_v47 = vld [vmem:[%s10650_s2 + $0x60] sm:$0xf]  ;;  %v6672_v48 = vld [vmem:[%s10650_s2 + $0x6c] sm:$0xf0]  ;;  %v5027_v50 = vor.u32 %v6772_v43, %v5026_v42  ;;  %1268 = vmatpush.bf16.msra.mxu1 %v4771_v45  ;;  %v47_v43 = vld [vmem:[%s10648_s0 + $0x38] sm:$0xff] }
  0x12   :  { %v4754_v49 = vld [vmem:[%s10650_s2 + $0x160] sm:$0xf]  ;;  %v6704_v51 = vld [vmem:[%s10650_s2 + $0x16c] sm:$0xf0]  ;;  %v4627_v56 = vor.u32 %v6672_v48, %v4626_v47  ;;  %1282 = vmatpush.bf16.msra.mxu2 %v4899_v46  ;;  %v4820_v46 = vld [vmem:[%s10650_s2 + $0x1f0] sm:$0xf0] }
  0x13   :  { %v4882_v52 = vld [vmem:[%s10650_s2 + $0x260] sm:$0xf]  ;;  %v6736_v53 = vld [vmem:[%s10650_s2 + $0x26c] sm:$0xf0]  ;;  %v4755_v57 = vor.u32 %v6704_v51, %v4754_v49  ;;  %1296 = vmatpush.bf16.msra.mxu3 %v5027_v50  ;;  %v43_v47 = vld [vmem:[%s10648_s0 + $0x18] sm:$0xff]  ;;  %v4695_v50 = vor.u32 %v6686_v32, %v4692_v33 }
  0x14   :  { %v5010_v54 = vld [vmem:[%s10650_s2 + $0x360] sm:$0xf]  ;;  %v6768_v55 = vld [vmem:[%s10650_s2 + $0x36c] sm:$0xf0]  ;;  %v4883_v58 = vor.u32 %v6736_v53, %v4882_v52  ;;  %1255 = vmatpush.bf16.msra.mxu0 %v4627_v56 }
  0x15   :  { %v4610_v59 = vld [vmem:[%s10650_s2 + $0x40] sm:$0xf]  ;;  %v6668_v60 = vld [vmem:[%s10650_s2 + $0x4c] sm:$0xf0]  ;;  %v5011_v62 = vor.u32 %v6768_v55, %v5010_v54  ;;  %1269 = vmatpush.bf16.msra.mxu1 %v4755_v57  ;;  %v6682_v57 = vld [vmem:[%s10650_s2 + $0xc4] sm:$0xf] }
  0x16   :  { %v4738_v61 = vld [vmem:[%s10650_s2 + $0x140] sm:$0xf]  ;;  %v6700_v63 = vld [vmem:[%s10650_s2 + $0x14c] sm:$0xf0]  ;;  %v4611_v4 = vor.u32 %v6668_v60, %v4610_v59  ;;  %1283 = vmatpush.bf16.msra.mxu2 %v4883_v58  ;;  %v4676_v58 = vld [vmem:[%s10650_s2 + $0xd0] sm:$0xf0] }
  0x17   :  { %v4866_v0 = vld [vmem:[%s10650_s2 + $0x240] sm:$0xf]  ;;  %v6732_v1 = vld [vmem:[%s10650_s2 + $0x24c] sm:$0xf0]  ;;  %v4739_v6 = vor.u32 %v6700_v63, %v4738_v61  ;;  %1297 = vmatpush.bf16.msra.mxu3 %v5011_v62  ;;  %v41_v61 = vld [vmem:[%s10648_s0 + $0x8] sm:$0xff]  ;;  %v4823_v63 = vor.u32 %v6718_v41, %v4820_v46 }
  0x18   :  { %v4994_v2 = vld [vmem:[%s10650_s2 + $0x340] sm:$0xf]  ;;  %v6764_v3 = vld [vmem:[%s10650_s2 + $0x34c] sm:$0xf0]  ;;  %v4867_v7 = vor.u32 %v6732_v1, %v4866_v0  ;;  %1256 = vmatpush.bf16.msra.mxu0 %v4611_v4  ;;  %v6714_v1 = vld [vmem:[%s10650_s2 + $0x1c4] sm:$0xf]  ;;  %v4679_v4 = vor.u32 %v6682_v57, %v4676_v58 }
  0x19   :  { %v4594_v5 = vld [vmem:[%s10650_s2 + $0x20] sm:$0xf]  ;;  %v6664_v8 = vld [vmem:[%s10650_s2 + $0x2c] sm:$0xf0]  ;;  %v4995_v11 = vor.u32 %v6764_v3, %v4994_v2  ;;  %1270 = vmatpush.bf16.msra.mxu1 %v4739_v6  ;;  %v4804_v2 = vld [vmem:[%s10650_s2 + $0x1d0] sm:$0xf0] }
  0x1a   :  { %v4722_v9 = vld [vmem:[%s10650_s2 + $0x120] sm:$0xf]  ;;  %v6696_v10 = vld [vmem:[%s10650_s2 + $0x12c] sm:$0xf0]  ;;  %v4595_v18 = vor.u32 %v6664_v8, %v4594_v5  ;;  %1284 = vmatpush.bf16.msra.mxu2 %v4867_v7  ;;  %v4756_v41 = vld [vmem:[%s10650_s2 + $0x170] sm:$0xf0] }
  0x1b   :  { %v4850_v12 = vld [vmem:[%s10650_s2 + $0x220] sm:$0xf]  ;;  %v6728_v13 = vld [vmem:[%s10650_s2 + $0x22c] sm:$0xf0]  ;;  %v4723_v23 = vor.u32 %v6696_v10, %v4722_v9  ;;  %1298 = vmatpush.bf16.msra.mxu3 %v4995_v11  ;;  %v6678_v10 = vld [vmem:[%s10650_s2 + $0xa4] sm:$0xf] }
  0x1c   :  { %v4978_v14 = vld [vmem:[%s10650_s2 + $0x320] sm:$0xf]  ;;  %v6760_v15 = vld [vmem:[%s10650_s2 + $0x32c] sm:$0xf0]  ;;  %v4851_v24 = vor.u32 %v6728_v13, %v4850_v12  ;;  %1257 = vmatpush.bf16.msra.mxu0 %v4595_v18  ;;  %v4660_v11 = vld [vmem:[%s10650_s2 + $0xb0] sm:$0xf0]  ;;  %v4807_v12 = vor.u32 %v6714_v1, %v4804_v2 }
  0x1d   :  { %v4578_v16 = vld [vmem:[%s10650_s2] sm:$0xf]  ;;  %v6660_v17 = vld [vmem:[%s10650_s2 + $0xc] sm:$0xf0]  ;;  %v4979_v28 = vor.u32 %v6760_v15, %v4978_v14  ;;  %1271 = vmatpush.bf16.msra.mxu1 %v4723_v23  ;;  %v6710_v14 = vld [vmem:[%s10650_s2 + $0x1a4] sm:$0xf] }
  0x1e   :  { %v4706_v19 = vld [vmem:[%s10650_s2 + $0x100] sm:$0xf]  ;;  %v6692_v20 = vld [vmem:[%s10650_s2 + $0x10c] sm:$0xf0]  ;;  %v4579_v35 = vor.u32 %v6660_v17, %v4578_v16  ;;  %1285 = vmatpush.bf16.msra.mxu2 %v4851_v24  ;;  %v4788_v15 = vld [vmem:[%s10650_s2 + $0x1b0] sm:$0xf0]  ;;  %v4663_v17 = vor.u32 %v6678_v10, %v4660_v11 }
  0x1f   :  { %v4834_v21 = vld [vmem:[%s10650_s2 + $0x200] sm:$0xf]  ;;  %v6724_v22 = vld [vmem:[%s10650_s2 + $0x20c] sm:$0xf0]  ;;  %v4707_v39 = vor.u32 %v6692_v20, %v4706_v19  ;;  %1299 = vmatpush.bf16.msra.mxu3 %v4979_v28  ;;  %v4644_v23 = vld [vmem:[%s10650_s2 + $0x90] sm:$0xf0]  ;;  %v4791_v24 = vor.u32 %v6710_v14, %v4788_v15 }
  0x20   :  { %v4962_v25 = vld [vmem:[%s10650_s2 + $0x300] sm:$0xf]  ;;  %v6756_v26 = vld [vmem:[%s10650_s2 + $0x30c] sm:$0xf0]  ;;  %v4835_v40 = vor.u32 %v6724_v22, %v4834_v21  ;;  %1258 = vmatpush.bf16.msra.mxu0 %v4579_v35  ;;  %v6674_v22 = vld [vmem:[%s10650_s2 + $0x84] sm:$0xf] }
  0x21   :  { %v5202_v27 = vld [vmem:[%s10650_s2 + $0x4e0] sm:$0xf]  ;;  %v6816_v29 = vld [vmem:[%s10650_s2 + $0x4ec] sm:$0xf0]  ;;  %v4963_v44 = vor.u32 %v6756_v26, %v4962_v25  ;;  %1272 = vmatpush.bf16.msra.mxu1 %v4707_v39  ;;  %v6706_v26 = vld [vmem:[%s10650_s2 + $0x184] sm:$0xf] }
  0x22   :  { %v5330_v30 = vld [vmem:[%s10650_s2 + $0x5e0] sm:$0xf]  ;;  %v6848_v31 = vld [vmem:[%s10650_s2 + $0x5ec] sm:$0xf0]  ;;  %v5203_v45 = vor.u32 %v6816_v29, %v5202_v27  ;;  %1286 = vmatpush.bf16.msra.mxu2 %v4835_v40  ;;  %v4772_v27 = vld [vmem:[%s10650_s2 + $0x190] sm:$0xf0]  ;;  %v4647_v29 = vor.u32 %v6674_v22, %v4644_v23 }
  0x23   :  { %v42_v34 = vld [vmem:[%s10648_s0 + $0x10] sm:$0xff]  ;;  %v5346_v37 = vld [vmem:[%s10650_s2 + $0x600] sm:$0xf]  ;;  %v5331_v49 = vor.u32 %v6848_v31, %v5330_v30  ;;  %1300 = vmatpush.bf16.msra.mxu3 %v4963_v44  ;;  %v6702_v40 = vld [vmem:[%s10650_s2 + $0x164] sm:$0xf] }
  0x24   :  { %v6852_v38 = vld [vmem:[%s10650_s2 + $0x60c] sm:$0xf0]  ;;  %v40_v42 = vld [vmem:[%s10648_s0] sm:$0xff]  ;;  %v7607_v54 = vpack.c.bf16 %v49_v36, %v42_v34  ;;  %1307 = vmatpush.bf16.msrb.mxu0 %v5203_v45  ;;  %v4628_v35 = vld [vmem:[%s10650_s2 + $0x70] sm:$0xf0] }
  0x25   :  { %v50_v48 = vld [vmem:[%s10648_s0 + $0x50] sm:$0xff]  ;;  %v5186_v51 = vld [vmem:[%s10650_s2 + $0x4c0] sm:$0xf]  ;;  %v7609_v55 = vpack.c.bf16 %v47_v43, %v40_v42  ;;  %v5347_v59 = vor.u32 %v6852_v38, %v5346_v37  ;;  %1321 = vmatpush.bf16.msrb.mxu1 %v5331_v49  ;;  %v6670_v34 = vld [vmem:[%s10650_s2 + $0x64] sm:$0xf]  ;;  %v4775_v38 = vor.u32 %v6706_v26, %v4772_v27 }
  0x26   :  { %v6812_v52 = vld [vmem:[%s10650_s2 + $0x4cc] sm:$0xf0]  ;;  %v5314_v53 = vld [vmem:[%s10650_s2 + $0x5c0] sm:$0xf]  ;;  %v7620_v60 = vpack.c.bf16 %v50_v48, %v43_v47  ;;  %1287 = vmatmul.bf16.vlgmr.msra.gmra.mxu2 %v7607_v54  ;;  %v53_v37 = vld [vmem:[%s10648_s0 + $0x68] sm:$0xff]  ;;  %v4631_v43 = vor.u32 %v6670_v34, %v4628_v35 }
  0x27   :  { %v6844_v56 = vld [vmem:[%s10650_s2 + $0x5cc] sm:$0xf0]  ;;  %v48_v62 = vld [vmem:[%s10648_s0 + $0x40] sm:$0xff]  ;;  %v5187_v0 = vor.u32 %v6812_v52, %v5186_v51  ;;  %1349 = vmatpush.bf16.msrb.mxu3 %v4695_v50  ;;  %1259 = vmatmul.bf16.vlgmr.msra.gmra.mxu0 %v7609_v55  ;;  %v4612_v49 = vld [vmem:[%s10650_s2 + $0x50] sm:$0xf0]  ;;  %v4759_v51 = vor.u32 %v6702_v40, %v4756_v41 }
  0x28   :  { %v5315_v3 = vor.u32 %v6844_v56, %v5314_v53  ;;  %v5170_v5 = vld [vmem:[%s10650_s2 + $0x4a0] sm:$0xf]  ;;  %v6808_v6 = vld [vmem:[%s10650_s2 + $0x4ac] sm:$0xf0]  ;;  %v7645_v8 = vpack.c.bf16 %v48_v62, %v41_v61  ;;  %1342 = vmatpush.bf16.msrb.mxu2 %v5347_v59  ;;  %1301 = vmatmul.bf16.vlgmr.msra.gmra.mxu3 %v7620_v60  ;;  %v6666_v48 = vld [vmem:[%s10650_s2 + $0x44] sm:$0xf] }
  0x29   :  { %v5298_v7 = vld [vmem:[%s10650_s2 + $0x5a0] sm:$0xf]  ;;  %v6840_v9 = vld [vmem:[%s10650_s2 + $0x5ac] sm:$0xf0]  ;;  %1308 = vmatpush.bf16.msrb.mxu0 %v5187_v0  ;;  %v5171_v13 = vor.u32 %v6808_v6, %v5170_v5  ;;  %v6698_v53 = vld [vmem:[%s10650_s2 + $0x144] sm:$0xf]  ;;  %v4615_v58 = vor.u32 %v6666_v48, %v4612_v49 }
  0x2a   :  { %1322 = vmatpush.bf16.msrb.mxu1 %v5315_v3  ;;  %v5299_v16 = vor.u32 %v6840_v9, %v5298_v7  ;;  %v5154_v18 = vld [vmem:[%s10650_s2 + $0x480] sm:$0xf]  ;;  %v6804_v19 = vld [vmem:[%s10650_s2 + $0x48c] sm:$0xf0]  ;;  %v4740_v56 = vld [vmem:[%s10650_s2 + $0x150] sm:$0xf0] }
  0x2b   :  { %1350 = vmatpush.bf16.msrb.mxu3 %v4679_v4  ;;  %v5282_v20 = vld [vmem:[%s10650_s2 + $0x580] sm:$0xf]  ;;  %1273 = vmatmul.bf16.vlgmr.msra.gmra.mxu1 %v7645_v8  ;;  %v6836_v21 = vld [vmem:[%s10650_s2 + $0x58c] sm:$0xf0]  ;;  %v5155_v25 = vor.u32 %v6804_v19, %v5154_v18  ;;  %v6662_v0 = vld [vmem:[%s10650_s2 + $0x24] sm:$0xf]  ;;  %v4743_v4 = vor.u32 %v6698_v53, %v4740_v56 }
  0x2c   :  { %1363 = vmatpush.bf16.msra.mxu2 %v4823_v63  ;;  %v5283_v28 = vor.u32 %v6836_v21, %v5282_v20  ;;  %v5138_v30 = vld [vmem:[%s10650_s2 + $0x460] sm:$0xf]  ;;  %v6800_v31 = vld [vmem:[%s10650_s2 + $0x46c] sm:$0xf0]  ;;  %v4596_v1 = vld [vmem:[%s10650_s2 + $0x30] sm:$0xf0] }
  0x2d   :  { %1309 = vmatpush.bf16.msrb.mxu0 %v5171_v13  ;;  %v5266_v32 = vld [vmem:[%s10650_s2 + $0x560] sm:$0xf]  ;;  %v6832_v33 = vld [vmem:[%s10650_s2 + $0x56c] sm:$0xf0]  ;;  %v5139_v39 = vor.u32 %v6800_v31, %v5138_v30  ;;  %v6694_v2 = vld [vmem:[%s10650_s2 + $0x124] sm:$0xf]  ;;  %v4599_v11 = vor.u32 %v6662_v0, %v4596_v1 }
  0x2e   :  { %1323 = vmatpush.bf16.msrb.mxu1 %v5299_v16  ;;  %v46_v36 = vld [vmem:[%s10648_s0 + $0x30] sm:$0xff]  ;;  %v5267_v42 = vor.u32 %v6832_v33, %v5266_v32  ;;  %v5122_v44 = vld [vmem:[%s10650_s2 + $0x440] sm:$0xf]  ;;  %v6658_v13 = vld [vmem:[%s10650_s2 + $0x4] sm:$0xf] }
  0x2f   :  { %1351 = vmatpush.bf16.msrb.mxu3 %v4663_v17  ;;  %v6796_v45 = vld [vmem:[%s10650_s2 + $0x44c] sm:$0xf0]  ;;  %v5250_v46 = vld [vmem:[%s10650_s2 + $0x540] sm:$0xf]  ;;  %v7736_v50 = vpack.c.bf16 %v53_v37, %v46_v36  ;;  %v4724_v3 = vld [vmem:[%s10650_s2 + $0x130] sm:$0xf0] }
  0x30   :  { %1364 = vmatpush.bf16.msra.mxu2 %v4807_v12  ;;  %v6828_v47 = vld [vmem:[%s10650_s2 + $0x54c] sm:$0xf0]  ;;  %v5123_v52 = vor.u32 %v6796_v45, %v5122_v44  ;;  %v5106_v59 = vld [vmem:[%s10650_s2 + $0x420] sm:$0xf]  ;;  %v4580_v14 = vld [vmem:[%s10650_s2 + $0x10] sm:$0xf0]  ;;  %v4727_v21 = vor.u32 %v6694_v2, %v4724_v3 }
  0x31   :  { %1310 = vmatpush.bf16.msrb.mxu0 %v5155_v25  ;;  %v5251_v57 = vor.u32 %v6828_v47, %v5250_v46  ;;  %v6792_v61 = vld [vmem:[%s10650_s2 + $0x42c] sm:$0xf0]  ;;  %v5234_v62 = vld [vmem:[%s10650_s2 + $0x520] sm:$0xf]  ;;  %v6750_v15 = vld [vmem:[%s10650_s2 + $0x2e4] sm:$0xf]  ;;  %v4583_v27 = vor.u32 %v6658_v13, %v4580_v14 }
  0x32   :  { %1324 = vmatpush.bf16.msrb.mxu1 %v5283_v28  ;;  %v6824_v63 = vld [vmem:[%s10650_s2 + $0x52c] sm:$0xf0]  ;;  %v5107_v5 = vor.u32 %v6792_v61, %v5106_v59  ;;  %v5090_v6 = vld [vmem:[%s10650_s2 + $0x400] sm:$0xf]  ;;  %v4948_v16 = vld [vmem:[%s10650_s2 + $0x2f0] sm:$0xf0] }
  0x33   :  { %1352 = vmatpush.bf16.msrb.mxu3 %v4647_v29  ;;  %v6788_v7 = vld [vmem:[%s10650_s2 + $0x40c] sm:$0xf0]  ;;  %v5218_v9 = vld [vmem:[%s10650_s2 + $0x500] sm:$0xf]  ;;  %v5235_v10 = vor.u32 %v6824_v63, %v5234_v62  ;;  %v6782_v17 = vld [vmem:[%s10650_s2 + $0x3e4] sm:$0xf]  ;;  %v4951_v31 = vor.u32 %v6750_v15, %v4948_v16 }
  0x34   :  { %1365 = vmatpush.bf16.msra.mxu2 %v4791_v24  ;;  %v6820_v12 = vld [vmem:[%s10650_s2 + $0x50c] sm:$0xf0]  ;;  %v5076_v18 = vld [vmem:[%s10650_s2 + $0x3f0] sm:$0xf0]  ;;  %v6814_v19 = vld [vmem:[%s10650_s2 + $0x4e4] sm:$0xf]  ;;  %v5091_v22 = vor.u32 %v6788_v7, %v5090_v6 }
  0x35   :  { %1311 = vmatpush.bf16.msrb.mxu0 %v5139_v39  ;;  %v5204_v20 = vld [vmem:[%s10650_s2 + $0x4f0] sm:$0xf0]  ;;  %v44_v23 = vld [vmem:[%s10648_s0 + $0x20] sm:$0xff]  ;;  %v51_v24 = vld [vmem:[%s10648_s0 + $0x58] sm:$0xff]  ;;  %v5219_v26 = vor.u32 %v6820_v12, %v5218_v9  ;;  %v5079_v32 = vor.u32 %v6782_v17, %v5076_v18 }
  0x36   :  { %1325 = vmatpush.bf16.msrb.mxu1 %v5267_v42  ;;  %5360 = vmatmul.msk.bf16.vlgmr.msrb.gmra.mxu2 %vm1247_vm0, %v7736_v50  ;;  %v6690_v25 = vld [vmem:[%s10650_s2 + $0x104] sm:$0xf]  ;;  %v4708_v28 = vld [vmem:[%s10650_s2 + $0x110] sm:$0xf0]  ;;  %v45_v29 = vld [vmem:[%s10648_s0 + $0x28] sm:$0xff]  ;;  %v5207_v36 = vor.u32 %v6814_v19, %v5204_v20  ;;  %v7833_v37 = vpack.c.bf16 %v51_v24, %v44_v23 }
  0x37   :  { %1353 = vmatpush.bf16.msrb.mxu3 %v4631_v43  ;;  %v52_v30 = vld [vmem:[%s10648_s0 + $0x60] sm:$0xff]  ;;  %v5332_v34 = vld [vmem:[%s10650_s2 + $0x5f0] sm:$0xf0]  ;;  %v4711_v41 = vor.u32 %v6690_v25, %v4708_v28 }
  0x38   :  { %1366 = vmatpush.bf16.msra.mxu2 %v4775_v38  ;;  %v6846_v33 = vld [vmem:[%s10650_s2 + $0x5e4] sm:$0xf]  ;;  %v4932_v38 = vld [vmem:[%s10650_s2 + $0x2d0] sm:$0xf0]  ;;  %v7844_v42 = vpack.c.bf16 %v52_v30, %v45_v29 }
  0x39   :  { %1312 = vmatpush.bf16.msrb.mxu0 %v5123_v52  ;;  %v6746_v35 = vld [vmem:[%s10650_s2 + $0x2c4] sm:$0xf]  ;;  %v5060_v40 = vld [vmem:[%s10650_s2 + $0x3d0] sm:$0xf0]  ;;  %v5335_v45 = vor.u32 %v6846_v33, %v5332_v34 }
  0x3a   :  { %1326 = vmatpush.bf16.msrb.mxu1 %v5251_v57  ;;  %v6778_v39 = vld [vmem:[%s10650_s2 + $0x3c4] sm:$0xf]  ;;  %v5188_v44 = vld [vmem:[%s10650_s2 + $0x4d0] sm:$0xf0]  ;;  %v4935_v46 = vor.u32 %v6746_v35, %v4932_v38 }
  0x3b   :  { %1354 = vmatpush.bf16.msrb.mxu3 %v4615_v58  ;;  %v6810_v43 = vld [vmem:[%s10650_s2 + $0x4c4] sm:$0xf]  ;;  %v5063_v47 = vor.u32 %v6778_v39, %v5060_v40  ;;  %v5316_v49 = vld [vmem:[%s10650_s2 + $0x5d0] sm:$0xf0] }
  0x3c   :  { %1367 = vmatpush.bf16.msra.mxu2 %v4759_v51  ;;  %v6842_v48 = vld [vmem:[%s10650_s2 + $0x5c4] sm:$0xf]  ;;  %v5191_v52 = vor.u32 %v6810_v43, %v5188_v44  ;;  %v4916_v53 = vld [vmem:[%s10650_s2 + $0x2b0] sm:$0xf0] }
  0x3d   :  { %1313 = vmatpush.bf16.msrb.mxu0 %v5107_v5  ;;  %v6742_v51 = vld [vmem:[%s10650_s2 + $0x2a4] sm:$0xf]  ;;  %v5044_v57 = vld [vmem:[%s10650_s2 + $0x3b0] sm:$0xf0]  ;;  %v5319_v61 = vor.u32 %v6842_v48, %v5316_v49 }
  0x3e   :  { %1327 = vmatpush.bf16.msrb.mxu1 %v5235_v10  ;;  %v6774_v56 = vld [vmem:[%s10650_s2 + $0x3a4] sm:$0xf]  ;;  %v5172_v59 = vld [vmem:[%s10650_s2 + $0x4b0] sm:$0xf0]  ;;  %v4919_v62 = vor.u32 %v6742_v51, %v4916_v53 }
  0x3f   :  { %1355 = vmatpush.bf16.msrb.mxu3 %v4599_v11  ;;  %v6806_v58 = vld [vmem:[%s10650_s2 + $0x4a4] sm:$0xf]  ;;  %v5047_v63 = vor.u32 %v6774_v56, %v5044_v57  ;;  %v5300_v1 = vld [vmem:[%s10650_s2 + $0x5b0] sm:$0xf0] }
  0x40   :  { %1368 = vmatpush.bf16.msra.mxu2 %v4743_v4  ;;  %v6838_v0 = vld [vmem:[%s10650_s2 + $0x5a4] sm:$0xf]  ;;  %v5175_v3 = vor.u32 %v6806_v58, %v5172_v59  ;;  %v4900_v4 = vld [vmem:[%s10650_s2 + $0x290] sm:$0xf0] }
  0x41   :  { %1314 = vmatpush.bf16.msrb.mxu0 %v5091_v22  ;;  %v6738_v2 = vld [vmem:[%s10650_s2 + $0x284] sm:$0xf]  ;;  %v5028_v6 = vld [vmem:[%s10650_s2 + $0x390] sm:$0xf0]  ;;  %v5303_v10 = vor.u32 %v6838_v0, %v5300_v1  ;;  %v4698_v0 = vld [vmem:[%s10650_s2 + $0xe8] sm:$0xf] }
  0x42   :  { %1328 = vmatpush.bf16.msrb.mxu1 %v5219_v26  ;;  %v6770_v5 = vld [vmem:[%s10650_s2 + $0x384] sm:$0xf]  ;;  %v5156_v9 = vld [vmem:[%s10650_s2 + $0x490] sm:$0xf0]  ;;  %v4903_v11 = vor.u32 %v6738_v2, %v4900_v4  ;;  %v6689_v1 = vld [vmem:[%s10650_s2 + $0xf4] sm:$0xf0] }
  0x43   :  { %1356 = vmatpush.bf16.msrb.mxu3 %v4583_v27  ;;  %v6802_v7 = vld [vmem:[%s10650_s2 + $0x484] sm:$0xf]  ;;  %v5031_v12 = vor.u32 %v6770_v5, %v5028_v6  ;;  %v5284_v14 = vld [vmem:[%s10650_s2 + $0x590] sm:$0xf0]  ;;  %v4954_v5 = vld [vmem:[%s10650_s2 + $0x2e8] sm:$0xf] }
  0x44   :  { %1369 = vmatpush.bf16.msra.mxu2 %v4727_v21  ;;  %1315 = vmatmul.bf16.vlgmr.msrb.gmra.mxu0 %v7833_v37  ;;  %v6834_v13 = vld [vmem:[%s10650_s2 + $0x584] sm:$0xf]  ;;  %v5159_v16 = vor.u32 %v6802_v7, %v5156_v9  ;;  %v4884_v17 = vld [vmem:[%s10650_s2 + $0x270] sm:$0xf0]  ;;  %v6753_v6 = vld [vmem:[%s10650_s2 + $0x2f4] sm:$0xf0] }
  0x45   :  { %1377 = vmatpush.bf16.msra.mxu0 %v4951_v31  ;;  %1329 = vmatmul.bf16.vlgmr.msrb.gmra.mxu1 %v7844_v42  ;;  %v6734_v15 = vld [vmem:[%s10650_s2 + $0x264] sm:$0xf]  ;;  %v5012_v19 = vld [vmem:[%s10650_s2 + $0x370] sm:$0xf0]  ;;  %v5287_v22 = vor.u32 %v6834_v13, %v5284_v14  ;;  %v4699_v13 = vor.u32 %v6689_v1, %v4698_v0  ;;  %v5082_v14 = vld [vmem:[%s10650_s2 + $0x3e8] sm:$0xf] }
  0x46   :  { %1391 = vmatpush.bf16.msra.mxu1 %v5079_v32  ;;  %1357 = vmatmul.bf16.vlgmr.msrb.gmra.mxu3 %v7609_v55  ;;  %v6766_v18 = vld [vmem:[%s10650_s2 + $0x364] sm:$0xf]  ;;  %v5140_v21 = vld [vmem:[%s10650_s2 + $0x470] sm:$0xf0]  ;;  %v4887_v23 = vor.u32 %v6734_v15, %v4884_v17  ;;  %v6785_v15 = vld [vmem:[%s10650_s2 + $0x3f4] sm:$0xf0] }
  0x47   :  { %1405 = vmatpush.bf16.msra.mxu3 %v5207_v36  ;;  %v6798_v20 = vld [vmem:[%s10650_s2 + $0x464] sm:$0xf]  ;;  %v5015_v24 = vor.u32 %v6766_v18, %v5012_v19  ;;  %v5268_v26 = vld [vmem:[%s10650_s2 + $0x570] sm:$0xf0]  ;;  %v4826_v17 = vld [vmem:[%s10650_s2 + $0x1e8] sm:$0xf]  ;;  %v4955_v19 = vor.u32 %v6753_v6, %v4954_v5 }
  0x48   :  { %1370 = vmatpush.bf16.msra.mxu2 %v4711_v41  ;;  %v6830_v25 = vld [vmem:[%s10650_s2 + $0x564] sm:$0xf]  ;;  %v5143_v28 = vor.u32 %v6798_v20, %v5140_v21  ;;  %v4868_v29 = vld [vmem:[%s10650_s2 + $0x250] sm:$0xf0]  ;;  %v6721_v18 = vld [vmem:[%s10650_s2 + $0x1f4] sm:$0xf0] }
  0x49   :  { %1378 = vmatpush.bf16.msra.mxu0 %v4935_v46  ;;  %v6730_v27 = vld [vmem:[%s10650_s2 + $0x244] sm:$0xf]  ;;  %v4996_v31 = vld [vmem:[%s10650_s2 + $0x350] sm:$0xf0]  ;;  %v5271_v34 = vor.u32 %v6830_v25, %v5268_v26  ;;  %v4682_v21 = vld [vmem:[%s10650_s2 + $0xc8] sm:$0xf]  ;;  %v4827_v26 = vor.u32 %v6721_v18, %v4826_v17 }
  0x4a   :  { %1392 = vmatpush.bf16.msra.mxu1 %v5063_v47  ;;  %v6762_v30 = vld [vmem:[%s10650_s2 + $0x344] sm:$0xf]  ;;  %v5124_v33 = vld [vmem:[%s10650_s2 + $0x450] sm:$0xf0]  ;;  %v4871_v35 = vor.u32 %v6730_v27, %v4868_v29  ;;  %v6749_v25 = vld [vmem:[%s10650_s2 + $0x2d4] sm:$0xf0] }
  0x4b   :  { %1406 = vmatpush.bf16.msra.mxu3 %v5191_v52  ;;  %1371 = vmatmul.bf16.vlgmr.msra.gmra.mxu2 %v7645_v8  ;;  %v6794_v32 = vld [vmem:[%s10650_s2 + $0x444] sm:$0xf]  ;;  %v4999_v36 = vor.u32 %v6762_v30, %v4996_v31  ;;  %v5252_v39 = vld [vmem:[%s10650_s2 + $0x550] sm:$0xf0]  ;;  %v5066_v27 = vld [vmem:[%s10650_s2 + $0x3c8] sm:$0xf] }
  0x4c   :  { %1419 = vmatpush.bf16.msrb.mxu2 %v5335_v45  ;;  %v6826_v38 = vld [vmem:[%s10650_s2 + $0x544] sm:$0xf]  ;;  %v5127_v41 = vor.u32 %v6794_v32, %v5124_v33  ;;  %v4852_v43 = vld [vmem:[%s10650_s2 + $0x230] sm:$0xf0]  ;;  %v4810_v30 = vld [vmem:[%s10650_s2 + $0x1c8] sm:$0xf] }
  0x4d   :  { %1379 = vmatpush.bf16.msra.mxu0 %v4919_v62  ;;  %v6726_v40 = vld [vmem:[%s10650_s2 + $0x224] sm:$0xf]  ;;  %v4980_v45 = vld [vmem:[%s10650_s2 + $0x330] sm:$0xf0]  ;;  %v5255_v48 = vor.u32 %v6826_v38, %v5252_v39  ;;  %v6717_v31 = vld [vmem:[%s10650_s2 + $0x1d4] sm:$0xf0] }
  0x4e   :  { %1393 = vmatpush.bf16.msra.mxu1 %v5047_v63  ;;  %v6758_v44 = vld [vmem:[%s10650_s2 + $0x324] sm:$0xf]  ;;  %v5108_v47 = vld [vmem:[%s10650_s2 + $0x430] sm:$0xf0]  ;;  %v4855_v52 = vor.u32 %v6726_v40, %v4852_v43  ;;  %v4666_v33 = vld [vmem:[%s10650_s2 + $0xa8] sm:$0xf]  ;;  %v4811_v39 = vor.u32 %v6717_v31, %v4810_v30 }
  0x4f   :  { %1407 = vmatpush.bf16.msra.mxu3 %v5175_v3  ;;  %v6790_v46 = vld [vmem:[%s10650_s2 + $0x424] sm:$0xf]  ;;  %v5236_v51 = vld [vmem:[%s10650_s2 + $0x530] sm:$0xf0]  ;;  %v4983_v53 = vor.u32 %v6758_v44, %v4980_v45  ;;  %v6745_v38 = vld [vmem:[%s10650_s2 + $0x2b4] sm:$0xf0] }
  0x50   :  { %1420 = vmatpush.bf16.msrb.mxu2 %v5319_v61  ;;  %v6822_v49 = vld [vmem:[%s10650_s2 + $0x524] sm:$0xf]  ;;  %v4836_v57 = vld [vmem:[%s10650_s2 + $0x210] sm:$0xf0]  ;;  %v5111_v59 = vor.u32 %v6790_v46, %v5108_v47  ;;  %v5050_v40 = vld [vmem:[%s10650_s2 + $0x3a8] sm:$0xf] }
  0x51   :  { %1380 = vmatpush.bf16.msra.mxu0 %v4903_v11  ;;  %v6722_v56 = vld [vmem:[%s10650_s2 + $0x204] sm:$0xf]  ;;  %v4964_v61 = vld [vmem:[%s10650_s2 + $0x310] sm:$0xf0]  ;;  %v5239_v3 = vor.u32 %v6822_v49, %v5236_v51  ;;  %v4794_v44 = vld [vmem:[%s10650_s2 + $0x1a8] sm:$0xf] }
  0x52   :  { %1394 = vmatpush.bf16.msra.mxu1 %v5031_v12  ;;  %v6754_v58 = vld [vmem:[%s10650_s2 + $0x304] sm:$0xf]  ;;  %v5092_v63 = vld [vmem:[%s10650_s2 + $0x410] sm:$0xf0]  ;;  %v4839_v7 = vor.u32 %v6722_v56, %v4836_v57  ;;  %v6713_v45 = vld [vmem:[%s10650_s2 + $0x1b4] sm:$0xf0] }
  0x53   :  { %1408 = vmatpush.bf16.msra.mxu3 %v5159_v16  ;;  %v6786_v62 = vld [vmem:[%s10650_s2 + $0x404] sm:$0xf]  ;;  %v5348_v4 = vld [vmem:[%s10650_s2 + $0x610] sm:$0xf0]  ;;  %v4967_v9 = vor.u32 %v6754_v58, %v4964_v61  ;;  %v4650_v47 = vld [vmem:[%s10650_s2 + $0x88] sm:$0xf] }
  0x54   :  { %1421 = vmatpush.bf16.msrb.mxu2 %v5303_v10  ;;  %v6850_v2 = vld [vmem:[%s10650_s2 + $0x604] sm:$0xf]  ;;  %v5220_v11 = vld [vmem:[%s10650_s2 + $0x510] sm:$0xf0]  ;;  %v5095_v12 = vor.u32 %v6786_v62, %v5092_v63  ;;  %v4906_v51 = vld [vmem:[%s10650_s2 + $0x288] sm:$0xf] }
  0x55   :  { %1381 = vmatpush.bf16.msra.mxu0 %v4887_v23  ;;  %v6818_v10 = vld [vmem:[%s10650_s2 + $0x504] sm:$0xf]  ;;  %v5351_v16 = vor.u32 %v6850_v2, %v5348_v4  ;;  %v5083_v23 = vor.u32 %v6785_v15, %v5082_v14  ;;  %v5034_v56 = vld [vmem:[%s10650_s2 + $0x388] sm:$0xf]  ;;  %v6773_v57 = vld [vmem:[%s10650_s2 + $0x394] sm:$0xf0] }
  0x56   :  { %1395 = vmatpush.bf16.msra.mxu1 %v5015_v24  ;;  %v5223_v20 = vor.u32 %v6818_v10, %v5220_v11  ;;  %v4938_v24 = vld [vmem:[%s10650_s2 + $0x2c8] sm:$0xf] }
  0x57   :  { %1409 = vmatpush.bf16.msra.mxu3 %v5143_v28  ;;  %v6781_v28 = vld [vmem:[%s10650_s2 + $0x3d4] sm:$0xf0]  ;;  %v4939_v32 = vor.u32 %v6749_v25, %v4938_v24 }
  0x58   :  { %1422 = vmatpush.bf16.msrb.mxu2 %v5287_v22  ;;  %v6685_v22 = vld [vmem:[%s10650_s2 + $0xd4] sm:$0xf0] }
  0x59   :  { %1382 = vmatpush.bf16.msra.mxu0 %v4871_v35  ;;  %v4683_v29 = vor.u32 %v6685_v22, %v4682_v21  ;;  %v5067_v35 = vor.u32 %v6781_v28, %v5066_v27 }
  0x5a   :  { %1396 = vmatpush.bf16.msra.mxu1 %v4999_v36  ;;  %v4922_v36 = vld [vmem:[%s10650_s2 + $0x2a8] sm:$0xf] }
  0x5b   :  { %1410 = vmatpush.bf16.msra.mxu3 %v5127_v41  ;;  %v6777_v41 = vld [vmem:[%s10650_s2 + $0x3b4] sm:$0xf0]  ;;  %v4923_v46 = vor.u32 %v6745_v38, %v4922_v36 }
  0x5c   :  { %1423 = vmatpush.bf16.msrb.mxu2 %v5271_v34  ;;  %v6681_v34 = vld [vmem:[%s10650_s2 + $0xb4] sm:$0xf0]  ;;  %v5051_v49 = vor.u32 %v6777_v41, %v5050_v40 }
  0x5d   :  { %1383 = vmatpush.bf16.msra.mxu0 %v4855_v52  ;;  %v4667_v43 = vor.u32 %v6681_v34, %v4666_v33  ;;  %v6741_v52 = vld [vmem:[%s10650_s2 + $0x294] sm:$0xf0] }
  0x5e   :  { %1397 = vmatpush.bf16.msra.mxu1 %v4983_v53  ;;  %v4795_v53 = vor.u32 %v6713_v45, %v4794_v44 }
  0x5f   :  { %1411 = vmatpush.bf16.msra.mxu3 %v5111_v59 }
  0x60   :  { %1424 = vmatpush.bf16.msrb.mxu2 %v5255_v48  ;;  %v6677_v48 = vld [vmem:[%s10650_s2 + $0x94] sm:$0xf0] }
  0x61   :  { %1384 = vmatpush.bf16.msra.mxu0 %v4839_v7 }
  0x62   :  { %1398 = vmatpush.bf16.msra.mxu1 %v4967_v9 }
  0x63   :  { %1412 = vmatpush.bf16.msra.mxu3 %v5095_v12 }
  0x64   :  { %1425 = vmatpush.bf16.msrb.mxu2 %v5239_v3  ;;  %1385 = vmatmul.bf16.vlgmr.msra.gmra.mxu0 %v7607_v54 }
  0x65   :  { %1475 = vmatpush.bf16.msrb.mxu0 %v4955_v19  ;;  %1399 = vmatmul.bf16.vlgmr.msra.gmra.mxu1 %v7620_v60 }
  0x66   :  { %1447 = vmatpush.bf16.msrb.mxu1 %v4699_v13  ;;  %1413 = vmatmul.bf16.vlgmr.msra.gmra.mxu3 %v7833_v37 }
  0x67   :  { %1440 = vmatpush.bf16.msrb.mxu3 %v5351_v16 }
  0x68   :  { %1426 = vmatpush.bf16.msrb.mxu2 %v5223_v20 }
  0x69   :  { %1476 = vmatpush.bf16.msrb.mxu0 %v4939_v32 }
  0x6a   :  { %1448 = vmatpush.bf16.msrb.mxu1 %v4683_v29 }
  0x6b   :  { %1461 = vmatpush.bf16.msra.mxu3 %v4827_v26  ;;  %1427 = vmatmul.bf16.vlgmr.msrb.gmra.mxu2 %v7844_v42 }
  0x6c   :  { %1489 = vmatpush.bf16.msra.mxu2 %v5083_v23 }
  0x6f   :  { %1462 = vmatpush.bf16.msra.mxu3 %v4811_v39 }
  0x70   :  { %1490 = vmatpush.bf16.msra.mxu2 %v5067_v35 }
  0x71   :  { %18 = vsyncpa [#allocation5], 0  ;;  %1449 = vmatpush.bf16.msrb.mxu1 %v4667_v43  ;;  %v4651_v58 = vor.u32 %v6677_v48, %v4650_v47  ;;  %v4778_v59 = vld [vmem:[%s10650_s2 + $0x188] sm:$0xf]  ;;  %v6709_v61 = vld [vmem:[%s10650_s2 + $0x194] sm:$0xf0]  ;;  %1477 = vmatpush.bf16.msrb.mxu0 %v4923_v46  ;;  %v4907_v62 = vor.u32 %v6741_v52, %v4906_v51  ;;  %v5035_v1 = vor.u32 %v6773_v57, %v5034_v56 }
  0x72   :  { %v4634_v63 = vld [vmem:[%s10650_s2 + $0x68] sm:$0xf]  ;;  %v6673_v0 = vld [vmem:[%s10650_s2 + $0x74] sm:$0xf0]  ;;  %v4779_v4 = vor.u32 %v6709_v61, %v4778_v59  ;;  %v6687_v56 = vld [vmem:[%s10650_s2 + $0xec] sm:$0xf] }
  0x73   :  { %v4890_v2 = vld [vmem:[%s10650_s2 + $0x268] sm:$0xf]  ;;  %v6737_v3 = vld [vmem:[%s10650_s2 + $0x274] sm:$0xf0]  ;;  %1463 = vmatpush.bf16.msra.mxu3 %v4795_v53  ;;  %v4635_v7 = vor.u32 %v6673_v0, %v4634_v63  ;;  %v4700_v57 = vld [vmem:[%s10650_s2 + $0xf8] sm:$0xf0] }
  0x74   :  { %1491 = vmatpush.bf16.msra.mxu2 %v5051_v49  ;;  %v5018_v5 = vld [vmem:[%s10650_s2 + $0x368] sm:$0xf]  ;;  %v6769_v6 = vld [vmem:[%s10650_s2 + $0x374] sm:$0xf0]  ;;  %v4891_v11 = vor.u32 %v6737_v3, %v4890_v2  ;;  %v6719_v3 = vld [vmem:[%s10650_s2 + $0x1ec] sm:$0xf] }
  0x75   :  { %1450 = vmatpush.bf16.msrb.mxu1 %v4651_v58  ;;  %v4762_v9 = vld [vmem:[%s10650_s2 + $0x168] sm:$0xf]  ;;  %v6705_v10 = vld [vmem:[%s10650_s2 + $0x174] sm:$0xf0]  ;;  %1478 = vmatpush.bf16.msrb.mxu0 %v4907_v62  ;;  %v5019_v14 = vor.u32 %v6769_v6, %v5018_v5  ;;  %v4703_v6 = vor.u32 %v6687_v56, %v4700_v57  ;;  %s4559_s29 = sshll.u32 %s10659_s11, 4  ;;  %s7293_s30 = smov 256   ;;  %s4560_s29 = int_to_ptr.hbm [resolvable:$true] %s4559_s29 }
  0x76   :  { %v4618_v12 = vld [vmem:[%s10650_s2 + $0x48] sm:$0xf]  ;;  %v6669_v13 = vld [vmem:[%s10650_s2 + $0x54] sm:$0xf0]  ;;  %v4763_v17 = vor.u32 %v6705_v10, %v4762_v9  ;;  %5361 = vmatmul.msk.bf16.vlgmr.msrb.gmra.mxu3 %vm1247_vm0, %v7736_v50  ;;  %v6683_v9 = vld [vmem:[%s10650_s2 + $0xcc] sm:$0xf] }
  0x77   :  { %v4874_v15 = vld [vmem:[%s10650_s2 + $0x248] sm:$0xf]  ;;  %v6733_v16 = vld [vmem:[%s10650_s2 + $0x254] sm:$0xf0]  ;;  %1464 = vmatpush.bf16.msra.mxu3 %v4779_v4  ;;  %v4619_v20 = vor.u32 %v6669_v13, %v4618_v12  ;;  %v4828_v4 = vld [vmem:[%s10650_s2 + $0x1f8] sm:$0xf0] }
  0x78   :  { %1492 = vmatpush.bf16.msra.mxu2 %v5035_v1  ;;  %v5002_v18 = vld [vmem:[%s10650_s2 + $0x348] sm:$0xf]  ;;  %v6765_v19 = vld [vmem:[%s10650_s2 + $0x354] sm:$0xf0]  ;;  %v4875_v23 = vor.u32 %v6733_v16, %v4874_v15  ;;  %v4684_v10 = vld [vmem:[%s10650_s2 + $0xd8] sm:$0xf0]  ;;  %v4831_v12 = vor.u32 %v6719_v3, %v4828_v4 }
  0x79   :  { %1451 = vmatpush.bf16.msrb.mxu1 %v4635_v7  ;;  %v4746_v21 = vld [vmem:[%s10650_s2 + $0x148] sm:$0xf]  ;;  %v6701_v22 = vld [vmem:[%s10650_s2 + $0x154] sm:$0xf0]  ;;  %1479 = vmatpush.bf16.msrb.mxu0 %v4891_v11  ;;  %v5003_v26 = vor.u32 %v6765_v19, %v5002_v18  ;;  %v4812_v18 = vld [vmem:[%s10650_s2 + $0x1d8] sm:$0xf0]  ;;  %v4687_v19 = vor.u32 %v6683_v9, %v4684_v10 }
  0x7a   :  { %v4602_v24 = vld [vmem:[%s10650_s2 + $0x28] sm:$0xf]  ;;  %v6665_v25 = vld [vmem:[%s10650_s2 + $0x34] sm:$0xf0]  ;;  %v4747_v29 = vor.u32 %v6701_v22, %v4746_v21  ;;  %v6679_v21 = vld [vmem:[%s10650_s2 + $0xac] sm:$0xf] }
  0x7b   :  { %v4858_v27 = vld [vmem:[%s10650_s2 + $0x228] sm:$0xf]  ;;  %v6729_v28 = vld [vmem:[%s10650_s2 + $0x234] sm:$0xf0]  ;;  %1465 = vmatpush.bf16.msra.mxu3 %v4763_v17  ;;  %v4603_v32 = vor.u32 %v6665_v25, %v4602_v24  ;;  %v6715_v17 = vld [vmem:[%s10650_s2 + $0x1cc] sm:$0xf] }
  0x7c   :  { %1493 = vmatpush.bf16.msra.mxu2 %v5019_v14  ;;  %v4986_v30 = vld [vmem:[%s10650_s2 + $0x328] sm:$0xf]  ;;  %v6761_v31 = vld [vmem:[%s10650_s2 + $0x334] sm:$0xf0]  ;;  %v4859_v36 = vor.u32 %v6729_v28, %v4858_v27  ;;  %v4668_v22 = vld [vmem:[%s10650_s2 + $0xb8] sm:$0xf0]  ;;  %v4815_v24 = vor.u32 %v6715_v17, %v4812_v18 }
  0x7d   :  { %1452 = vmatpush.bf16.msrb.mxu1 %v4619_v20  ;;  %v4730_v33 = vld [vmem:[%s10650_s2 + $0x128] sm:$0xf]  ;;  %v6697_v34 = vld [vmem:[%s10650_s2 + $0x134] sm:$0xf0]  ;;  %1480 = vmatpush.bf16.msrb.mxu0 %v4875_v23  ;;  %v4987_v41 = vor.u32 %v6761_v31, %v4986_v30  ;;  %v4796_v30 = vld [vmem:[%s10650_s2 + $0x1b8] sm:$0xf0]  ;;  %v4671_v31 = vor.u32 %v6679_v21, %v4668_v22 }
  0x7e   :  { %v4586_v35 = vld [vmem:[%s10650_s2 + $0x8] sm:$0xf]  ;;  %v6661_v38 = vld [vmem:[%s10650_s2 + $0x14] sm:$0xf0]  ;;  %v4731_v47 = vor.u32 %v6697_v34, %v4730_v33  ;;  %v6675_v33 = vld [vmem:[%s10650_s2 + $0x8c] sm:$0xf] }
  0x7f   :  { %v5210_v39 = vld [vmem:[%s10650_s2 + $0x4e8] sm:$0xf]  ;;  %v6817_v40 = vld [vmem:[%s10650_s2 + $0x4f4] sm:$0xf0]  ;;  %1466 = vmatpush.bf16.msra.mxu3 %v4747_v29  ;;  %v4587_v52 = vor.u32 %v6661_v38, %v4586_v35  ;;  %v6711_v29 = vld [vmem:[%s10650_s2 + $0x1ac] sm:$0xf] }
  0x80   :  { %1494 = vmatpush.bf16.msra.mxu2 %v5003_v26  ;;  %v4714_v43 = vld [vmem:[%s10650_s2 + $0x108] sm:$0xf]  ;;  %v6725_v45 = vld [vmem:[%s10650_s2 + $0x214] sm:$0xf0]  ;;  %v5211_v58 = vor.u32 %v6817_v40, %v5210_v39  ;;  %v4652_v34 = vld [vmem:[%s10650_s2 + $0x98] sm:$0xf0] }
  0x81   :  { %v4842_v44 = vld [vmem:[%s10650_s2 + $0x208] sm:$0xf]  ;;  %v6757_v48 = vld [vmem:[%s10650_s2 + $0x314] sm:$0xf0]  ;;  %1453 = vmatpush.bf16.msrb.mxu1 %v4603_v32  ;;  %1481 = vmatpush.bf16.msrb.mxu0 %v4859_v36  ;;  %v4799_v36 = vor.u32 %v6711_v29, %v4796_v30  ;;  %v4748_v9 = vld [vmem:[%s10650_s2 + $0x158] sm:$0xf0] }
  0x82   :  { %v4970_v46 = vld [vmem:[%s10650_s2 + $0x308] sm:$0xf]  ;;  %v6853_v51 = vld [vmem:[%s10650_s2 + $0x614] sm:$0xf0]  ;;  %v4843_v59 = vor.u32 %v6725_v45, %v4842_v44  ;;  %v4780_v44 = vld [vmem:[%s10650_s2 + $0x198] sm:$0xf0]  ;;  %v4655_v45 = vor.u32 %v6675_v33, %v4652_v34 }
  0x83   :  { %v5354_v49 = vld [vmem:[%s10650_s2 + $0x608] sm:$0xf]  ;;  %v6693_v53 = vld [vmem:[%s10650_s2 + $0x114] sm:$0xf0]  ;;  %v4971_v0 = vor.u32 %v6757_v48, %v4970_v46  ;;  %1467 = vmatpush.bf16.msra.mxu3 %v4731_v47  ;;  %v6671_v47 = vld [vmem:[%s10650_s2 + $0x6c] sm:$0xf] }
  0x84   :  { %v5338_v61 = vld [vmem:[%s10650_s2 + $0x5e8] sm:$0xf]  ;;  %v6849_v62 = vld [vmem:[%s10650_s2 + $0x5f4] sm:$0xf0]  ;;  %1495 = vmatpush.bf16.msra.mxu2 %v4987_v41  ;;  %v5355_v2 = vor.u32 %v6853_v51, %v5354_v49  ;;  %v4715_v5 = vor.u32 %v6693_v53, %v4714_v43  ;;  %v6707_v43 = vld [vmem:[%s10650_s2 + $0x18c] sm:$0xf] }
  0x85   :  { %v5194_v63 = vld [vmem:[%s10650_s2 + $0x4c8] sm:$0xf]  ;;  %v6813_v1 = vld [vmem:[%s10650_s2 + $0x4d4] sm:$0xf0]  ;;  %1454 = vmatpush.bf16.msrb.mxu1 %v4587_v52  ;;  %v5339_v7 = vor.u32 %v6849_v62, %v5338_v61  ;;  %1482 = vmatpush.bf16.msrb.mxu0 %v4843_v59  ;;  %v4636_v48 = vld [vmem:[%s10650_s2 + $0x78] sm:$0xf0]  ;;  %v4783_v51 = vor.u32 %v6707_v43, %v4780_v44 }
  0x86   :  { %v5195_v11 = vor.u32 %v6813_v1, %v5194_v63  ;;  %v5322_v13 = vld [vmem:[%s10650_s2 + $0x5c8] sm:$0xf]  ;;  %v6845_v14 = vld [vmem:[%s10650_s2 + $0x5d4] sm:$0xf0]  ;;  %v4764_v59 = vld [vmem:[%s10650_s2 + $0x178] sm:$0xf0]  ;;  %v4639_v61 = vor.u32 %v6671_v47, %v4636_v48 }
  0x87   :  { %v5178_v15 = vld [vmem:[%s10650_s2 + $0x4a8] sm:$0xf]  ;;  %v6809_v16 = vld [vmem:[%s10650_s2 + $0x4b4] sm:$0xf0]  ;;  %1468 = vmatpush.bf16.msra.mxu3 %v4715_v5  ;;  %v5323_v20 = vor.u32 %v6845_v14, %v5322_v13  ;;  %v6667_v63 = vld [vmem:[%s10650_s2 + $0x4c] sm:$0xf] }
  0x88   :  { %1496 = vmatpush.bf16.msra.mxu2 %v4971_v0  ;;  %1483 = vmatmul.bf16.vlgmr.msrb.gmra.mxu0 %v7607_v54  ;;  %v5179_v23 = vor.u32 %v6809_v16, %v5178_v15  ;;  %v5306_v25 = vld [vmem:[%s10650_s2 + $0x5a8] sm:$0xf]  ;;  %v6841_v26 = vld [vmem:[%s10650_s2 + $0x5b4] sm:$0xf0]  ;;  %v4620_v0 = vld [vmem:[%s10650_s2 + $0x58] sm:$0xf0] }
  0x89   :  { %1503 = vmatpush.bf16.msra.mxu1 %v5211_v58  ;;  %1538 = vmatpush.bf16.msra.mxu0 %v5355_v2  ;;  %v5162_v27 = vld [vmem:[%s10650_s2 + $0x488] sm:$0xf]  ;;  %v6805_v28 = vld [vmem:[%s10650_s2 + $0x494] sm:$0xf0]  ;;  %v5307_v32 = vor.u32 %v6841_v26, %v5306_v25  ;;  %v6703_v58 = vld [vmem:[%s10650_s2 + $0x16c] sm:$0xf]  ;;  %v4623_v10 = vor.u32 %v6667_v63, %v4620_v0 }
  0x8a   :  { %1469 = vmatmul.bf16.vlgmr.msra.gmra.mxu3 %v7645_v8  ;;  %1455 = vmatmul.bf16.vlgmr.msrb.gmra.mxu1 %v7609_v55  ;;  %v5163_v35 = vor.u32 %v6805_v28, %v5162_v27  ;;  %v5290_v38 = vld [vmem:[%s10650_s2 + $0x588] sm:$0xf]  ;;  %v6837_v39 = vld [vmem:[%s10650_s2 + $0x594] sm:$0xf0]  ;;  %v4767_v2 = vor.u32 %v6703_v58, %v4764_v59  ;;  %v4604_v13 = vld [vmem:[%s10650_s2 + $0x38] sm:$0xf0] }
  0x8b   :  { %1517 = vmatpush.bf16.msrb.mxu3 %v5339_v7  ;;  %1497 = vmatmul.bf16.vlgmr.msra.gmra.mxu2 %v7620_v60  ;;  %v5146_v40 = vld [vmem:[%s10650_s2 + $0x468] sm:$0xf]  ;;  %v6801_v41 = vld [vmem:[%s10650_s2 + $0x474] sm:$0xf0]  ;;  %v5291_v46 = vor.u32 %v6837_v39, %v5290_v38  ;;  %v6699_v7 = vld [vmem:[%s10650_s2 + $0x14c] sm:$0xf] }
  0x8c   :  { %1545 = vmatpush.bf16.msrb.mxu2 %v4703_v6  ;;  %v5147_v49 = vor.u32 %v6801_v41, %v5146_v40  ;;  %v5274_v52 = vld [vmem:[%s10650_s2 + $0x568] sm:$0xf]  ;;  %v6833_v53 = vld [vmem:[%s10650_s2 + $0x574] sm:$0xf0]  ;;  %v4751_v15 = vor.u32 %v6699_v7, %v4748_v9  ;;  %v4732_v21 = vld [vmem:[%s10650_s2 + $0x138] sm:$0xf0] }
  0x8d   :  { %1504 = vmatpush.bf16.msra.mxu1 %v5195_v11  ;;  %1559 = vmatpush.bf16.msrb.mxu0 %v4831_v12  ;;  %v5130_v56 = vld [vmem:[%s10650_s2 + $0x448] sm:$0xf]  ;;  %v6797_v57 = vld [vmem:[%s10650_s2 + $0x454] sm:$0xf0]  ;;  %v5275_v62 = vor.u32 %v6833_v53, %v5274_v52  ;;  %v6663_v12 = vld [vmem:[%s10650_s2 + $0x2c] sm:$0xf] }
  0x8e   :  { %v5131_v1 = vor.u32 %v6797_v57, %v5130_v56  ;;  %v5258_v3 = vld [vmem:[%s10650_s2 + $0x548] sm:$0xf]  ;;  %v6829_v4 = vld [vmem:[%s10650_s2 + $0x554] sm:$0xf0]  ;;  %v4607_v22 = vor.u32 %v6663_v12, %v4604_v13  ;;  %v6659_v27 = vld [vmem:[%s10650_s2 + $0xc] sm:$0xf] }
  0x8f   :  { %1518 = vmatpush.bf16.msrb.mxu3 %v5323_v20  ;;  %v5114_v5 = vld [vmem:[%s10650_s2 + $0x428] sm:$0xf]  ;;  %v6793_v6 = vld [vmem:[%s10650_s2 + $0x434] sm:$0xf0]  ;;  %v5259_v11 = vor.u32 %v6829_v4, %v5258_v3  ;;  %v6695_v20 = vld [vmem:[%s10650_s2 + $0x12c] sm:$0xf] }
  0x90   :  { %1546 = vmatpush.bf16.msrb.mxu2 %v4687_v19  ;;  %v5115_v14 = vor.u32 %v6793_v6, %v5114_v5  ;;  %v5242_v16 = vld [vmem:[%s10650_s2 + $0x528] sm:$0xf]  ;;  %v6825_v17 = vld [vmem:[%s10650_s2 + $0x534] sm:$0xf0]  ;;  %v4588_v28 = vld [vmem:[%s10650_s2 + $0x18] sm:$0xf0]  ;;  %v4735_v30 = vor.u32 %v6695_v20, %v4732_v21 }
  0x91   :  { %1505 = vmatpush.bf16.msra.mxu1 %v5179_v23  ;;  %1560 = vmatpush.bf16.msrb.mxu0 %v4815_v24  ;;  %v5098_v18 = vld [vmem:[%s10650_s2 + $0x408] sm:$0xf]  ;;  %v6789_v19 = vld [vmem:[%s10650_s2 + $0x414] sm:$0xf0]  ;;  %v6751_v23 = vld [vmem:[%s10650_s2 + $0x2ec] sm:$0xf]  ;;  %v5243_v25 = vor.u32 %v6825_v17, %v5242_v16  ;;  %v4591_v39 = vor.u32 %v6659_v27, %v4588_v28 }
  0x92   :  { %v4956_v24 = vld [vmem:[%s10650_s2 + $0x2f8] sm:$0xf0]  ;;  %v5226_v26 = vld [vmem:[%s10650_s2 + $0x508] sm:$0xf]  ;;  %v5099_v29 = vor.u32 %v6789_v19, %v5098_v18  ;;  %v6747_v38 = vld [vmem:[%s10650_s2 + $0x2cc] sm:$0xf] }
  0x93   :  { %1519 = vmatpush.bf16.msrb.mxu3 %v5307_v32  ;;  %v6783_v32 = vld [vmem:[%s10650_s2 + $0x3ec] sm:$0xf]  ;;  %v5084_v33 = vld [vmem:[%s10650_s2 + $0x3f8] sm:$0xf0]  ;;  %v4959_v34 = vor.u32 %v6751_v23, %v4956_v24  ;;  %s7295_s11 = smov [#allocation2]   ;;  %s7296_s14 = smov 896  }
  0x94   :  { %1547 = vmatpush.bf16.msrb.mxu2 %v4671_v31  ;;  %v6821_v31 = vld [vmem:[%s10650_s2 + $0x514] sm:$0xf0]  ;;  %v4940_v40 = vld [vmem:[%s10650_s2 + $0x2d8] sm:$0xf0]  ;;  %v6691_v41 = vld [vmem:[%s10650_s2 + $0x10c] sm:$0xf]  ;;  %v5087_v47 = vor.u32 %v6783_v32, %v5084_v33 }
  0x95   :  { %1506 = vmatpush.bf16.msra.mxu1 %v5163_v35  ;;  %1561 = vmatpush.bf16.msrb.mxu0 %v4799_v36  ;;  %v6815_v35 = vld [vmem:[%s10650_s2 + $0x4ec] sm:$0xf]  ;;  %v5212_v36 = vld [vmem:[%s10650_s2 + $0x4f8] sm:$0xf0]  ;;  %v5227_v44 = vor.u32 %v6821_v31, %v5226_v26  ;;  %s4544_s12 = sshll.u32 %s7295_s11, 4  ;;  %s4545_s12 = int_to_ptr.vmem [resolvable:$true] %s4544_s12 }
  0x96   :  { %v4716_v43 = vld [vmem:[%s10650_s2 + $0x118] sm:$0xf0]  ;;  %v5215_v48 = vor.u32 %v6815_v35, %v5212_v36  ;;  %v6811_v56 = vld [vmem:[%s10650_s2 + $0x4cc] sm:$0xf] }
  0x97   :  { %1520 = vmatpush.bf16.msrb.mxu3 %v5291_v46  ;;  %v5340_v46 = vld [vmem:[%s10650_s2 + $0x5f8] sm:$0xf0]  ;;  %v4719_v52 = vor.u32 %v6691_v41, %v4716_v43  ;;  %v6743_v59 = vld [vmem:[%s10650_s2 + $0x2ac] sm:$0xf] }
  0x98   :  { %1548 = vmatpush.bf16.msrb.mxu2 %v4655_v45  ;;  %5362 = vmatmul.msk.bf16.vlgmr.msra.gmra.mxu0 %vm1247_vm0, %v7736_v50  ;;  %v6847_v45 = vld [vmem:[%s10650_s2 + $0x5ec] sm:$0xf]  ;;  %v5068_v53 = vld [vmem:[%s10650_s2 + $0x3d8] sm:$0xf0] }
  0x99   :  { %1507 = vmatpush.bf16.msra.mxu1 %v5147_v49  ;;  %1562 = vmatpush.bf16.msrb.mxu0 %v4783_v51  ;;  %v6779_v49 = vld [vmem:[%s10650_s2 + $0x3cc] sm:$0xf]  ;;  %v4943_v51 = vor.u32 %v6747_v38, %v4940_v40  ;;  %v5196_v57 = vld [vmem:[%s10650_s2 + $0x4d8] sm:$0xf0]  ;;  %v5343_v58 = vor.u32 %v6847_v45, %v5340_v46 }
  0x9a   :  { %v5324_v63 = vld [vmem:[%s10650_s2 + $0x5d8] sm:$0xf0]  ;;  %v5071_v0 = vor.u32 %v6779_v49, %v5068_v53  ;;  %v6807_v5 = vld [vmem:[%s10650_s2 + $0x4ac] sm:$0xf] }
  0x9b   :  { %1521 = vmatpush.bf16.msrb.mxu3 %v5275_v62  ;;  %v6843_v62 = vld [vmem:[%s10650_s2 + $0x5cc] sm:$0xf]  ;;  %v5052_v4 = vld [vmem:[%s10650_s2 + $0x3b8] sm:$0xf0] }
  0x9c   :  { %1549 = vmatpush.bf16.msrb.mxu2 %v4639_v61  ;;  %v4924_v61 = vld [vmem:[%s10650_s2 + $0x2b8] sm:$0xf0]  ;;  %v5327_v7 = vor.u32 %v6843_v62, %v5324_v63  ;;  %v6739_v9 = vld [vmem:[%s10650_s2 + $0x28c] sm:$0xf] }
  0x9d   :  { %1508 = vmatpush.bf16.msra.mxu1 %v5131_v1  ;;  %1563 = vmatpush.bf16.msrb.mxu0 %v4767_v2  ;;  %v5199_v1 = vor.u32 %v6811_v56, %v5196_v57  ;;  %v6775_v2 = vld [vmem:[%s10650_s2 + $0x3ac] sm:$0xf]  ;;  %v4927_v3 = vor.u32 %v6743_v59, %v4924_v61  ;;  %v5180_v6 = vld [vmem:[%s10650_s2 + $0x4b8] sm:$0xf0] }
  0x9e   :  { %v5308_v12 = vld [vmem:[%s10650_s2 + $0x5b8] sm:$0xf0]  ;;  %v5055_v13 = vor.u32 %v6775_v2, %v5052_v4  ;;  %v6803_v17 = vld [vmem:[%s10650_s2 + $0x48c] sm:$0xf] }
  0x9f   :  { %1522 = vmatpush.bf16.msrb.mxu3 %v5259_v11  ;;  %v6839_v11 = vld [vmem:[%s10650_s2 + $0x5ac] sm:$0xf]  ;;  %v5164_v18 = vld [vmem:[%s10650_s2 + $0x498] sm:$0xf0] }
  0xa0   :  { %1550 = vmatpush.bf16.msrb.mxu2 %v4623_v10  ;;  %v4908_v10 = vld [vmem:[%s10650_s2 + $0x298] sm:$0xf0]  ;;  %v5311_v19 = vor.u32 %v6839_v11, %v5308_v12  ;;  %v6735_v20 = vld [vmem:[%s10650_s2 + $0x26c] sm:$0xf]  ;;  %v5167_v24 = vor.u32 %v6803_v17, %v5164_v18  ;;  %v8623_v17 = vld [vmem:[%s10651_s3] sm:$0xf] }
  0xa1   :  { %1509 = vmatpush.bf16.msra.mxu1 %v5115_v14  ;;  %1564 = vmatpush.bf16.msrb.mxu0 %v4751_v15  ;;  %v5183_v14 = vor.u32 %v6807_v5, %v5180_v6  ;;  %v6771_v15 = vld [vmem:[%s10650_s2 + $0x38c] sm:$0xf]  ;;  %v4911_v16 = vor.u32 %v6739_v9, %v4908_v10  ;;  %v4892_v21 = vld [vmem:[%s10650_s2 + $0x278] sm:$0xf0] }
  0xa2   :  { %v5292_v23 = vld [vmem:[%s10650_s2 + $0x598] sm:$0xf0]  ;;  %v4895_v26 = vor.u32 %v6735_v20, %v4892_v21  ;;  %v6799_v28 = vld [vmem:[%s10650_s2 + $0x46c] sm:$0xf] }
  0xa3   :  { %1523 = vmatpush.bf16.msrb.mxu3 %v5243_v25  ;;  %v6767_v25 = vld [vmem:[%s10650_s2 + $0x36c] sm:$0xf]  ;;  %v5020_v27 = vld [vmem:[%s10650_s2 + $0x378] sm:$0xf0] }
  0xa4   :  { %1551 = vmatpush.bf16.msrb.mxu2 %v4607_v22  ;;  %v6835_v22 = vld [vmem:[%s10650_s2 + $0x58c] sm:$0xf]  ;;  %v4876_v32 = vld [vmem:[%s10650_s2 + $0x258] sm:$0xf0]  ;;  %v5023_v35 = vor.u32 %v6767_v25, %v5020_v27  ;;  %v1260_v53 = vpop.f32.mrf.mxu0  ;;  %v6867_v27 = vld [vmem:[%s10652_s4 + $0x64] sm:$0xf0] }
  0xa5   :  { %1510 = vmatpush.bf16.msra.mxu1 %v5099_v29  ;;  %1565 = vmatpush.bf16.msrb.mxu0 %v4735_v30  ;;  %v5148_v29 = vld [vmem:[%s10650_s2 + $0x478] sm:$0xf0]  ;;  %v5295_v30 = vor.u32 %v6835_v22, %v5292_v23  ;;  %v6731_v31 = vld [vmem:[%s10650_s2 + $0x24c] sm:$0xf]  ;;  %v5486_v23 = vld [vmem:[%s10652_s4 + $0xf0] sm:$0xf] }
  0xa6   :  { %v6831_v33 = vld [vmem:[%s10650_s2 + $0x56c] sm:$0xf]  ;;  %v5151_v36 = vor.u32 %v6799_v28, %v5148_v29  ;;  %v5004_v40 = vld [vmem:[%s10650_s2 + $0x358] sm:$0xf0] }
  0xa7   :  { %1524 = vmatpush.bf16.msrb.mxu3 %v5227_v44  ;;  %v6763_v38 = vld [vmem:[%s10650_s2 + $0x34c] sm:$0xf]  ;;  %v5132_v43 = vld [vmem:[%s10650_s2 + $0x458] sm:$0xf0] }
  0xa8   :  { %1552 = vmatpush.bf16.msrb.mxu2 %v4591_v39  ;;  %1511 = vmatmul.bf16.vlgmr.msra.gmra.mxu1 %v7833_v37  ;;  %v4879_v39 = vor.u32 %v6731_v31, %v4876_v32  ;;  %v6795_v41 = vld [vmem:[%s10650_s2 + $0x44c] sm:$0xf]  ;;  %v4860_v46 = vld [vmem:[%s10650_s2 + $0x238] sm:$0xf0]  ;;  %v5007_v49 = vor.u32 %v6763_v38, %v5004_v40  ;;  %v8580_v61 = vpop.f32.mrf.mxu1  ;;  %v6865_v38 = vld [vmem:[%s10652_s4 + $0x54] sm:$0xf0] }
  0xa9   :  { %1573 = vmatpush.bf16.msrb.mxu1 %v4959_v34  ;;  %1566 = vmatpush.bf16.msrb.mxu0 %v4719_v52  ;;  %v5276_v34 = vld [vmem:[%s10650_s2 + $0x578] sm:$0xf0]  ;;  %v6727_v45 = vld [vmem:[%s10650_s2 + $0x22c] sm:$0xf] }
  0xaa   :  { %1525 = vmatmul.bf16.vlgmr.msrb.gmra.mxu3 %v7844_v42  ;;  %v5279_v44 = vor.u32 %v6831_v33, %v5276_v34  ;;  %v6759_v52 = vld [vmem:[%s10650_s2 + $0x32c] sm:$0xf]  ;;  %v4863_v56 = vor.u32 %v6727_v45, %v4860_v46  ;;  %v4988_v57 = vld [vmem:[%s10650_s2 + $0x338] sm:$0xf0]  ;;  %v5478_v33 = vld [vmem:[%s10652_s4 + $0xe0] sm:$0xf] }
  0xab   :  { %1587 = vmatpush.bf16.msra.mxu3 %v5087_v47  ;;  %1553 = vmatmul.bf16.vlgmr.msrb.gmra.mxu2 %v7609_v55  ;;  %v5036_v55 = vld [vmem:[%s10650_s2 + $0x398] sm:$0xf0]  ;;  %v6827_v47 = vld [vmem:[%s10650_s2 + $0x54c] sm:$0xf]  ;;  %v4991_v5 = vor.u32 %v6759_v52, %v4988_v57  ;;  %v1302_v31 = vpop.f32.mrf.mxu3  ;;  %v6883_v34 = vld [vmem:[%s10652_s4 + $0xe4] sm:$0xf0] }
  0xac   :  { %1601 = vmatpush.bf16.msra.mxu2 %v5215_v48  ;;  %1567 = vmatmul.bf16.vlgmr.msrb.gmra.mxu0 %v7645_v8  ;;  %v5039_v8 = vor.u32 %v6771_v15, %v5036_v55  ;;  %v5260_v48 = vld [vmem:[%s10650_s2 + $0x558] sm:$0xf0]  ;;  %v6723_v63 = vld [vmem:[%s10650_s2 + $0x20c] sm:$0xf]  ;;  %v5422_v15 = vld [vmem:[%s10652_s4 + $0x70] sm:$0xf]  ;;  %v1262_v29 = vpop.f32.mrf.mxu0 }
  0xad   :  { %1574 = vmatpush.bf16.msrb.mxu1 %v4943_v51  ;;  %1615 = vmatpush.bf16.msra.mxu0 %v5343_v58  ;;  %v5135_v51 = vor.u32 %v6795_v41, %v5132_v43  ;;  %v6791_v58 = vld [vmem:[%s10650_s2 + $0x42c] sm:$0xf]  ;;  %v5116_v59 = vld [vmem:[%s10650_s2 + $0x438] sm:$0xf0]  ;;  %v5263_v62 = vor.u32 %v6827_v47, %v5260_v48  ;;  %v5470_v43 = vld [vmem:[%s10652_s4 + $0xd0] sm:$0xf] }
  0xae   :  { %v5244_v2 = vld [vmem:[%s10650_s2 + $0x538] sm:$0xf0]  ;;  %v5119_v6 = vor.u32 %v6791_v58, %v5116_v59  ;;  %v6755_v10 = vld [vmem:[%s10650_s2 + $0x30c] sm:$0xf]  ;;  %v6879_v52 = vld [vmem:[%s10652_s4 + $0xc4] sm:$0xf0] }
  0xaf   :  { %1588 = vmatpush.bf16.msra.mxu3 %v5071_v0  ;;  %v4844_v0 = vld [vmem:[%s10650_s2 + $0x218] sm:$0xf0]  ;;  %v6787_v12 = vld [vmem:[%s10650_s2 + $0x40c] sm:$0xf]  ;;  %v5390_v57 = vld [vmem:[%s10652_s4 + $0x30] sm:$0xf] }
  0xb0   :  { %1602 = vmatpush.bf16.msra.mxu2 %v5199_v1  ;;  %v6823_v1 = vld [vmem:[%s10650_s2 + $0x52c] sm:$0xf]  ;;  %v5356_v4 = vld [vmem:[%s10650_s2 + $0x618] sm:$0xf0]  ;;  %v4847_v9 = vor.u32 %v6723_v63, %v4844_v0  ;;  %v6861_v58 = vld [vmem:[%s10652_s4 + $0x34] sm:$0xf0] }
  0xb1   :  { %1575 = vmatpush.bf16.msrb.mxu1 %v4927_v3  ;;  %1616 = vmatpush.bf16.msra.mxu0 %v5327_v7  ;;  %v6851_v3 = vld [vmem:[%s10650_s2 + $0x60c] sm:$0xf]  ;;  %v8600_v7 = vpop.f32.mrf.mxu2  ;;  %v4972_v11 = vld [vmem:[%s10650_s2 + $0x318] sm:$0xf0]  ;;  %v5391_v63 = vor.u32 %v6861_v58, %v5390_v57  ;;  %v5454_v0 = vld [vmem:[%s10652_s4 + $0xb0] sm:$0xf] }
  0xb2   :  { %v5359_v55 = vor.u32 %v6851_v3, %v5356_v4  ;;  %v6819_v18 = vld [vmem:[%s10650_s2 + $0x50c] sm:$0xf]  ;;  %v4975_v20 = vor.u32 %v6755_v10, %v4972_v11  ;;  %v5382_v4 = vld [vmem:[%s10652_s4 + $0x20] sm:$0xf] }
  0xb3   :  { %1589 = vmatpush.bf16.msra.mxu3 %v5055_v13  ;;  %v5247_v13 = vor.u32 %v6823_v1, %v5244_v2  ;;  %v6877_v1 = vld [vmem:[%s10652_s4 + $0xb4] sm:$0xf0] }
  0xb4   :  { %1603 = vmatpush.bf16.msra.mxu2 %v5183_v14  ;;  %v5100_v14 = vld [vmem:[%s10650_s2 + $0x418] sm:$0xf0] }
  0xb5   :  { %1576 = vmatpush.bf16.msrb.mxu1 %v4911_v16  ;;  %1617 = vmatpush.bf16.msra.mxu0 %v5311_v19  ;;  %v6869_v16 = vld [vmem:[%s10652_s4 + $0x74] sm:$0xf0]  ;;  %v5228_v19 = vld [vmem:[%s10650_s2 + $0x518] sm:$0xf0]  ;;  %v5103_v21 = vor.u32 %v6787_v12, %v5100_v14  ;;  %v6875_v14 = vld [vmem:[%s10652_s4 + $0xa4] sm:$0xf0] }
  0xb6   :  { %v5423_v22 = vor.u32 %v6869_v16, %v5422_v15  ;;  %v5231_v25 = vor.u32 %v6819_v18, %v5228_v19  ;;  %v5374_v16 = vld [vmem:[%s10652_s4 + $0x10] sm:$0xf]  ;;  %s7297_s2 = smov 56  }
  0xb7   :  { %1590 = vmatpush.bf16.msra.mxu3 %v5039_v8  ;;  %v6885_v8 = vld [vmem:[%s10652_s4 + $0xf4] sm:$0xf0] }
  0xb8   :  { %1604 = vmatpush.bf16.msra.mxu2 %v5167_v24  ;;  %v259_v24 = vperm.slane %v8623_v17, 0  ;;  %v5487_v28 = vor.u32 %v6885_v8, %v5486_v23  ;;  %v5366_v8 = vld [vmem:[%s10652_s4] sm:$0xf] }
  0xb9   :  { %1577 = vmatpush.bf16.msrb.mxu1 %v4895_v26  ;;  %1618 = vmatpush.bf16.msra.mxu0 %v5295_v30  ;;  %v5414_v26 = vld [vmem:[%s10652_s4 + $0x60] sm:$0xf]  ;;  %v1276_v30 = vpop.f32.mrf.mxu1  ;;  %v1290_v40 = vpop.f32.mrf.mxu2 }
  0xba   :  { %v5415_v32 = vor.u32 %v6867_v27, %v5414_v26  ;;  %v6868_v26 = vld [vmem:[%s10652_s4 + $0x74] sm:$0xf]  ;;  %v5424_v27 = vld [vmem:[%s10652_s4 + $0x78] sm:$0xf0] }
  0xbb   :  { %1591 = vmatpush.bf16.msra.mxu3 %v5023_v35  ;;  %v1261_v35 = vadd.f32 %v1260_v53, %v259_v24 }
  0xbc   :  { %1605 = vmatpush.bf16.msra.mxu2 %v5151_v36  ;;  %v1263_v36 = vadd.f32 %v1262_v29, %v259_v24  ;;  %v6855_v24 = vld [vmem:[%s10652_s4 + $0x4] sm:$0xf0] }
  0xbd   :  { %1578 = vmatpush.bf16.msrb.mxu1 %v4879_v39  ;;  %1619 = vmatpush.bf16.msra.mxu0 %v5279_v44  ;;  %v5479_v39 = vor.u32 %v6883_v34, %v5478_v33  ;;  %v6881_v44 = vld [vmem:[%s10652_s4 + $0xd4] sm:$0xf0]  ;;  %v1275_v45 = vadd.f32 %v8580_v61, %v1261_v35  ;;  %v1304_v61 = vpop.f32.mrf.mxu3  ;;  %v5367_v29 = vor.u32 %v6855_v24, %v5366_v8 }
  0xbe   :  { %v1277_v46 = vadd.f32 %v1276_v30, %v1263_v36  ;;  %v5430_v30 = vld [vmem:[%s10652_s4 + $0x80] sm:$0xf]  ;;  %v5427_v34 = vor.u32 %v6868_v26, %v5424_v27  ;;  %v6884_v36 = vld [vmem:[%s10652_s4 + $0xf4] sm:$0xf]  ;;  %v5440_v26 = vld [vmem:[%s10652_s4 + $0x98] sm:$0xf0] }
  0xbf   :  { %1592 = vmatpush.bf16.msra.mxu3 %v5007_v49  ;;  %v1289_v53 = vadd.f32 %v8600_v7, %v1275_v45  ;;  %v6882_v45 = vld [vmem:[%s10652_s4 + $0xe4] sm:$0xf] }
  0xc0   :  { %1606 = vmatpush.bf16.msra.mxu2 %v5135_v51  ;;  %v5462_v51 = vld [vmem:[%s10652_s4 + $0xc0] sm:$0xf] }
  0xc1   :  { %1579 = vmatpush.bf16.msrb.mxu1 %v4863_v56  ;;  %1620 = vmatpush.bf16.msra.mxu0 %v5263_v62  ;;  %v1316_v47 = vpop.f32.mrf.mxu0  ;;  %v1291_v56 = vadd.f32 %v1290_v40, %v1277_v46  ;;  %v5463_v59 = vor.u32 %v6879_v52, %v5462_v51  ;;  %v1344_v62 = vpop.f32.mrf.mxu2  ;;  %v1303_v2 = vadd.f32 %v1302_v31, %v1289_v53  ;;  %v6871_v31 = vld [vmem:[%s10652_s4 + $0x84] sm:$0xf0]  ;;  %v5480_v46 = vld [vmem:[%s10652_s4 + $0xe8] sm:$0xf0]  ;;  %v6862_v51 = vld [vmem:[%s10652_s4 + $0x44] sm:$0xf] }
  0xc2   :  { %v1330_v48 = vpop.f32.mrf.mxu1  ;;  %v5431_v35 = vor.u32 %v6871_v31, %v5430_v30  ;;  %v5400_v52 = vld [vmem:[%s10652_s4 + $0x48] sm:$0xf0] }
  0xc3   :  { %1593 = vmatpush.bf16.msra.mxu3 %v4991_v5  ;;  %v1305_v3 = vadd.f32 %v1304_v61, %v1291_v56  ;;  %v6859_v5 = vld [vmem:[%s10652_s4 + $0x24] sm:$0xf0]  ;;  %v5403_v58 = vor.u32 %v6862_v51, %v5400_v52  ;;  %v5464_v61 = vld [vmem:[%s10652_s4 + $0xc8] sm:$0xf0]  ;;  %v6893_v51 = vld [vmem:[%s10652_s4 + $0x134] sm:$0xf0] }
  0xc4   :  { %1607 = vmatpush.bf16.msra.mxu2 %v5119_v6  ;;  %v5455_v6 = vor.u32 %v6877_v1, %v5454_v0  ;;  %v5383_v12 = vor.u32 %v6859_v5, %v5382_v4  ;;  %v6858_v4 = vld [vmem:[%s10652_s4 + $0x24] sm:$0xf]  ;;  %v5384_v5 = vld [vmem:[%s10652_s4 + $0x28] sm:$0xf0] }
  0xc5   :  { %1580 = vmatpush.bf16.msrb.mxu1 %v4847_v9  ;;  %1621 = vmatpush.bf16.msra.mxu0 %v5247_v13  ;;  %v1317_v9 = vadd.f32 %v1316_v47, %v1303_v2  ;;  %v5446_v13 = vld [vmem:[%s10652_s4 + $0xa0] sm:$0xf]  ;;  %v6876_v2 = vld [vmem:[%s10652_s4 + $0xb4] sm:$0xf] }
  0xc7   :  { %1594 = vmatpush.bf16.msra.mxu3 %v4975_v20  ;;  %v1331_v18 = vadd.f32 %v1330_v48, %v1317_v9  ;;  %v6880_v48 = vld [vmem:[%s10652_s4 + $0xd4] sm:$0xf] }
  0xc8   :  { %1581 = vmatmul.bf16.vlgmr.msrb.gmra.mxu1 %v7607_v54  ;;  %1608 = vmatpush.bf16.msra.mxu2 %v5103_v21  ;;  %v5406_v54 = vld [vmem:[%s10652_s4 + $0x50] sm:$0xf] }
  0xc9   :  { %1636 = vmatpush.bf16.msra.mxu1 %v5359_v55  ;;  %1622 = vmatpush.bf16.msra.mxu0 %v5231_v25  ;;  %v5407_v41 = vor.u32 %v6865_v38, %v5406_v54  ;;  %v1318_v7 = vpop.f32.mrf.mxu0  ;;  %v5447_v55 = vor.u32 %v6875_v14, %v5446_v13  ;;  %v1346_v19 = vpop.f32.mrf.mxu2  ;;  %v5438_v21 = vld [vmem:[%s10652_s4 + $0x90] sm:$0xf]  ;;  %v5488_v54 = vld [vmem:[%s10652_s4 + $0xf8] sm:$0xf0]  ;;  %v6866_v38 = vld [vmem:[%s10652_s4 + $0x64] sm:$0xf] }
  0xca   :  { %1595 = vmatmul.bf16.vlgmr.msra.gmra.mxu3 %v7620_v60  ;;  %v5398_v60 = vld [vmem:[%s10652_s4 + $0x40] sm:$0xf]  ;;  %v1319_v10 = vadd.f32 %v1318_v7, %v1305_v3  ;;  %v1332_v11 = vpop.f32.mrf.mxu1  ;;  %v8736_v33 = vpop.f32.mrf.mxu3  ;;  %v5491_v40 = vor.u32 %v6884_v36, %v5488_v54  ;;  %v5456_v3 = vld [vmem:[%s10652_s4 + $0xb8] sm:$0xf0] }
  0xcb   :  { %2045 = vmatpush.bf16.msrb.mxu3 %v5423_v22  ;;  %1609 = vmatmul.bf16.vlgmr.msra.gmra.mxu2 %v7833_v37  ;;  %v6863_v37 = vld [vmem:[%s10652_s4 + $0x44] sm:$0xf0]  ;;  %v6873_v22 = vld [vmem:[%s10652_s4 + $0x94] sm:$0xf0] }
  0xcc   :  { %1623 = vmatmul.bf16.vlgmr.msra.gmra.mxu0 %v7844_v42  ;;  %v5471_v42 = vor.u32 %v6881_v44, %v5470_v43  ;;  %v5399_v49 = vor.u32 %v6863_v37, %v5398_v60  ;;  %v1333_v15 = vadd.f32 %v1332_v11, %v1319_v10  ;;  %v5439_v25 = vor.u32 %v6873_v22, %v5438_v21  ;;  %v6864_v60 = vld [vmem:[%s10652_s4 + $0x54] sm:$0xf]  ;;  %v5408_v37 = vld [vmem:[%s10652_s4 + $0x58] sm:$0xf0]  ;;  %v5550_v10 = vld [vmem:[%s10652_s4 + $0x170] sm:$0xf] }
  0xcd   :  { %2059 = vmatpush.bf16.msrb.mxu1 %v5487_v28  ;;  %v1345_v28 = vadd.f32 %v1344_v62, %v1331_v18  ;;  %v5411_v47 = vor.u32 %v6864_v60, %v5408_v37  ;;  %v6860_v62 = vld [vmem:[%s10652_s4 + $0x34] sm:$0xf]  ;;  %v6901_v11 = vld [vmem:[%s10652_s4 + $0x174] sm:$0xf0]  ;;  %v5376_v18 = vld [vmem:[%s10652_s4 + $0x18] sm:$0xf0] }
  0xce   :  { %v1347_v23 = vadd.f32 %v1346_v19, %v1333_v15  ;;  %v5551_v13 = vor.u32 %v6901_v11, %v5550_v10  ;;  %v5387_v15 = vor.u32 %v6858_v4, %v5384_v5  ;;  %v5542_v21 = vld [vmem:[%s10652_s4 + $0x160] sm:$0xf]  ;;  %v6899_v22 = vld [vmem:[%s10652_s4 + $0x164] sm:$0xf0] }
  0xcf   :  { %2046 = vmatpush.bf16.msrb.mxu3 %v5415_v32  ;;  %v5543_v8 = vor.u32 %v6899_v22, %v5542_v21  ;;  %v6895_v60 = vld [vmem:[%s10652_s4 + $0x144] sm:$0xf0]  ;;  %v5494_v10 = vld [vmem:[%s10652_s4 + $0x100] sm:$0xf]  ;;  %v6917_v21 = vld [vmem:[%s10652_s4 + $0x1f4] sm:$0xf0] }
  0xd0   :  { %v1647_v32 = vmax.f32 %v1347_v23, 0.0  ;;  %2073 = vmatpush.bf16.msrb.mxu2 %v5551_v13  ;;  %v6887_v11 = vld [vmem:[%s10652_s4 + $0x104] sm:$0xf0] }
  0xd1   :  { %2060 = vmatpush.bf16.msrb.mxu1 %v5479_v39  ;;  %v5416_v39 = vld [vmem:[%s10652_s4 + $0x68] sm:$0xf0]  ;;  %v1372_v56 = vpop.f32.mrf.mxu2  ;;  %v5495_v13 = vor.u32 %v6887_v11, %v5494_v10 }
  0xd2   :  { %v5419_v44 = vor.u32 %v6866_v38, %v5416_v39  ;;  %v1360_v57 = vpop.f32.mrf.mxu3  ;;  %v6870_v39 = vld [vmem:[%s10652_s4 + $0x84] sm:$0xf] }
  0xd3   :  { %2047 = vmatpush.bf16.msrb.mxu3 %v5407_v41  ;;  %v1643_v41 = vmax.f32 %v1345_v28, 0.0  ;;  %v6854_v28 = vld [vmem:[%s10652_s4 + $0x4] sm:$0xf] }
  0xd4   :  { %2074 = vmatpush.bf16.msrb.mxu2 %v5543_v8  ;;  %v6896_v8 = vld [vmem:[%s10652_s4 + $0x154] sm:$0xf] }
  0xd5   :  { %2061 = vmatpush.bf16.msrb.mxu1 %v5471_v42  ;;  %v8750_v43 = vpack.c.bf16 %v1647_v32, %v1643_v41  ;;  %v5483_v42 = vor.u32 %v6882_v45, %v5480_v46  ;;  %v5534_v32 = vld [vmem:[%s10652_s4 + $0x150] sm:$0xf]  ;;  %v5526_v46 = vld [vmem:[%s10652_s4 + $0x140] sm:$0xf] }
  0xd7   :  { %2048 = vmatpush.bf16.msrb.mxu3 %v5399_v49  ;;  %v5472_v49 = vld [vmem:[%s10652_s4 + $0xd8] sm:$0xf0] }
  0xd8   :  { %5363 = vmatmul.msk.bf16.vlgmr.msra.gmra.mxu1 %vm1247_vm0, %v7736_v50  ;;  %v6857_v50 = vld [vmem:[%s10652_s4 + $0x14] sm:$0xf0]  ;;  %v5475_v53 = vor.u32 %v6880_v48, %v5472_v49  ;;  %v5518_v49 = vld [vmem:[%s10652_s4 + $0x130] sm:$0xf] }
  0xd9   :  { %2062 = vmatpush.bf16.msrb.mxu1 %v5463_v59  ;;  %v5375_v20 = vor.u32 %v6857_v50, %v5374_v16  ;;  %v6878_v59 = vld [vmem:[%s10652_s4 + $0xc4] sm:$0xf]  ;;  %v1374_v14 = vpop.f32.mrf.mxu2  ;;  %v5448_v50 = vld [vmem:[%s10652_s4 + $0xa8] sm:$0xf0] }
  0xda   :  { %v5467_v0 = vor.u32 %v6878_v59, %v5464_v61  ;;  %v6874_v16 = vld [vmem:[%s10652_s4 + $0xa4] sm:$0xf]  ;;  %v5510_v61 = vld [vmem:[%s10652_s4 + $0x120] sm:$0xf] }
  0xdb   :  { %2049 = vmatpush.bf16.msrb.mxu3 %v5391_v63  ;;  %v5392_v63 = vld [vmem:[%s10652_s4 + $0x38] sm:$0xf0]  ;;  %v5451_v19 = vor.u32 %v6874_v16, %v5448_v50  ;;  %v6898_v50 = vld [vmem:[%s10652_s4 + $0x164] sm:$0xf] }
  0xdc   :  { %v5395_v1 = vor.u32 %v6860_v62, %v5392_v63  ;;  %v6891_v62 = vld [vmem:[%s10652_s4 + $0x124] sm:$0xf0] }
  0xdd   :  { %2063 = vmatpush.bf16.msrb.mxu1 %v5455_v6  ;;  %v5459_v6 = vor.u32 %v6876_v2, %v5456_v3 }
  0xdf   :  { %2050 = vmatpush.bf16.msrb.mxu3 %v5383_v12  ;;  %v260_v12 = vperm.slane %v8623_v17, 1 }
  0xe1   :  { %2064 = vmatpush.bf16.msrb.mxu1 %v5447_v55  ;;  %v1386_v7 = vpop.f32.mrf.mxu0  ;;  %v6856_v55 = vld [vmem:[%s10652_s4 + $0x14] sm:$0xf]  ;;  %v1359_v23 = vadd.f32 %v8736_v33, %v260_v12  ;;  %v1361_v27 = vadd.f32 %v1360_v57, %v260_v12  ;;  %v6897_v33 = vld [vmem:[%s10652_s4 + $0x154] sm:$0xf0] }
  0xe2   :  { %v5379_v24 = vor.u32 %v6856_v55, %v5376_v18  ;;  %v5544_v55 = vld [vmem:[%s10652_s4 + $0x168] sm:$0xf0] }
  0xe3   :  { %2051 = vmatpush.bf16.msrb.mxu3 %v5375_v20  ;;  %v1400_v20 = vpop.f32.mrf.mxu1  ;;  %v1375_v41 = vadd.f32 %v1374_v14, %v1361_v27  ;;  %v6900_v14 = vld [vmem:[%s10652_s4 + $0x174] sm:$0xf]  ;;  %v6915_v27 = vld [vmem:[%s10652_s4 + $0x1e4] sm:$0xf0] }
  0xe5   :  { %2065 = vmatpush.bf16.msrb.mxu1 %v5439_v25  ;;  %v6872_v25 = vld [vmem:[%s10652_s4 + $0x94] sm:$0xf] }
  0xe6   :  { %v5443_v30 = vor.u32 %v6872_v25, %v5440_v26  ;;  %v5606_v26 = vld [vmem:[%s10652_s4 + $0x1e0] sm:$0xf] }
  0xe7   :  { %2052 = vmatpush.bf16.msrb.mxu3 %v5367_v29  ;;  %v5368_v29 = vld [vmem:[%s10652_s4 + $0x8] sm:$0xf0] }
  0xe8   :  { %v5371_v38 = vor.u32 %v6854_v28, %v5368_v29  ;;  %v5607_v28 = vor.u32 %v6915_v27, %v5606_v26  ;;  %v6894_v29 = vld [vmem:[%s10652_s4 + $0x144] sm:$0xf] }
  0xe9   :  { %2066 = vmatpush.bf16.msrb.mxu1 %v5431_v35  ;;  %v1414_v9 = vpop.f32.mrf.mxu3  ;;  %v5535_v35 = vor.u32 %v6897_v33, %v5534_v32  ;;  %v1388_v36 = vpop.f32.mrf.mxu0  ;;  %v5598_v32 = vld [vmem:[%s10652_s4 + $0x1d0] sm:$0xf]  ;;  %v6913_v33 = vld [vmem:[%s10652_s4 + $0x1d4] sm:$0xf0] }
  0xea   :  { %2053 = vmatmul.bf16.vlgmr.msrb.gmra.mxu3 %v8750_v43  ;;  %v1389_v37 = vadd.f32 %v1388_v36, %v1375_v41  ;;  %v5590_v41 = vld [vmem:[%s10652_s4 + $0x1c0] sm:$0xf] }
  0xeb   :  { %2101 = vmatpush.bf16.msra.mxu3 %v5427_v34  ;;  %v1373_v34 = vadd.f32 %v1372_v56, %v1359_v23  ;;  %2075 = vmatpush.bf16.msrb.mxu2 %v5535_v35  ;;  %v5599_v35 = vor.u32 %v6913_v33, %v5598_v32  ;;  %v5600_v32 = vld [vmem:[%s10652_s4 + $0x1d8] sm:$0xf0] }
  0xed   :  { %2115 = vmatpush.bf16.msra.mxu1 %v5491_v40  ;;  %v5432_v40 = vld [vmem:[%s10652_s4 + $0x88] sm:$0xf0] }
  0xee   :  { %v1428_v54 = vpop.f32.mrf.mxu2  ;;  %v5435_v45 = vor.u32 %v6870_v39, %v5432_v40  ;;  %v261_v39 = vperm.slane %v8623_v17, 2 }
  0xef   :  { %2102 = vmatpush.bf16.msra.mxu3 %v5419_v44  ;;  %v1387_v44 = vadd.f32 %v1386_v7, %v1373_v34 }
  0xf1   :  { %2116 = vmatpush.bf16.msra.mxu1 %v5483_v42  ;;  %v1416_v31 = vpop.f32.mrf.mxu3  ;;  %v5527_v42 = vor.u32 %v6895_v60, %v5526_v46  ;;  %v1401_v48 = vadd.f32 %v1400_v20, %v1387_v44  ;;  %v5614_v20 = vld [vmem:[%s10652_s4 + $0x1f0] sm:$0xf]  ;;  %v6911_v44 = vld [vmem:[%s10652_s4 + $0x1c4] sm:$0xf0]  ;;  %v6890_v60 = vld [vmem:[%s10652_s4 + $0x124] sm:$0xf] }
  0xf2   :  { %v5615_v22 = vor.u32 %v6917_v21, %v5614_v20  ;;  %v5591_v46 = vor.u32 %v6911_v44, %v5590_v41 }
  0xf3   :  { %2103 = vmatpush.bf16.msra.mxu3 %v5411_v47  ;;  %v1402_v47 = vpop.f32.mrf.mxu1  ;;  %2076 = vmatpush.bf16.msrb.mxu2 %v5527_v42  ;;  %v1415_v56 = vadd.f32 %v1414_v9, %v1401_v48  ;;  %v5582_v48 = vld [vmem:[%s10652_s4 + $0x1b0] sm:$0xf] }
  0xf4   :  { %v1403_v57 = vadd.f32 %v1402_v47, %v1389_v37  ;;  %2087 = vmatpush.bf16.msrb.mxu0 %v5615_v22  ;;  %v5512_v37 = vld [vmem:[%s10652_s4 + $0x128] sm:$0xf0] }
  0xf5   :  { %2117 = vmatpush.bf16.msra.mxu1 %v5475_v53  ;;  %v5519_v53 = vor.u32 %v6893_v51, %v5518_v49  ;;  %v1429_v63 = vadd.f32 %v1428_v54, %v1415_v56  ;;  %v6892_v54 = vld [vmem:[%s10652_s4 + $0x134] sm:$0xf]  ;;  %v5515_v47 = vor.u32 %v6890_v60, %v5512_v37  ;;  %v6909_v49 = vld [vmem:[%s10652_s4 + $0x1b4] sm:$0xf0]  ;;  %v5584_v60 = vld [vmem:[%s10652_s4 + $0x1b8] sm:$0xf0] }
  0xf6   :  { %v1430_v59 = vpop.f32.mrf.mxu2  ;;  %v5583_v51 = vor.u32 %v6909_v49, %v5582_v48 }
  0xf7   :  { %2104 = vmatpush.bf16.msra.mxu3 %v5403_v58  ;;  %v1417_v58 = vadd.f32 %v1416_v31, %v1403_v57  ;;  %2077 = vmatpush.bf16.msrb.mxu2 %v5519_v53  ;;  %v6888_v57 = vld [vmem:[%s10652_s4 + $0x114] sm:$0xf] }
  0xf8   :  { %2088 = vmatpush.bf16.msrb.mxu0 %v5607_v28 }
  0xf9   :  { %2118 = vmatpush.bf16.msra.mxu1 %v5467_v0  ;;  %v1442_v52 = vpop.f32.mrf.mxu3  ;;  %v5511_v0 = vor.u32 %v6891_v62, %v5510_v61  ;;  %v1431_v2 = vadd.f32 %v1430_v59, %v1417_v58  ;;  %v5504_v58 = vld [vmem:[%s10652_s4 + $0x118] sm:$0xf0] }
  0xfa   :  { %v1443_v3 = vadd.f32 %v1442_v52, %v1429_v63  ;;  %v5507_v62 = vor.u32 %v6888_v57, %v5504_v58  ;;  %v5574_v63 = vld [vmem:[%s10652_s4 + $0x1a0] sm:$0xf]  ;;  %v5568_v57 = vld [vmem:[%s10652_s4 + $0x198] sm:$0xf0] }
  0xfb   :  { %2105 = vmatpush.bf16.msra.mxu3 %v5395_v1  ;;  %v5502_v1 = vld [vmem:[%s10652_s4 + $0x110] sm:$0xf]  ;;  %2078 = vmatpush.bf16.msrb.mxu2 %v5511_v0  ;;  %v6907_v0 = vld [vmem:[%s10652_s4 + $0x1a4] sm:$0xf0] }
  0xfc   :  { %v1644_v7 = vmax.f32 %v1443_v3, 0.0  ;;  %2089 = vmatpush.bf16.msrb.mxu0 %v5599_v35  ;;  %v5496_v3 = vld [vmem:[%s10652_s4 + $0x108] sm:$0xf0] }
  0xfd   :  { %2119 = vmatpush.bf16.msra.mxu1 %v5459_v6 }
  0xff   :  { %2106 = vmatpush.bf16.msra.mxu3 %v5387_v15  ;;  %v5552_v15 = vld [vmem:[%s10652_s4 + $0x178] sm:$0xf0] }
 0x100   :  { %v5555_v16 = vor.u32 %v6900_v14, %v5552_v15  ;;  %2090 = vmatpush.bf16.msrb.mxu0 %v5591_v46  ;;  %v5558_v15 = vld [vmem:[%s10652_s4 + $0x180] sm:$0xf]  ;;  %v6908_v46 = vld [vmem:[%s10652_s4 + $0x1b4] sm:$0xf] }
 0x101   :  { %2120 = vmatpush.bf16.msra.mxu1 %v5451_v19  ;;  %v1444_v5 = vpop.f32.mrf.mxu3  ;;  %v5547_v19 = vor.u32 %v6898_v50, %v5544_v55  ;;  %v5587_v37 = vor.u32 %v6908_v46, %v5584_v60  ;;  %v9079_v46 = vld [vmem:[%s10653_s5] sm:$0x3]  ;;  %s4546_s5 = sshll.u32 %s10658_s10, 4  ;;  %s4547_s5 = int_to_ptr.hbm [resolvable:$true] %s4546_s5 }
 0x102   :  { %v1445_v6 = vadd.f32 %v1444_v5, %v1431_v2  ;;  %v6886_v2 = vld [vmem:[%s10652_s4 + $0x104] sm:$0xf] }
 0x103   :  { %2107 = vmatpush.bf16.msra.mxu3 %v5379_v24  ;;  %v5536_v24 = vld [vmem:[%s10652_s4 + $0x158] sm:$0xf0] }
 0x104   :  { %v1648_v9 = vmax.f32 %v1445_v6, 0.0  ;;  %v5539_v25 = vor.u32 %v6896_v8, %v5536_v24  ;;  %2091 = vmatpush.bf16.msrb.mxu0 %v5583_v51  ;;  %v5499_v6 = vor.u32 %v6886_v2, %v5496_v3  ;;  %v6914_v24 = vld [vmem:[%s10652_s4 + $0x1e4] sm:$0xf] }
 0x105   :  { %2121 = vmatpush.bf16.msra.mxu1 %v5443_v30  ;;  %v1484_v18 = vpop.f32.mrf.mxu0  ;;  %v5528_v30 = vld [vmem:[%s10652_s4 + $0x148] sm:$0xf0] }
 0x106   :  { %v1652_v12 = vpack.c.bf16 %v1648_v9, %v1644_v7  ;;  %v5531_v31 = vor.u32 %v6894_v29, %v5528_v30  ;;  %v5566_v7 = vld [vmem:[%s10652_s4 + $0x190] sm:$0xf]  ;;  %v6905_v9 = vld [vmem:[%s10652_s4 + $0x194] sm:$0xf0] }
 0x107   :  { %2108 = vmatpush.bf16.msra.mxu3 %v5371_v38  ;;  %v1456_v23 = vpop.f32.mrf.mxu1  ;;  %v5520_v38 = vld [vmem:[%s10652_s4 + $0x138] sm:$0xf0]  ;;  %v5567_v10 = vor.u32 %v6905_v9, %v5566_v7 }
 0x108   :  { %2067 = vmatmul.bf16.vlgmr.msrb.gmra.mxu1 %v1652_v12  ;;  %v5523_v40 = vor.u32 %v6892_v54, %v5520_v38  ;;  %v1457_v42 = vadd.f32 %v1456_v23, %v261_v39 }
 0x109   :  { %2122 = vmatpush.bf16.msra.mxu1 %v5435_v45 }
 0x10a   :  { %2109 = vmatmul.bf16.vlgmr.msra.gmra.mxu3 %v8750_v43  ;;  %v6889_v43 = vld [vmem:[%s10652_s4 + $0x114] sm:$0xf0] }
 0x10b   :  { %v5503_v4 = vor.u32 %v6889_v43, %v5502_v1  ;;  %v5575_v43 = vor.u32 %v6907_v0, %v5574_v63 }
 0x10d   :  { %2079 = vmatpush.bf16.msrb.mxu2 %v5503_v4  ;;  %v1470_v34 = vpop.f32.mrf.mxu3  ;;  %v1486_v36 = vpop.f32.mrf.mxu0  ;;  %2092 = vmatpush.bf16.msrb.mxu0 %v5575_v43 }
 0x10e   :  { %v1498_v53 = vpop.f32.mrf.mxu2  ;;  %v1471_v59 = vadd.f32 %v1470_v34, %v1457_v42  ;;  %v6906_v42 = vld [vmem:[%s10652_s4 + $0x1a4] sm:$0xf] }
 0x10f   :  { %v1458_v45 = vpop.f32.mrf.mxu1 }
 0x110   :  { %v1459_v61 = vadd.f32 %v1458_v45, %v261_v39  ;;  %v1485_v4 = vadd.f32 %v1484_v18, %v1471_v59  ;;  %v6916_v18 = vld [vmem:[%s10652_s4 + $0x1f4] sm:$0xf]  ;;  %v6910_v39 = vld [vmem:[%s10652_s4 + $0x1c4] sm:$0xf]  ;;  %v262_v45 = vperm.slane %v8623_v17, 3 }
 0x111   :  { %2080 = vmatpush.bf16.msrb.mxu2 %v5495_v13  ;;  %2093 = vmatpush.bf16.msrb.mxu0 %v5567_v10  ;;  %v6902_v59 = vld [vmem:[%s10652_s4 + $0x184] sm:$0xf] }
 0x115   :  { %2129 = vmatpush.bf16.msra.mxu2 %v5555_v16  ;;  %v1540_v52 = vpop.f32.mrf.mxu0  ;;  %v1472_v56 = vpop.f32.mrf.mxu3  ;;  %v6903_v16 = vld [vmem:[%s10652_s4 + $0x184] sm:$0xf0] }
 0x116   :  { %v1473_v5 = vadd.f32 %v1472_v56, %v1459_v61  ;;  %v1500_v50 = vpop.f32.mrf.mxu2  ;;  %v5559_v55 = vor.u32 %v6903_v16, %v5558_v15  ;;  %v6904_v56 = vld [vmem:[%s10652_s4 + $0x194] sm:$0xf]  ;;  %v5560_v61 = vld [vmem:[%s10652_s4 + $0x188] sm:$0xf0] }
 0x117   :  { %v5571_v58 = vor.u32 %v6904_v56, %v5568_v57 }
 0x118   :  { %2123 = vmatmul.bf16.vlgmr.msra.gmra.mxu1 %v1652_v12  ;;  %v1499_v12 = vadd.f32 %v1498_v53, %v1485_v4  ;;  %v1487_v13 = vadd.f32 %v1486_v36, %v1473_v5  ;;  %2094 = vmatpush.bf16.msrb.mxu0 %v5559_v55 }
 0x119   :  { %2130 = vmatpush.bf16.msra.mxu2 %v5547_v19  ;;  %v5616_v19 = vld [vmem:[%s10652_s4 + $0x1f8] sm:$0xf0] }
 0x11a   :  { %v5619_v21 = vor.u32 %v6916_v18, %v5616_v19  ;;  %v1501_v23 = vadd.f32 %v1500_v50, %v1487_v13 }
 0x11c   :  { %2143 = vmatpush.bf16.msra.mxu0 %v5619_v21 }
 0x11d   :  { %2131 = vmatpush.bf16.msra.mxu2 %v5539_v25  ;;  %v1542_v14 = vpop.f32.mrf.mxu0  ;;  %v5608_v25 = vld [vmem:[%s10652_s4 + $0x1e8] sm:$0xf0] }
 0x11e   :  { %v5611_v27 = vor.u32 %v6914_v24, %v5608_v25  ;;  %v5736_v25 = vld [vmem:[%s10654_s6 + $0xf0] sm:$0xf0] }
 0x120   :  { %2144 = vmatpush.bf16.msra.mxu0 %v5611_v27  ;;  %v6949_v27 = vld [vmem:[%s10654_s6 + $0xf4] sm:$0xf0] }
 0x121   :  { %2132 = vmatpush.bf16.msra.mxu2 %v5531_v31  ;;  %v6912_v31 = vld [vmem:[%s10652_s4 + $0x1d4] sm:$0xf] }
 0x122   :  { %v5603_v35 = vor.u32 %v6912_v31, %v5600_v32  ;;  %v5744_v31 = vld [vmem:[%s10654_s6 + $0xf8] sm:$0xf0] }
 0x124   :  { %2145 = vmatpush.bf16.msra.mxu0 %v5603_v35  ;;  %v6942_v35 = vld [vmem:[%s10654_s6 + $0xc4] sm:$0xf] }
 0x125   :  { %2133 = vmatpush.bf16.msra.mxu2 %v5523_v40  ;;  %v1512_v1 = vpop.f32.mrf.mxu1  ;;  %v5592_v40 = vld [vmem:[%s10652_s4 + $0x1c8] sm:$0xf0] }
 0x126   :  { %v1513_v20 = vadd.f32 %v1512_v1, %v1499_v12  ;;  %v5595_v44 = vor.u32 %v6910_v39, %v5592_v40  ;;  %v5563_v1 = vor.u32 %v6902_v59, %v5560_v61  ;;  %v6945_v39 = vld [vmem:[%s10654_s6 + $0xd4] sm:$0xf0]  ;;  %v5712_v59 = vld [vmem:[%s10654_s6 + $0xb8] sm:$0xf0]  ;;  %v1721_v61 = vperm.slane %v9079_v46, 0 }
 0x128   :  { %2146 = vmatpush.bf16.msra.mxu0 %v5595_v44  ;;  %v6943_v44 = vld [vmem:[%s10654_s6 + $0xcc] sm:$0xf] }
 0x129   :  { %2134 = vmatpush.bf16.msra.mxu2 %v5515_v47  ;;  %v1568_v34 = vpop.f32.mrf.mxu0  ;;  %v5576_v47 = vld [vmem:[%s10652_s4 + $0x1a8] sm:$0xf0] }
 0x12a   :  { %v5579_v51 = vor.u32 %v6906_v42, %v5576_v47  ;;  %v6940_v42 = vld [vmem:[%s10654_s6 + $0xac] sm:$0xf0]  ;;  %v6938_v47 = vld [vmem:[%s10654_s6 + $0xa4] sm:$0xf] }
 0x12c   :  { %2147 = vmatpush.bf16.msra.mxu0 %v5587_v37  ;;  %v5702_v37 = vld [vmem:[%s10654_s6 + $0xa0] sm:$0xf] }
 0x12d   :  { %2135 = vmatpush.bf16.msra.mxu2 %v5507_v62  ;;  %v1526_v11 = vpop.f32.mrf.mxu3  ;;  %v1514_v22 = vpop.f32.mrf.mxu1 }
 0x12e   :  { %v1527_v8 = vadd.f32 %v1526_v11, %v1513_v20  ;;  %v1515_v26 = vadd.f32 %v1514_v22, %v1501_v23  ;;  %v1554_v36 = vpop.f32.mrf.mxu2  ;;  %v5734_v22 = vld [vmem:[%s10654_s6 + $0xe0] sm:$0xf]  ;;  %v6948_v23 = vld [vmem:[%s10654_s6 + $0xec] sm:$0xf0] }
 0x12f   :  { %v1555_v48 = vadd.f32 %v1554_v36, %v262_v45  ;;  %v5735_v24 = vor.u32 %v6948_v23, %v5734_v22  ;;  %v6931_v22 = vld [vmem:[%s10654_s6 + $0x6c] sm:$0xf]  ;;  %v5680_v23 = vld [vmem:[%s10654_s6 + $0x78] sm:$0xf0] }
 0x130   :  { %v1541_v29 = vadd.f32 %v1540_v52, %v1527_v8  ;;  %2148 = vmatpush.bf16.msra.mxu0 %v5579_v51  ;;  %v6946_v8 = vld [vmem:[%s10654_s6 + $0xe4] sm:$0xf]  ;;  %v5704_v51 = vld [vmem:[%s10654_s6 + $0xb0] sm:$0xf0] }
 0x131   :  { %2136 = vmatpush.bf16.msra.mxu2 %v5499_v6  ;;  %v1570_v49 = vpop.f32.mrf.mxu0  ;;  %v1569_v53 = vadd.f32 %v1568_v34, %v1555_v48  ;;  %2372 = vmatpush.bf16.msrb.mxu3 %v5735_v24  ;;  %v6944_v34 = vld [vmem:[%s10654_s6 + $0xcc] sm:$0xf0]  ;;  %v5707_v56 = vor.u32 %v6938_v47, %v5704_v51  ;;  %v6922_v47 = vld [vmem:[%s10654_s6 + $0x24] sm:$0xf] }
 0x132   :  { %v1645_v54 = vmax.f32 %v1541_v29, 0.0 }
 0x134   :  { %2149 = vmatpush.bf16.msra.mxu0 %v5571_v58  ;;  %v6939_v58 = vld [vmem:[%s10654_s6 + $0xac] sm:$0xf] }
 0x135   :  { %v1528_v28 = vpop.f32.mrf.mxu3 }
 0x136   :  { %v1529_v30 = vadd.f32 %v1528_v28, %v1515_v26  ;;  %v1556_v52 = vpop.f32.mrf.mxu2  ;;  %v5742_v26 = vld [vmem:[%s10654_s6 + $0xe8] sm:$0xf]  ;;  %v5739_v28 = vor.u32 %v6946_v8, %v5736_v25  ;;  %v5683_v25 = vor.u32 %v6931_v22, %v5680_v23 }
 0x137   :  { %v1557_v43 = vadd.f32 %v1556_v52, %v262_v45  ;;  %v5743_v29 = vor.u32 %v6949_v27, %v5742_v26  ;;  %v5728_v45 = vld [vmem:[%s10654_s6 + $0xd8] sm:$0xf0]  ;;  %v5710_v52 = vld [vmem:[%s10654_s6 + $0xa8] sm:$0xf]  ;;  %v5654_v27 = vld [vmem:[%s10654_s6 + $0x40] sm:$0xf] }
 0x138   :  { %v1543_v33 = vadd.f32 %v1542_v14, %v1529_v30  ;;  %2150 = vmatpush.bf16.msra.mxu0 %v5563_v1  ;;  %v6947_v30 = vld [vmem:[%s10654_s6 + $0xec] sm:$0xf]  ;;  %2386 = vmatpush.bf16.msrb.mxu1 %v5739_v28  ;;  %v5731_v60 = vor.u32 %v6943_v44, %v5728_v45  ;;  %v6936_v1 = vld [vmem:[%s10654_s6 + $0x8c] sm:$0xf0]  ;;  %v1722_v45 = vperm.slane %v9079_v46, 1 }
 0x139   :  { %v1571_v5 = vadd.f32 %v1570_v49, %v1557_v43  ;;  %v5747_v32 = vor.u32 %v6947_v30, %v5744_v31  ;;  %v5703_v49 = vor.u32 %v6940_v42, %v5702_v37  ;;  %v6934_v43 = vld [vmem:[%s10654_s6 + $0x84] sm:$0xf]  ;;  %v6928_v28 = vld [vmem:[%s10654_s6 + $0x4c] sm:$0xf0]  ;;  %v6086_v46 = vld [vmem:[%s10656_s8 + $0x2a0] sm:$0xf] }
 0x13a   :  { %v1649_v38 = vmax.f32 %v1543_v33, 0.0  ;;  %v5718_v33 = vld [vmem:[%s10654_s6 + $0xc0] sm:$0xf]  ;;  %v6924_v37 = vld [vmem:[%s10654_s6 + $0x2c] sm:$0xf0] }
 0x13b   :  { %v5719_v36 = vor.u32 %v6944_v34, %v5718_v33  ;;  %v5656_v33 = vld [vmem:[%s10654_s6 + $0x50] sm:$0xf0]  ;;  %v5662_v34 = vld [vmem:[%s10654_s6 + $0x48] sm:$0xf] }
 0x13c   :  { %v1653_v41 = vpack.c.bf16 %v1649_v38, %v1645_v54  ;;  %v5720_v54 = vld [vmem:[%s10654_s6 + $0xd0] sm:$0xf0]  ;;  %v5726_v38 = vld [vmem:[%s10654_s6 + $0xc8] sm:$0xf] }
 0x13d   :  { %v5723_v40 = vor.u32 %v6942_v35, %v5720_v54  ;;  %2373 = vmatpush.bf16.msrb.mxu3 %v5719_v36  ;;  %v6929_v35 = vld [vmem:[%s10654_s6 + $0x54] sm:$0xf0] }
 0x13e   :  { %2081 = vmatmul.bf16.vlgmr.msrb.gmra.mxu2 %v1653_v41 }
 0x13f   :  { %2400 = vmatpush.bf16.msrb.mxu2 %v5743_v29  ;;  %2387 = vmatpush.bf16.msrb.mxu1 %v5723_v40  ;;  %v6926_v29 = vld [vmem:[%s10654_s6 + $0x44] sm:$0xf]  ;;  %v5664_v40 = vld [vmem:[%s10654_s6 + $0x58] sm:$0xf0] }
 0x140   :  { %v5659_v54 = vor.u32 %v6926_v29, %v5656_v33  ;;  %v7002_v29 = vld [vmem:[%s10656_s8 + $0x1a0] sm:$0xf0] }
 0x141   :  { %2374 = vmatpush.bf16.msrb.mxu3 %v5703_v49 }
 0x143   :  { %2388 = vmatpush.bf16.msrb.mxu1 %v5707_v56  ;;  %v5648_v56 = vld [vmem:[%s10654_s6 + $0x38] sm:$0xf0] }
 0x145   :  { %v1582_v17 = vpop.f32.mrf.mxu1 }
 0x146   :  { %v1583_v63 = vadd.f32 %v1582_v17, %v1569_v53  ;;  %v6941_v53 = vld [vmem:[%s10654_s6 + $0xb4] sm:$0xf0] }
 0x147   :  { %v5711_v57 = vor.u32 %v6941_v53, %v5710_v52  ;;  %v6925_v52 = vld [vmem:[%s10654_s6 + $0x34] sm:$0xf0]  ;;  %v6923_v53 = vld [vmem:[%s10654_s6 + $0x2c] sm:$0xf] }
 0x149   :  { %v1624_v3 = vpop.f32.mrf.mxu0 }
 0x14d   :  { %v1584_v62 = vpop.f32.mrf.mxu1  ;;  %v1596_v0 = vpop.f32.mrf.mxu3 }
 0x14e   :  { %v1610_v2 = vpop.f32.mrf.mxu2  ;;  %v1597_v4 = vadd.f32 %v1596_v0, %v1583_v63  ;;  %2137 = vmatmul.bf16.vlgmr.msra.gmra.mxu2 %v1653_v41  ;;  %v1585_v7 = vadd.f32 %v1584_v62, %v1571_v5  ;;  %v5727_v41 = vor.u32 %v6945_v39, %v5726_v38  ;;  %v5715_v63 = vor.u32 %v6939_v58, %v5712_v59  ;;  %v5686_v0 = vld [vmem:[%s10654_s6 + $0x80] sm:$0xf]  ;;  %v6937_v5 = vld [vmem:[%s10654_s6 + $0x94] sm:$0xf0]  ;;  %v6927_v39 = vld [vmem:[%s10654_s6 + $0x4c] sm:$0xf] }
 0x14f   :  { %v5663_v38 = vor.u32 %v6929_v35, %v5662_v34  ;;  %v5651_v59 = vor.u32 %v6923_v53, %v5648_v56 }
 0x150   :  { %v1611_v6 = vadd.f32 %v1610_v2, %v1597_v4  ;;  %2401 = vmatpush.bf16.msrb.mxu2 %v5727_v41  ;;  %v5687_v2 = vor.u32 %v6936_v1, %v5686_v0  ;;  %v5694_v4 = vld [vmem:[%s10654_s6 + $0x88] sm:$0xf]  ;;  %v5667_v41 = vor.u32 %v6927_v39, %v5664_v40  ;;  %v6562_v39 = vld [vmem:[%s10656_s8 + $0x658] sm:$0xf] }
 0x151   :  { %v1626_v15 = vpop.f32.mrf.mxu0 }
 0x152   :  { %v1625_v12 = vadd.f32 %v1624_v3, %v1611_v6  ;;  %v5688_v3 = vld [vmem:[%s10654_s6 + $0x90] sm:$0xf0]  ;;  %2375 = vmatpush.bf16.msrb.mxu3 %v5687_v2  ;;  %v5630_v2 = vld [vmem:[%s10654_s6 + $0x8] sm:$0xf] }
 0x153   :  { %v5691_v6 = vor.u32 %v6934_v43, %v5688_v3  ;;  %v5624_v43 = vld [vmem:[%s10654_s6 + $0x10] sm:$0xf0]  ;;  %v6921_v3 = vld [vmem:[%s10654_s6 + $0x14] sm:$0xf0] }
 0x154   :  { %2402 = vmatpush.bf16.msrb.mxu2 %v5711_v57 }
 0x155   :  { %v1638_v9 = vpop.f32.mrf.mxu1  ;;  %v1598_v10 = vpop.f32.mrf.mxu3  ;;  %2389 = vmatpush.bf16.msrb.mxu1 %v5691_v6 }
 0x156   :  { %v1599_v11 = vadd.f32 %v1598_v10, %v1585_v7  ;;  %v1612_v13 = vpop.f32.mrf.mxu2  ;;  %v1639_v50 = vadd.f32 %v1638_v9, %v1625_v12  ;;  %v5695_v7 = vor.u32 %v6937_v5, %v5694_v4  ;;  %v6935_v9 = vld [vmem:[%s10654_s6 + $0x8c] sm:$0xf]  ;;  %v5696_v10 = vld [vmem:[%s10654_s6 + $0x98] sm:$0xf0] }
 0x158   :  { %v1613_v14 = vadd.f32 %v1612_v13, %v1599_v11  ;;  %v1646_v19 = vmax.f32 %v1639_v50, 0.0  ;;  %v5699_v11 = vor.u32 %v6935_v9, %v5696_v10  ;;  %2403 = vmatpush.bf16.msrb.mxu2 %v5695_v7  ;;  %v5670_v13 = vld [vmem:[%s10654_s6 + $0x60] sm:$0xf]  ;;  %v5672_v50 = vld [vmem:[%s10654_s6 + $0x70] sm:$0xf0]  ;;  %v5631_v7 = vor.u32 %v6921_v3, %v5630_v2 }
 0x159   :  { %v6919_v9 = vld [vmem:[%s10654_s6 + $0xc] sm:$0xf]  ;;  %v5632_v10 = vld [vmem:[%s10654_s6 + $0x18] sm:$0xf0] }
 0x15a   :  { %v1627_v16 = vadd.f32 %v1626_v15, %v1613_v14  ;;  %v6932_v14 = vld [vmem:[%s10654_s6 + $0x6c] sm:$0xf0]  ;;  %v6930_v15 = vld [vmem:[%s10654_s6 + $0x64] sm:$0xf] }
 0x15d   :  { %v1640_v55 = vpop.f32.mrf.mxu1 }
 0x15e   :  { %v1641_v18 = vadd.f32 %v1640_v55, %v1627_v16  ;;  %v5671_v16 = vor.u32 %v6932_v14, %v5670_v13  ;;  %v5678_v55 = vld [vmem:[%s10654_s6 + $0x68] sm:$0xf] }
 0x160   :  { %v1650_v20 = vmax.f32 %v1641_v18, 0.0  ;;  %v6933_v18 = vld [vmem:[%s10654_s6 + $0x74] sm:$0xf0]  ;;  %2376 = vmatpush.bf16.msrb.mxu3 %v5671_v16  ;;  %v6170_v16 = vld [vmem:[%s10656_s8 + $0x348] sm:$0xf] }
 0x162   :  { %v1654_v21 = vpack.c.bf16 %v1650_v20, %v1646_v19  ;;  %v5675_v20 = vor.u32 %v6930_v15, %v5672_v50  ;;  %v7058_v50 = vld [vmem:[%s10656_s8 + $0x360] sm:$0xf0] }
 0x164   :  { %2095 = vmatmul.bf16.vlgmr.msrb.gmra.mxu0 %v1654_v21  ;;  %2390 = vmatpush.bf16.msrb.mxu1 %v5675_v20  ;;  %v6142_v20 = vld [vmem:[%s10656_s8 + $0x310] sm:$0xf] }
 0x165   :  { %2414 = vmatpush.bf16.msrb.mxu0 %v5747_v32  ;;  %v5655_v32 = vor.u32 %v6928_v28, %v5654_v27 }
 0x167   :  { %2377 = vmatpush.bf16.msrb.mxu3 %v5655_v32 }
 0x168   :  { %2391 = vmatpush.bf16.msrb.mxu1 %v5659_v54  ;;  %v6114_v54 = vld [vmem:[%s10656_s8 + $0x2d8] sm:$0xf] }
 0x169   :  { %2415 = vmatpush.bf16.msrb.mxu0 %v5731_v60  ;;  %v5638_v60 = vld [vmem:[%s10654_s6 + $0x20] sm:$0xf] }
 0x16a   :  { %v5639_v42 = vor.u32 %v6924_v37, %v5638_v60  ;;  %v6995_v60 = vld [vmem:[%s10656_s8 + $0x168] sm:$0xf0] }
 0x16c   :  { %2378 = vmatpush.bf16.msrb.mxu3 %v5639_v42 }
 0x16d   :  { %v2054_v17 = vpop.f32.mrf.mxu3  ;;  %2416 = vmatpush.bf16.msrb.mxu0 %v5715_v63  ;;  %v6918_v63 = vld [vmem:[%s10654_s6 + $0x4] sm:$0xf] }
 0x16e   :  { %v2055_v12 = vadd.f32 %v2054_v17, %v1721_v61  ;;  %v5640_v17 = vld [vmem:[%s10654_s6 + $0x30] sm:$0xf0]  ;;  %v5627_v6 = vor.u32 %v6918_v63, %v5624_v43 }
 0x16f   :  { %v5643_v51 = vor.u32 %v6922_v47, %v5640_v17  ;;  %v6366_v17 = vld [vmem:[%s10656_s8 + $0x4d0] sm:$0xf]  ;;  %v7100_v63 = vld [vmem:[%s10656_s8 + $0x4b0] sm:$0xf0] }
 0x171   :  { %2417 = vmatpush.bf16.msrb.mxu0 %v5699_v11  ;;  %2392 = vmatpush.bf16.msrb.mxu1 %v5643_v51 }
 0x174   :  { %2151 = vmatmul.bf16.vlgmr.msra.gmra.mxu0 %v1654_v21  ;;  %v5679_v21 = vor.u32 %v6933_v18, %v5678_v55  ;;  %v6618_v55 = vld [vmem:[%s10656_s8 + $0x6c8] sm:$0xf]  ;;  %v6171_v18 = vor.u32 %v7058_v50, %v6170_v16  ;;  %v7142_v16 = vld [vmem:[%s10656_s8 + $0x600] sm:$0xf0] }
 0x175   :  { %v2056_v8 = vpop.f32.mrf.mxu3  ;;  %2418 = vmatpush.bf16.msrb.mxu0 %v5683_v25  ;;  %2393 = vmatpush.bf16.msrb.mxu1 %v5627_v6  ;;  %v5946_v25 = vld [vmem:[%s10656_s8 + $0x188] sm:$0xf]  ;;  %v5862_v6 = vld [vmem:[%s10656_s8 + $0xe0] sm:$0xf] }
 0x176   :  { %2404 = vmatpush.bf16.msrb.mxu2 %v5679_v21  ;;  %v2057_v44 = vadd.f32 %v2056_v8, %v1721_v61  ;;  %v5622_v61 = vld [vmem:[%s10654_s6] sm:$0xf]  ;;  %v7051_v21 = vld [vmem:[%s10656_s8 + $0x328] sm:$0xf0]  ;;  %v6590_v8 = vld [vmem:[%s10656_s8 + $0x690] sm:$0xf]  ;;  %v5947_v34 = vor.u32 %v7002_v29, %v5946_v25 }
 0x177   :  { %v6143_v28 = vor.u32 %v7051_v21, %v6142_v20  ;;  %v6974_v21 = vld [vmem:[%s10656_s8 + $0xc0] sm:$0xf0]  ;;  %v6030_v25 = vld [vmem:[%s10656_s8 + $0x230] sm:$0xf] }
 0x179   :  { %2419 = vmatpush.bf16.msrb.mxu0 %v5667_v41  ;;  %3878 = vmatpush.bf16.msra.mxu1 %v6171_v18  ;;  %v7156_v41 = vld [vmem:[%s10656_s8 + $0x670] sm:$0xf0] }
 0x17a   :  { %2405 = vmatpush.bf16.msrb.mxu2 %v5663_v38  ;;  %v7044_v38 = vld [vmem:[%s10656_s8 + $0x2f0] sm:$0xf0]  ;;  %v6563_v56 = vor.u32 %v7156_v41, %v6562_v39 }
 0x17b   :  { %v6115_v51 = vor.u32 %v7044_v38, %v6114_v54  ;;  %v2157_v38 = vld [vmem:[%s10649_s1] sm:$0xff]  ;;  %v7016_v41 = vld [vmem:[%s10656_s8 + $0x210] sm:$0xf0] }
 0x17d   :  { %2420 = vmatpush.bf16.msrb.mxu0 %v5651_v59  ;;  %3879 = vmatpush.bf16.msra.mxu1 %v6143_v28  ;;  %v5890_v59 = vld [vmem:[%s10656_s8 + $0x118] sm:$0xf]  ;;  %v7135_v28 = vld [vmem:[%s10656_s8 + $0x5c8] sm:$0xf0] }
 0x181   :  { %3880 = vmatpush.bf16.msra.mxu1 %v6115_v51  ;;  %v6960_v51 = vld [vmem:[%s10656_s8 + $0x50] sm:$0xf0] }
 0x185   :  { %v2068_v48 = vpop.f32.mrf.mxu1 }
 0x186   :  { %v2069_v19 = vadd.f32 %v2068_v48, %v2055_v12  ;;  %v5646_v48 = vld [vmem:[%s10654_s6 + $0x28] sm:$0xf]  ;;  %v5635_v12 = vor.u32 %v6919_v9, %v5632_v10 }
 0x187   :  { %v5647_v58 = vor.u32 %v6925_v52, %v5646_v48  ;;  %v7107_v48 = vld [vmem:[%s10656_s8 + $0x4e8] sm:$0xf0] }
 0x188   :  { %2421 = vmatpush.bf16.msrb.mxu0 %v5635_v12  ;;  %v6367_v52 = vor.u32 %v7107_v48, %v6366_v17  ;;  %v7030_v12 = vld [vmem:[%s10656_s8 + $0x280] sm:$0xf0]  ;;  %v5778_v17 = vld [vmem:[%s10656_s8 + $0x38] sm:$0xf] }
 0x189   :  { %2406 = vmatpush.bf16.msrb.mxu2 %v5647_v58  ;;  %v7149_v58 = vld [vmem:[%s10656_s8 + $0x638] sm:$0xf0] }
 0x18d   :  { %v2070_v24 = vpop.f32.mrf.mxu1  ;;  %v2110_v57 = vpop.f32.mrf.mxu3  ;;  %2407 = vmatpush.bf16.msrb.mxu2 %v5631_v7  ;;  %v6981_v7 = vld [vmem:[%s10656_s8 + $0xf8] sm:$0xf0] }
 0x18e   :  { %v2071_v49 = vadd.f32 %v2070_v24, %v2057_v44  ;;  %v2111_v14 = vadd.f32 %v2110_v57, %v1722_v45  ;;  %v7163_v24 = vld [vmem:[%s10656_s8 + $0x6a8] sm:$0xf0]  ;;  %v5918_v44 = vld [vmem:[%s10656_s8 + $0x150] sm:$0xf]  ;;  %v6534_v57 = vld [vmem:[%s10656_s8 + $0x620] sm:$0xf] }
 0x18f   :  { %v6591_v33 = vor.u32 %v7163_v24, %v6590_v8  ;;  %v5919_v47 = vor.u32 %v6995_v60, %v5918_v44  ;;  %v6535_v10 = vor.u32 %v7149_v58, %v6534_v57  ;;  %v6450_v44 = vld [vmem:[%s10656_s8 + $0x578] sm:$0xf]  ;;  %v7128_v60 = vld [vmem:[%s10656_s8 + $0x590] sm:$0xf0]  ;;  %v7009_v58 = vld [vmem:[%s10656_s8 + $0x1d8] sm:$0xf0] }
 0x195   :  { %v2124_v4 = vpop.f32.mrf.mxu1 }
 0x196   :  { %v2125_v15 = vadd.f32 %v2124_v4, %v2111_v14  ;;  %v7093_v14 = vld [vmem:[%s10656_s8 + $0x478] sm:$0xf0] }
 0x19d   :  { %v2126_v40 = vpop.f32.mrf.mxu1 }
 0x1c1   :  { %v2082_v62 = vpop.f32.mrf.mxu2 }
 0x1c2   :  { %v2083_v26 = vadd.f32 %v2082_v62, %v2069_v19  ;;  %v6920_v62 = vld [vmem:[%s10654_s6 + $0xc] sm:$0xf0]  ;;  %v7170_v19 = vld [vmem:[%s10656_s8 + $0x6e0] sm:$0xf0]  ;;  %s7294_s6 = smov 16  }
 0x1c3   :  { %v5623_v1 = vor.u32 %v6920_v62, %v5622_v61  ;;  %v6619_v23 = vor.u32 %v7170_v19, %v6618_v55  ;;  %v6988_v61 = vld [vmem:[%s10656_s8 + $0x130] sm:$0xf0]  ;;  %v6338_v62 = vld [vmem:[%s10656_s8 + $0x498] sm:$0xf]  ;;  %v5863_v55 = vor.u32 %v6981_v7, %v5862_v6  ;;  %v5834_v19 = vld [vmem:[%s10656_s8 + $0xa8] sm:$0xf] }
 0x1c4   :  { %v5891_v43 = vor.u32 %v6988_v61, %v5890_v59  ;;  %v6339_v2 = vor.u32 %v7100_v63, %v6338_v62  ;;  %v5835_v29 = vor.u32 %v6974_v21, %v5834_v19  ;;  %v6422_v59 = vld [vmem:[%s10656_s8 + $0x540] sm:$0xf]  ;;  %v7121_v61 = vld [vmem:[%s10656_s8 + $0x558] sm:$0xf0]  ;;  %v7055_v62 = vld [vmem:[%s10656_s8 + $0x34c] sm:$0xf] }
 0x1c5   :  { %2379 = vmatpush.bf16.msrb.mxu3 %v5623_v1  ;;  %3906 = vmatpush.bf16.msra.mxu0 %v6619_v23  ;;  %v7086_v23 = vld [vmem:[%s10656_s8 + $0x440] sm:$0xf0]  ;;  %v6172_v63 = vld [vmem:[%s10656_s8 + $0x364] sm:$0xf0]  ;;  %v6953_v6 = vld [vmem:[%s10656_s8 + $0x18] sm:$0xf0] }
 0x1c6   :  { %v6999_v7 = vld [vmem:[%s10656_s8 + $0x18c] sm:$0xf]  ;;  %v7160_v19 = vld [vmem:[%s10656_s8 + $0x694] sm:$0xf] }
 0x1c9   :  { %v2084_v30 = vpop.f32.mrf.mxu2  ;;  %3864 = vmatpush.bf16.msra.mxu3 %v5947_v34  ;;  %3907 = vmatpush.bf16.msra.mxu0 %v6591_v33  ;;  %v6967_v33 = vld [vmem:[%s10656_s8 + $0x88] sm:$0xf0]  ;;  %v6254_v34 = vld [vmem:[%s10656_s8 + $0x3f0] sm:$0xf] }
 0x1ca   :  { %v2085_v0 = vadd.f32 %v2084_v30, %v2071_v49  ;;  %v6394_v30 = vld [vmem:[%s10656_s8 + $0x508] sm:$0xf] }
 0x1cd   :  { %3865 = vmatpush.bf16.msra.mxu3 %v5919_v47  ;;  %3908 = vmatpush.bf16.msra.mxu0 %v6563_v56  ;;  %v5974_v56 = vld [vmem:[%s10656_s8 + $0x1c0] sm:$0xf] }
 0x1d1   :  { %v2138_v13 = vpop.f32.mrf.mxu2  ;;  %3866 = vmatpush.bf16.msra.mxu3 %v5891_v43  ;;  %3909 = vmatpush.bf16.msra.mxu0 %v6535_v10  ;;  %v5975_v10 = vor.u32 %v7009_v58, %v5974_v56  ;;  %v6508_v56 = vld [vmem:[%s10656_s8 + $0x604] sm:$0xf0]  ;;  %v6978_v58 = vld [vmem:[%s10656_s8 + $0xe4] sm:$0xf] }
 0x1d2   :  { %v2139_v22 = vadd.f32 %v2138_v13, %v2125_v15  ;;  %v6310_v13 = vld [vmem:[%s10656_s8 + $0x460] sm:$0xf]  ;;  %v6506_v15 = vld [vmem:[%s10656_s8 + $0x5e8] sm:$0xf] }
 0x1d3   :  { %v6311_v18 = vor.u32 %v7093_v14, %v6310_v13  ;;  %v6507_v24 = vor.u32 %v7142_v16, %v6506_v15  ;;  %v5948_v13 = vld [vmem:[%s10656_s8 + $0x1a4] sm:$0xf0]  ;;  %v7111_v14 = vld [vmem:[%s10656_s8 + $0x50c] sm:$0xf]  ;;  %v6175_v16 = vor.u32 %v7055_v62, %v6172_v63  ;;  %v6312_v63 = vld [vmem:[%s10656_s8 + $0x47c] sm:$0xf0] }
 0x1d4   :  { %v6396_v15 = vld [vmem:[%s10656_s8 + $0x524] sm:$0xf0] }
 0x1d5   :  { %3867 = vmatpush.bf16.msra.mxu3 %v5863_v55  ;;  %3910 = vmatpush.bf16.msra.mxu0 %v6507_v24  ;;  %v7048_v55 = vld [vmem:[%s10656_s8 + $0x314] sm:$0xf] }
 0x1d6   :  { %v6992_v24 = vld [vmem:[%s10656_s8 + $0x154] sm:$0xf] }
 0x1d9   :  { %v2140_v49 = vpop.f32.mrf.mxu2  ;;  %3868 = vmatpush.bf16.msra.mxu3 %v5835_v29 }
 0x1e1   :  { %v2096_v31 = vpop.f32.mrf.mxu0 }
 0x1e2   :  { %v9172_v36 = vadd.f32 %v2096_v31, %v2083_v26  ;;  %v2112_v26 = vpop.f32.mrf.mxu3  ;;  %v7114_v31 = vld [vmem:[%s10656_s8 + $0x520] sm:$0xf0] }
 0x1e3   :  { %v6395_v35 = vor.u32 %v7114_v31, %v6394_v30  ;;  %v2113_v37 = vadd.f32 %v2112_v26, %v1722_v45  ;;  %v7037_v45 = vld [vmem:[%s10656_s8 + $0x2b8] sm:$0xf0]  ;;  %v7023_v26 = vld [vmem:[%s10656_s8 + $0x248] sm:$0xf0]  ;;  %v5806_v31 = vld [vmem:[%s10656_s8 + $0x70] sm:$0xf] }
 0x1e4   :  { %4536 = vst [vmem:[#allocation4] sm:$0xff] %v9172_v36  ;;  %v6087_v4 = vor.u32 %v7037_v45, %v6086_v46  ;;  %v7072_v46 = vld [vmem:[%s10656_s8 + $0x3d0] sm:$0xf0] }
 0x1e5   :  { %3892 = vmatpush.bf16.msra.mxu2 %v6395_v35  ;;  %v2127_v53 = vadd.f32 %v2126_v40, %v2113_v37  ;;  %v7079_v35 = vld [vmem:[%s10656_s8 + $0x408] sm:$0xf0]  ;;  %v6002_v40 = vld [vmem:[%s10656_s8 + $0x1f8] sm:$0xf] }
 0x1e6   :  { %3881 = vmatpush.bf16.msra.mxu1 %v6087_v4  ;;  %v2158_v37 = vld [vmem:[%s10649_s1 + $0x8] sm:$0xff]  ;;  %v6255_v47 = vor.u32 %v7079_v35, %v6254_v34 }
 0x1e7   :  { %v6620_v4 = vld [vmem:[%s10656_s8 + $0x6e4] sm:$0xf0] }
 0x1e9   :  { %v2098_v5 = vpop.f32.mrf.mxu0  ;;  %3893 = vmatpush.bf16.msra.mxu2 %v6367_v52  ;;  %v6226_v52 = vld [vmem:[%s10656_s8 + $0x3b8] sm:$0xf] }
 0x1ea   :  { %v9230_v11 = vadd.f32 %v2098_v5, %v2085_v0  ;;  %v2141_v0 = vadd.f32 %v2140_v49, %v2127_v53  ;;  %v6058_v5 = vld [vmem:[%s10656_s8 + $0x268] sm:$0xf]  ;;  %v6003_v49 = vor.u32 %v7016_v41, %v6002_v40  ;;  %v6451_v53 = vor.u32 %v7128_v60, %v6450_v44  ;;  %v6088_v40 = vld [vmem:[%s10656_s8 + $0x2bc] sm:$0xf0]  ;;  %v7146_v41 = vld [vmem:[%s10656_s8 + $0x624] sm:$0xf] }
 0x1eb   :  { %v6059_v20 = vor.u32 %v7030_v12, %v6058_v5  ;;  %v6227_v43 = vor.u32 %v7072_v46, %v6226_v52  ;;  %v5750_v5 = vld [vmem:[%s10656_s8] sm:$0xf]  ;;  %v6423_v12 = vor.u32 %v7121_v61, %v6422_v59  ;;  %v7027_v52 = vld [vmem:[%s10656_s8 + $0x26c] sm:$0xf]  ;;  %v6060_v46 = vld [vmem:[%s10656_s8 + $0x284] sm:$0xf0] }
 0x1ec   :  { %4538 = vst [vmem:[#allocation4 + $0x10] sm:$0xff] %v9230_v11  ;;  %v5751_v21 = vor.u32 %v6953_v6, %v5750_v5  ;;  %v6536_v44 = vld [vmem:[%s10656_s8 + $0x63c] sm:$0xf0]  ;;  %v7090_v61 = vld [vmem:[%s10656_s8 + $0x464] sm:$0xf] }
 0x1ed   :  { %3894 = vmatpush.bf16.msra.mxu2 %v6339_v2  ;;  %3882 = vmatpush.bf16.msra.mxu1 %v6059_v20  ;;  %v6592_v20 = vld [vmem:[%s10656_s8 + $0x6ac] sm:$0xf0]  ;;  %v5864_v59 = vld [vmem:[%s10656_s8 + $0xfc] sm:$0xf0]  ;;  %v6971_v6 = vld [vmem:[%s10656_s8 + $0xac] sm:$0xf] }
 0x1ee   :  { %v6595_v29 = vor.u32 %v7160_v19, %v6592_v20  ;;  %v5867_v62 = vor.u32 %v6978_v58, %v5864_v59  ;;  %v7076_v19 = vld [vmem:[%s10656_s8 + $0x3f4] sm:$0xf]  ;;  %v6626_v59 = vld [vmem:[%s10656_s8 + $0x6d0] sm:$0xf] }
 0x1f1   :  { %v2152_v27 = vpop.f32.mrf.mxu0  ;;  %3895 = vmatpush.bf16.msra.mxu2 %v6311_v18  ;;  %v6144_v18 = vld [vmem:[%s10656_s8 + $0x32c] sm:$0xf0] }
 0x1f2   :  { %v2153_v32 = vadd.f32 %v2152_v27, %v2139_v22  ;;  %v6282_v22 = vld [vmem:[%s10656_s8 + $0x428] sm:$0xf]  ;;  %v6478_v27 = vld [vmem:[%s10656_s8 + $0x5b0] sm:$0xf] }
 0x1f3   :  { %v6283_v30 = vor.u32 %v7086_v23, %v6282_v22  ;;  %v6479_v39 = vor.u32 %v7135_v28, %v6478_v27  ;;  %v5951_v23 = vor.u32 %v6999_v7, %v5948_v13  ;;  %v6368_v27 = vld [vmem:[%s10656_s8 + $0x4ec] sm:$0xf0]  ;;  %v6147_v28 = vor.u32 %v7048_v55, %v6144_v18  ;;  %v7083_v7 = vld [vmem:[%s10656_s8 + $0x42c] sm:$0xf]  ;;  %v6004_v13 = vld [vmem:[%s10656_s8 + $0x214] sm:$0xf0] }
 0x1f4   :  { %v2159_v42 = vmul.f32 0.5, %v2153_v32  ;;  %4537 = vst [vmem:[#allocation4 + $0x8] sm:$0xff] %v2153_v32  ;;  %v6031_v32 = vor.u32 %v7023_v26, %v6030_v25  ;;  %v5920_v25 = vld [vmem:[%s10656_s8 + $0x16c] sm:$0xf0]  ;;  %v7104_v26 = vld [vmem:[%s10656_s8 + $0x4d4] sm:$0xf] }
 0x1f5   :  { %3896 = vmatpush.bf16.msra.mxu2 %v6283_v30  ;;  %3911 = vmatpush.bf16.msra.mxu0 %v6479_v39  ;;  %v7041_v30 = vld [vmem:[%s10656_s8 + $0x2dc] sm:$0xf]  ;;  %v5923_v34 = vor.u32 %v6992_v24, %v5920_v25  ;;  %v6371_v35 = vor.u32 %v7104_v26, %v6368_v27  ;;  %v7034_v39 = vld [vmem:[%s10656_s8 + $0x2a4] sm:$0xf]  ;;  %v6964_v55 = vld [vmem:[%s10656_s8 + $0x74] sm:$0xf] }
 0x1f6   :  { %v2161_v1 = vmul.f32 1.442695, %v2159_v42  ;;  %v5807_v42 = vor.u32 %v6967_v33, %v5806_v31  ;;  %3883 = vmatpush.bf16.msra.mxu1 %v6031_v32  ;;  %v6116_v31 = vld [vmem:[%s10656_s8 + $0x2f4] sm:$0xf0]  ;;  %v7153_v32 = vld [vmem:[%s10656_s8 + $0x65c] sm:$0xf]  ;;  %v6091_v60 = vor.u32 %v7034_v39, %v6088_v40 }
 0x1f7   :  { %v6564_v33 = vld [vmem:[%s10656_s8 + $0x674] sm:$0xf0]  ;;  %v5808_v18 = vld [vmem:[%s10656_s8 + $0x8c] sm:$0xf0]  ;;  %v7118_v24 = vld [vmem:[%s10656_s8 + $0x544] sm:$0xf] }
 0x1f8   :  { %7180 = vpow2.f32 %v2161_v1  ;;  %3869 = vmatpush.bf16.msra.mxu3 %v5807_v42  ;;  %v5779_v1 = vor.u32 %v6960_v51, %v5778_v17  ;;  %v6985_v42 = vld [vmem:[%s10656_s8 + $0x11c] sm:$0xf]  ;;  %v5811_v20 = vor.u32 %v6964_v55, %v5808_v18  ;;  %v6424_v26 = vld [vmem:[%s10656_s8 + $0x55c] sm:$0xf0]  ;;  %v6402_v55 = vld [vmem:[%s10656_s8 + $0x510] sm:$0xf] }
 0x1f9   :  { %v2154_v3 = vpop.f32.mrf.mxu0  ;;  %3897 = vmatpush.bf16.msra.mxu2 %v6255_v47  ;;  %3912 = vmatpush.bf16.msra.mxu0 %v6451_v53  ;;  %v5892_v47 = vld [vmem:[%s10656_s8 + $0x134] sm:$0xf0]  ;;  %v7097_v17 = vld [vmem:[%s10656_s8 + $0x49c] sm:$0xf]  ;;  %v7139_v53 = vld [vmem:[%s10656_s8 + $0x5ec] sm:$0xf]  ;;  %v6427_v27 = vor.u32 %v7118_v24, %v6424_v26 }
 0x1fa   :  { %v2155_v9 = vadd.f32 %v2154_v3, %v2141_v0  ;;  %v7167_v0 = vld [vmem:[%s10656_s8 + $0x6cc] sm:$0xf]  ;;  %3884 = vmatpush.bf16.msra.mxu1 %v6003_v49  ;;  %v6340_v49 = vld [vmem:[%s10656_s8 + $0x4b4] sm:$0xf0]  ;;  %v6200_v39 = vld [vmem:[%s10656_s8 + $0x39c] sm:$0xf0] }
 0x1fb   :  { %v6343_v51 = vor.u32 %v7097_v17, %v6340_v49  ;;  %v7115_v18 = vld [vmem:[%s10656_s8 + $0x528] sm:$0xf0]  ;;  %v6570_v26 = vld [vmem:[%s10656_s8 + $0x660] sm:$0xf] }
 0x1fc   :  { %v2160_v50 = vmul.f32 0.5, %v2155_v9  ;;  %4539 = vst [vmem:[#allocation4 + $0x18] sm:$0xff] %v2155_v9  ;;  %3870 = vmatpush.bf16.msra.mxu3 %v5779_v1  ;;  %v7020_v1 = vld [vmem:[%s10656_s8 + $0x234] sm:$0xf] }
 0x1fd   :  { %3898 = vmatpush.bf16.msra.mxu2 %v6227_v43  ;;  %3913 = vmatpush.bf16.msra.mxu0 %v6423_v12  ;;  %v6032_v43 = vld [vmem:[%s10656_s8 + $0x24c] sm:$0xf0]  ;;  %v7013_v12 = vld [vmem:[%s10656_s8 + $0x1fc] sm:$0xf] }
 0x1fe   :  { %v2163_v8 = vmul.f32 1.442695, %v2160_v50  ;;  %v7181_v54 = vpop.eup %7180  ;;  %v6623_v50 = vor.u32 %v7167_v0, %v6620_v4  ;;  %3885 = vmatpush.bf16.msra.mxu1 %v5975_v10  ;;  %v6315_v0 = vor.u32 %v7090_v61, %v6312_v63  ;;  %v6480_v4 = vld [vmem:[%s10656_s8 + $0x5cc] sm:$0xf0]  ;;  %v7171_v61 = vld [vmem:[%s10656_s8 + $0x6e8] sm:$0xf0] }
 0x1ff   :  { %v2165_v48 = vmul.f32 %v7181_v54, %v2157_v38  ;;  %v6119_v54 = vor.u32 %v7041_v30, %v6116_v31  ;;  %v6567_v38 = vor.u32 %v7153_v32, %v6564_v33  ;;  %v7069_v30 = vld [vmem:[%s10656_s8 + $0x3bc] sm:$0xf]  ;;  %v6228_v32 = vld [vmem:[%s10656_s8 + $0x3d4] sm:$0xf0] }
 0x200   :  { %7182 = vpow2.f32 %v2163_v8  ;;  %v6399_v8 = vor.u32 %v7111_v14, %v6396_v15  ;;  %3871 = vmatpush.bf16.msra.mxu3 %v5751_v21  ;;  %v7125_v14 = vld [vmem:[%s10656_s8 + $0x57c] sm:$0xf]  ;;  %v6007_v15 = vor.u32 %v7013_v12, %v6004_v13  ;;  %v6256_v21 = vld [vmem:[%s10656_s8 + $0x40c] sm:$0xf0]  ;;  %v6231_v33 = vor.u32 %v7069_v30, %v6228_v32  ;;  %v5926_v30 = vld [vmem:[%s10656_s8 + $0x158] sm:$0xf] }
 0x201   :  { %v2167_v2 = vadd.f32 %v2165_v48, %v9172_v36  ;;  %v6198_v36 = vld [vmem:[%s10656_s8 + $0x380] sm:$0xf]  ;;  %v5895_v48 = vor.u32 %v6985_v42, %v5892_v47 }
 0x206   :  { %v7183_v45 = vpop.eup %7182 }
 0x207   :  { %v2166_v57 = vmul.f32 %v7183_v45, %v2158_v37  ;;  %v6539_v37 = vor.u32 %v7146_v41, %v6536_v44  ;;  %v6063_v45 = vor.u32 %v7027_v52, %v6060_v46  ;;  %v2202_v41 = vld [vmem:[%s10655_s7] sm:$0xf] }
 0x208   :  { %v2207_v42 = vperm.slane %v2202_v41, 3  ;;  %v2204_v52 = vperm.slane %v2202_v41, 0 }
 0x209   :  { %v2168_v3 = vadd.f32 %v2166_v57, %v9230_v11  ;;  %v7065_v11 = vld [vmem:[%s10656_s8 + $0x398] sm:$0xf0]  ;;  %v6511_v57 = vor.u32 %v7139_v53, %v6508_v56  ;;  %v6178_v53 = vld [vmem:[%s10656_s8 + $0x350] sm:$0xf]  ;;  %v7059_v56 = vld [vmem:[%s10656_s8 + $0x368] sm:$0xf0] }
 0x20a   :  { %v6199_v22 = vor.u32 %v7065_v11, %v6198_v36  ;;  %v5836_v36 = vld [vmem:[%s10656_s8 + $0xc4] sm:$0xf0] }
 0x20b   :  { %v2169_v9 = vpack.c.bf16 %v2168_v3, %v2167_v2  ;;  %v6035_v2 = vor.u32 %v7020_v1, %v6032_v43  ;;  %v7132_v3 = vld [vmem:[%s10656_s8 + $0x5b4] sm:$0xf]  ;;  %v5839_v11 = vor.u32 %v6971_v6, %v5836_v36  ;;  %v6179_v43 = vor.u32 %v7059_v56, %v6178_v53  ;;  %v7143_v53 = vld [vmem:[%s10656_s8 + $0x608] sm:$0xf0] }
 0x20c   :  { %3899 = vmatpush.bf16.msra.mxu2 %v6199_v22  ;;  %v6483_v5 = vor.u32 %v7132_v3, %v6480_v4  ;;  %v6259_v22 = vor.u32 %v7076_v19, %v6256_v21  ;;  %v6627_v4 = vor.u32 %v7171_v61, %v6626_v59  ;;  %v7052_v6 = vld [vmem:[%s10656_s8 + $0x330] sm:$0xf0]  ;;  %v6318_v61 = vld [vmem:[%s10656_s8 + $0x468] sm:$0xf] }
 0x20d   :  { %2380 = vmatmul.bf16.vlgmr.msrb.gmra.mxu3 %v2169_v9  ;;  %2394 = vmatmul.bf16.vlgmr.msrb.gmra.mxu1 %v2169_v9 }
 0x20e   :  { %2408 = vmatmul.bf16.vlgmr.msrb.gmra.mxu2 %v2169_v9  ;;  %2422 = vmatmul.bf16.vlgmr.msrb.gmra.mxu0 %v2169_v9  ;;  %v6284_v9 = vld [vmem:[%s10656_s8 + $0x444] sm:$0xf0] }
 0x20f   :  { %3934 = vmatpush.bf16.msrb.mxu1 %v6175_v16  ;;  %3962 = vmatpush.bf16.msrb.mxu0 %v6623_v50  ;;  %v6287_v10 = vor.u32 %v7083_v7, %v6284_v9  ;;  %v6452_v16 = vld [vmem:[%s10656_s8 + $0x594] sm:$0xf0] }
 0x210   :  { %3920 = vmatpush.bf16.msrb.mxu3 %v5951_v23  ;;  %3948 = vmatpush.bf16.msrb.mxu2 %v6399_v8  ;;  %v6455_v50 = vor.u32 %v7125_v14, %v6452_v16  ;;  %v7006_v23 = vld [vmem:[%s10656_s8 + $0x1c4] sm:$0xf]  ;;  %v5976_v8 = vld [vmem:[%s10656_s8 + $0x1dc] sm:$0xf0]  ;;  %v6598_v9 = vld [vmem:[%s10656_s8 + $0x698] sm:$0xf] }
 0x211   :  { %v5979_v25 = vor.u32 %v7006_v23, %v5976_v8  ;;  %v5954_v14 = vld [vmem:[%s10656_s8 + $0x190] sm:$0xf]  ;;  %v7045_v23 = vld [vmem:[%s10656_s8 + $0x2f8] sm:$0xf0] }
 0x213   :  { %3935 = vmatpush.bf16.msrb.mxu1 %v6147_v28  ;;  %3963 = vmatpush.bf16.msrb.mxu0 %v6595_v29  ;;  %v6957_v28 = vld [vmem:[%s10656_s8 + $0x3c] sm:$0xf]  ;;  %v5780_v29 = vld [vmem:[%s10656_s8 + $0x54] sm:$0xf0] }
 0x214   :  { %3921 = vmatpush.bf16.msrb.mxu3 %v5923_v34  ;;  %3949 = vmatpush.bf16.msrb.mxu2 %v6371_v35  ;;  %v5783_v31 = vor.u32 %v6957_v28, %v5780_v29  ;;  %v6950_v34 = vld [vmem:[%s10656_s8 + $0x4] sm:$0xf]  ;;  %v5752_v35 = vld [vmem:[%s10656_s8 + $0x1c] sm:$0xf0]  ;;  %v6403_v29 = vor.u32 %v7115_v18, %v6402_v55  ;;  %v5814_v18 = vld [vmem:[%s10656_s8 + $0x78] sm:$0xf] }
 0x217   :  { %3936 = vmatpush.bf16.msrb.mxu1 %v6119_v54  ;;  %3964 = vmatpush.bf16.msrb.mxu0 %v6567_v38  ;;  %v5755_v54 = vor.u32 %v6950_v34, %v5752_v35  ;;  %v7062_v38 = vld [vmem:[%s10656_s8 + $0x384] sm:$0xf]  ;;  %v6374_v34 = vld [vmem:[%s10656_s8 + $0x4d8] sm:$0xf]  ;;  %v7108_v35 = vld [vmem:[%s10656_s8 + $0x4f0] sm:$0xf0] }
 0x218   :  { %3922 = vmatpush.bf16.msrb.mxu3 %v5895_v48  ;;  %3950 = vmatpush.bf16.msrb.mxu2 %v6343_v51  ;;  %v6203_v40 = vor.u32 %v7062_v38, %v6200_v39  ;;  %v6094_v38 = vld [vmem:[%s10656_s8 + $0x2a8] sm:$0xf]  ;;  %v7038_v39 = vld [vmem:[%s10656_s8 + $0x2c0] sm:$0xf0] }
 0x21b   :  { %3937 = vmatpush.bf16.msrb.mxu1 %v6091_v60  ;;  %3965 = vmatpush.bf16.msrb.mxu0 %v6539_v37  ;;  %v2205_v37 = vperm.slane %v2202_v41, 1 }
 0x21c   :  { %3923 = vmatpush.bf16.msrb.mxu3 %v5867_v62  ;;  %3951 = vmatpush.bf16.msrb.mxu2 %v6315_v0 }
 0x21f   :  { %3938 = vmatpush.bf16.msrb.mxu1 %v6063_v45  ;;  %3966 = vmatpush.bf16.msrb.mxu0 %v6511_v57  ;;  %v2206_v57 = vperm.slane %v2202_v41, 2  ;;  %v6542_v41 = vld [vmem:[%s10656_s8 + $0x628] sm:$0xf] }
 0x220   :  { %3924 = vmatpush.bf16.msrb.mxu3 %v5839_v11  ;;  %3952 = vmatpush.bf16.msrb.mxu2 %v6287_v10  ;;  %v7164_v10 = vld [vmem:[%s10656_s8 + $0x6b0] sm:$0xf0] }
 0x221   :  { %v6599_v21 = vor.u32 %v7164_v10, %v6598_v9  ;;  %v6290_v9 = vld [vmem:[%s10656_s8 + $0x430] sm:$0xf]  ;;  %v7087_v10 = vld [vmem:[%s10656_s8 + $0x448] sm:$0xf0] }
 0x222   :  { %v6291_v55 = vor.u32 %v7087_v10, %v6290_v9  ;;  %v7105_v9 = vld [vmem:[%s10656_s8 + $0x4dc] sm:$0xf]  ;;  %v6376_v10 = vld [vmem:[%s10656_s8 + $0x4f4] sm:$0xf0] }
 0x223   :  { %3939 = vmatpush.bf16.msrb.mxu1 %v6035_v2  ;;  %3967 = vmatpush.bf16.msrb.mxu0 %v6483_v5  ;;  %v6150_v5 = vld [vmem:[%s10656_s8 + $0x318] sm:$0xf] }
 0x224   :  { %3925 = vmatpush.bf16.msrb.mxu3 %v5811_v20  ;;  %3953 = vmatpush.bf16.msrb.mxu2 %v6259_v22  ;;  %v6122_v22 = vld [vmem:[%s10656_s8 + $0x2e0] sm:$0xf] }
 0x227   :  { %3940 = vmatpush.bf16.msrb.mxu1 %v6007_v15  ;;  %3968 = vmatpush.bf16.msrb.mxu0 %v6455_v50  ;;  %v7003_v15 = vld [vmem:[%s10656_s8 + $0x1a8] sm:$0xf0]  ;;  %v6151_v50 = vor.u32 %v7052_v6, %v6150_v5  ;;  %v5842_v6 = vld [vmem:[%s10656_s8 + $0xb0] sm:$0xf] }
 0x228   :  { %3926 = vmatpush.bf16.msrb.mxu3 %v5783_v31  ;;  %3954 = vmatpush.bf16.msrb.mxu2 %v6231_v33  ;;  %v6996_v31 = vld [vmem:[%s10656_s8 + $0x170] sm:$0xf0]  ;;  %v6123_v33 = vor.u32 %v7045_v23, %v6122_v22  ;;  %v5982_v23 = vld [vmem:[%s10656_s8 + $0x1c8] sm:$0xf] }
 0x229   :  { %v7080_v22 = vld [vmem:[%s10656_s8 + $0x410] sm:$0xf0] }
 0x22b   :  { %3941 = vmatpush.bf16.msrb.mxu1 %v5979_v25  ;;  %3969 = vmatpush.bf16.msrb.mxu0 %v6427_v27  ;;  %v5955_v25 = vor.u32 %v7003_v15, %v5954_v14  ;;  %v7157_v27 = vld [vmem:[%s10656_s8 + $0x678] sm:$0xf0] }
 0x22c   :  { %3927 = vmatpush.bf16.msrb.mxu3 %v5755_v54  ;;  %3955 = vmatpush.bf16.msrb.mxu2 %v6203_v40  ;;  %v6571_v54 = vor.u32 %v7157_v27, %v6570_v26  ;;  %v5927_v40 = vor.u32 %v6996_v31, %v5926_v30  ;;  %v7017_v14 = vld [vmem:[%s10656_s8 + $0x218] sm:$0xf0]  ;;  %v7122_v26 = vld [vmem:[%s10656_s8 + $0x560] sm:$0xf0]  ;;  %v6180_v30 = vld [vmem:[%s10656_s8 + $0x36c] sm:$0xf0] }
 0x22d   :  { %v7168_v31 = vld [vmem:[%s10656_s8 + $0x6d4] sm:$0xf] }
 0x28a   :  { %v2395_v44 = vpop.f32.mrf.mxu1 }
 0x28b   :  { %v2423_v60 = vpop.f32.mrf.mxu0  ;;  %v2396_v17 = vadd.f32 %v2395_v44, %v2205_v37  ;;  %v7150_v44 = vld [vmem:[%s10656_s8 + $0x640] sm:$0xf0] }
 0x28c   :  { %v2424_v49 = vadd.f32 %v2423_v60, %v2207_v42  ;;  %v6375_v60 = vor.u32 %v7108_v35, %v6374_v34  ;;  %v6628_v34 = vld [vmem:[%s10656_s8 + $0x6ec] sm:$0xf0]  ;;  %v5786_v35 = vld [vmem:[%s10656_s8 + $0x40] sm:$0xf] }
 0x28d   :  { %v2429_v62 = vmax.f32 %v2396_v17, 0.0  ;;  %v6346_v17 = vld [vmem:[%s10656_s8 + $0x4a0] sm:$0xf] }
 0x28e   :  { %v2431_v0 = vmax.f32 %v2424_v49, 0.0  ;;  %v6543_v49 = vor.u32 %v7150_v44, %v6542_v41 }
 0x290   :  { %v2381_v47 = vpop.f32.mrf.mxu3 }
 0x291   :  { %v2409_v48 = vpop.f32.mrf.mxu2  ;;  %v2382_v2 = vadd.f32 %v2381_v47, %v2204_v52  ;;  %v6095_v47 = vor.u32 %v7038_v39, %v6094_v38  ;;  %v6234_v39 = vld [vmem:[%s10656_s8 + $0x3c0] sm:$0xf] }
 0x292   :  { %v2397_v51 = vpop.f32.mrf.mxu1  ;;  %v2410_v36 = vadd.f32 %v2409_v48, %v2206_v57  ;;  %v7101_v48 = vld [vmem:[%s10656_s8 + $0x4b8] sm:$0xf0] }
 0x293   :  { %v2398_v46 = vadd.f32 %v2397_v51, %v2205_v37  ;;  %v2425_v45 = vpop.f32.mrf.mxu0  ;;  %v2428_v19 = vmax.f32 %v2382_v2, 0.0  ;;  %v5898_v37 = vld [vmem:[%s10656_s8 + $0x120] sm:$0xf]  ;;  %v6066_v51 = vld [vmem:[%s10656_s8 + $0x270] sm:$0xf]  ;;  %v6347_v56 = vor.u32 %v7101_v48, %v6346_v17 }
 0x294   :  { %v2426_v58 = vadd.f32 %v2425_v45, %v2207_v42  ;;  %v2430_v8 = vmax.f32 %v2410_v36, 0.0  ;;  %v6989_v42 = vld [vmem:[%s10656_s8 + $0x138] sm:$0xf0]  ;;  %v6514_v45 = vld [vmem:[%s10656_s8 + $0x5f0] sm:$0xf] }
 0x295   :  { %v2433_v63 = vmax.f32 %v2398_v46, 0.0  ;;  %v5899_v46 = vor.u32 %v6989_v42, %v5898_v37  ;;  %v6486_v2 = vld [vmem:[%s10656_s8 + $0x5b8] sm:$0xf]  ;;  %v6975_v36 = vld [vmem:[%s10656_s8 + $0xc8] sm:$0xf0]  ;;  %v6631_v37 = vor.u32 %v7168_v31, %v6628_v34 }
 0x296   :  { %v2435_v1 = vmax.f32 %v2426_v58, 0.0  ;;  %v6982_v58 = vld [vmem:[%s10656_s8 + $0x100] sm:$0xf0]  ;;  %v5843_v15 = vor.u32 %v6975_v36, %v5842_v6  ;;  %v7161_v17 = vld [vmem:[%s10656_s8 + $0x69c] sm:$0xf] }
 0x297   :  { %v9644_v3 = vpack.c.bf16 %v2433_v63, %v2429_v62  ;;  %v7094_v62 = vld [vmem:[%s10656_s8 + $0x480] sm:$0xf0]  ;;  %v6515_v63 = vor.u32 %v7143_v53, %v6514_v45  ;;  %v6600_v48 = vld [vmem:[%s10656_s8 + $0x6b4] sm:$0xf0]  ;;  %v7000_v53 = vld [vmem:[%s10656_s8 + $0x194] sm:$0xf] }
 0x298   :  { %v9652_v11 = vpack.c.bf16 %v2435_v1, %v2431_v0  ;;  %v2383_v7 = vpop.f32.mrf.mxu3  ;;  %v6038_v0 = vld [vmem:[%s10656_s8 + $0x238] sm:$0xf]  ;;  %v7024_v1 = vld [vmem:[%s10656_s8 + $0x250] sm:$0xf0]  ;;  %v6319_v5 = vor.u32 %v7094_v62, %v6318_v61  ;;  %v7066_v45 = vld [vmem:[%s10656_s8 + $0x3a0] sm:$0xf0]  ;;  %v6603_v61 = vor.u32 %v7161_v17, %v6600_v48 }
 0x299   :  { %v2384_v12 = vadd.f32 %v2383_v7, %v2204_v52  ;;  %v2411_v13 = vpop.f32.mrf.mxu2  ;;  %3886 = vmatmul.bf16.vlgmr.msra.gmra.mxu1 %v9644_v3  ;;  %v7031_v52 = vld [vmem:[%s10656_s8 + $0x288] sm:$0xf0]  ;;  %v6039_v7 = vor.u32 %v7024_v1, %v6038_v0  ;;  %v6124_v0 = vld [vmem:[%s10656_s8 + $0x2fc] sm:$0xf0]  ;;  %v6993_v6 = vld [vmem:[%s10656_s8 + $0x15c] sm:$0xf] }
 0x29a   :  { %v2412_v16 = vadd.f32 %v2411_v13, %v2206_v57  ;;  %3914 = vmatmul.bf16.vlgmr.msra.gmra.mxu0 %v9652_v11  ;;  %3990 = vmatpush.bf16.msra.mxu1 %v6179_v43  ;;  %v5870_v57 = vld [vmem:[%s10656_s8 + $0xe8] sm:$0xf]  ;;  %v6067_v59 = vor.u32 %v7031_v52, %v6066_v51  ;;  %v6010_v13 = vld [vmem:[%s10656_s8 + $0x200] sm:$0xf]  ;;  %v6954_v52 = vld [vmem:[%s10656_s8 + $0x20] sm:$0xf0] }
 0x29b   :  { %v2432_v20 = vmax.f32 %v2384_v12, 0.0  ;;  %4018 = vmatpush.bf16.msra.mxu0 %v6627_v4  ;;  %v5871_v43 = vor.u32 %v6982_v58, %v5870_v57  ;;  %v7136_v4 = vld [vmem:[%s10656_s8 + $0x5d0] sm:$0xf0]  ;;  %v5758_v51 = vld [vmem:[%s10656_s8 + $0x8] sm:$0xf] }
 0x29c   :  { %v2434_v24 = vmax.f32 %v2412_v16, 0.0  ;;  %v6487_v12 = vor.u32 %v7136_v4, %v6486_v2  ;;  %v6458_v16 = vld [vmem:[%s10656_s8 + $0x580] sm:$0xf]  ;;  %v7112_v58 = vld [vmem:[%s10656_s8 + $0x514] sm:$0xf]  ;;  %v5759_v62 = vor.u32 %v6954_v52, %v5758_v51 }
 0x29d   :  { %v9686_v28 = vpack.c.bf16 %v2432_v20, %v2428_v19  ;;  %v6968_v19 = vld [vmem:[%s10656_s8 + $0x90] sm:$0xf0]  ;;  %v6011_v20 = vor.u32 %v7017_v14, %v6010_v13  ;;  %v7154_v2 = vld [vmem:[%s10656_s8 + $0x664] sm:$0xf]  ;;  %v6572_v4 = vld [vmem:[%s10656_s8 + $0x67c] sm:$0xf0] }
 0x29e   :  { %v9694_v32 = vpack.c.bf16 %v2434_v24, %v2430_v8  ;;  %3991 = vmatpush.bf16.msra.mxu1 %v6151_v50  ;;  %v7129_v50 = vld [vmem:[%s10656_s8 + $0x598] sm:$0xf0]  ;;  %v7010_v24 = vld [vmem:[%s10656_s8 + $0x1e0] sm:$0xf0]  ;;  %v5815_v27 = vor.u32 %v6968_v19, %v5814_v18  ;;  %v5928_v36 = vld [vmem:[%s10656_s8 + $0x174] sm:$0xf0] }
 0x29f   :  { %4019 = vmatpush.bf16.msra.mxu0 %v6599_v21  ;;  %3872 = vmatmul.bf16.vlgmr.msra.gmra.mxu3 %v9686_v28  ;;  %v6262_v21 = vld [vmem:[%s10656_s8 + $0x3f8] sm:$0xf]  ;;  %v6459_v8 = vor.u32 %v7129_v50, %v6458_v16  ;;  %v5983_v38 = vor.u32 %v7010_v24, %v5982_v23  ;;  %v7035_v13 = vld [vmem:[%s10656_s8 + $0x2ac] sm:$0xf]  ;;  %v6096_v14 = vld [vmem:[%s10656_s8 + $0x2c4] sm:$0xf0] }
 0x2a0   :  { %3900 = vmatmul.bf16.vlgmr.msra.gmra.mxu2 %v9694_v32  ;;  %3976 = vmatpush.bf16.msra.mxu3 %v5955_v25  ;;  %v6430_v25 = vld [vmem:[%s10656_s8 + $0x548] sm:$0xf]  ;;  %v7147_v16 = vld [vmem:[%s10656_s8 + $0x62c] sm:$0xf]  ;;  %v6986_v18 = vld [vmem:[%s10656_s8 + $0x124] sm:$0xf] }
 0x2a1   :  { %4004 = vmatpush.bf16.msra.mxu2 %v6403_v29  ;;  %v7056_v29 = vld [vmem:[%s10656_s8 + $0x354] sm:$0xf]  ;;  %v6431_v41 = vor.u32 %v7122_v26, %v6430_v25  ;;  %v6544_v50 = vld [vmem:[%s10656_s8 + $0x644] sm:$0xf0]  ;;  %v5900_v19 = vld [vmem:[%s10656_s8 + $0x13c] sm:$0xf0] }
 0x2a2   :  { %3992 = vmatpush.bf16.msra.mxu1 %v6123_v33  ;;  %v6263_v33 = vor.u32 %v7080_v22, %v6262_v21  ;;  %v6183_v44 = vor.u32 %v7056_v29, %v6180_v30  ;;  %v7098_v21 = vld [vmem:[%s10656_s8 + $0x4a4] sm:$0xf]  ;;  %v6348_v22 = vld [vmem:[%s10656_s8 + $0x4bc] sm:$0xf0]  ;;  %v6547_v23 = vor.u32 %v7147_v16, %v6544_v50  ;;  %v6068_v24 = vld [vmem:[%s10656_s8 + $0x28c] sm:$0xf0]  ;;  %v5903_v25 = vor.u32 %v6986_v18, %v5900_v19 }
 0x2a3   :  { %4020 = vmatpush.bf16.msra.mxu0 %v6571_v54  ;;  %v6961_v54 = vld [vmem:[%s10656_s8 + $0x58] sm:$0xf0]  ;;  %v7140_v26 = vld [vmem:[%s10656_s8 + $0x5f4] sm:$0xf]  ;;  %v6351_v29 = vor.u32 %v7098_v21, %v6348_v22  ;;  %v6979_v30 = vld [vmem:[%s10656_s8 + $0xec] sm:$0xf] }
 0x2a4   :  { %3977 = vmatpush.bf16.msra.mxu3 %v5927_v40  ;;  %v7073_v40 = vld [vmem:[%s10656_s8 + $0x3d8] sm:$0xf0]  ;;  %v5787_v42 = vor.u32 %v6961_v54, %v5786_v35  ;;  %v5872_v31 = vld [vmem:[%s10656_s8 + $0x104] sm:$0xf0]  ;;  %v7091_v34 = vld [vmem:[%s10656_s8 + $0x46c] sm:$0xf] }
 0x2a5   :  { %4005 = vmatpush.bf16.msra.mxu2 %v6375_v60  ;;  %v7049_v60 = vld [vmem:[%s10656_s8 + $0x31c] sm:$0xf]  ;;  %v6320_v35 = vld [vmem:[%s10656_s8 + $0x484] sm:$0xf0]  ;;  %v7084_v17 = vld [vmem:[%s10656_s8 + $0x434] sm:$0xf] }
 0x2a6   :  { %3993 = vmatpush.bf16.msra.mxu1 %v6095_v47  ;;  %v6152_v47 = vld [vmem:[%s10656_s8 + $0x334] sm:$0xf0]  ;;  %v6292_v48 = vld [vmem:[%s10656_s8 + $0x44c] sm:$0xf0]  ;;  %v7014_v51 = vld [vmem:[%s10656_s8 + $0x204] sm:$0xf] }
 0x2a7   :  { %4021 = vmatpush.bf16.msra.mxu0 %v6543_v49  ;;  %v6235_v49 = vor.u32 %v7073_v40, %v6234_v39  ;;  %v6155_v57 = vor.u32 %v7049_v60, %v6152_v47  ;;  %v6040_v39 = vld [vmem:[%s10656_s8 + $0x254] sm:$0xf0]  ;;  %v5875_v40 = vor.u32 %v6979_v30, %v5872_v31  ;;  %v6323_v60 = vor.u32 %v7091_v34, %v6320_v35  ;;  %v6012_v52 = vld [vmem:[%s10656_s8 + $0x21c] sm:$0xf0]  ;;  %v7165_v22 = vld [vmem:[%s10656_s8 + $0x6b8] sm:$0xf0] }
 0x2a8   :  { %3978 = vmatpush.bf16.msra.mxu3 %v5899_v46  ;;  %v6206_v46 = vld [vmem:[%s10656_s8 + $0x388] sm:$0xf]  ;;  %v6606_v21 = vld [vmem:[%s10656_s8 + $0x6a0] sm:$0xf]  ;;  %v6410_v31 = vld [vmem:[%s10656_s8 + $0x518] sm:$0xf] }
 0x2a9   :  { %4006 = vmatpush.bf16.msra.mxu2 %v6347_v56  ;;  %3942 = vmatmul.bf16.vlgmr.msrb.gmra.mxu1 %v9644_v3  ;;  %v5956_v56 = vld [vmem:[%s10656_s8 + $0x1ac] sm:$0xf0]  ;;  %v6207_v1 = vor.u32 %v7066_v45, %v6206_v46  ;;  %v7126_v45 = vld [vmem:[%s10656_s8 + $0x584] sm:$0xf]  ;;  %v6607_v34 = vor.u32 %v7165_v22, %v6606_v21  ;;  %v6298_v21 = vld [vmem:[%s10656_s8 + $0x438] sm:$0xf] }
 0x2aa   :  { %3970 = vmatmul.bf16.vlgmr.msrb.gmra.mxu0 %v9652_v11  ;;  %3994 = vmatpush.bf16.msra.mxu1 %v6067_v59  ;;  %v6404_v59 = vld [vmem:[%s10656_s8 + $0x52c] sm:$0xf0]  ;;  %v7088_v22 = vld [vmem:[%s10656_s8 + $0x450] sm:$0xf0] }
 0x2ab   :  { %4022 = vmatpush.bf16.msra.mxu0 %v6515_v63  ;;  %v7042_v63 = vld [vmem:[%s10656_s8 + $0x2e4] sm:$0xf] }
 0x2ac   :  { %3979 = vmatpush.bf16.msra.mxu3 %v5871_v43  ;;  %v5959_v43 = vor.u32 %v7000_v53, %v5956_v56  ;;  %v6460_v53 = vld [vmem:[%s10656_s8 + $0x59c] sm:$0xf0]  ;;  %v6295_v56 = vor.u32 %v7084_v17, %v6292_v48  ;;  %v7109_v48 = vld [vmem:[%s10656_s8 + $0x4f8] sm:$0xf0] }
 0x2ad   :  { %4007 = vmatpush.bf16.msra.mxu2 %v6319_v5  ;;  %v6407_v5 = vor.u32 %v7112_v58, %v6404_v59  ;;  %v5816_v58 = vld [vmem:[%s10656_s8 + $0x94] sm:$0xf0]  ;;  %v6015_v59 = vor.u32 %v7014_v51, %v6012_v52  ;;  %v6382_v17 = vld [vmem:[%s10656_s8 + $0x4e0] sm:$0xf]  ;;  %v6102_v51 = vld [vmem:[%s10656_s8 + $0x2b0] sm:$0xf] }
 0x2ae   :  { %3995 = vmatpush.bf16.msra.mxu1 %v6039_v7  ;;  %v6127_v7 = vor.u32 %v7042_v63, %v6124_v0  ;;  %v7007_v63 = vld [vmem:[%s10656_s8 + $0x1cc] sm:$0xf]  ;;  %v6463_v0 = vor.u32 %v7126_v45, %v6460_v53  ;;  %v6550_v45 = vld [vmem:[%s10656_s8 + $0x630] sm:$0xf] }
 0x2af   :  { %4023 = vmatpush.bf16.msra.mxu0 %v6487_v12  ;;  %3928 = vmatmul.bf16.vlgmr.msrb.gmra.mxu3 %v9686_v28  ;;  %v6575_v12 = vor.u32 %v7154_v2, %v6572_v4  ;;  %v6432_v2 = vld [vmem:[%s10656_s8 + $0x564] sm:$0xf0]  ;;  %v7039_v52 = vld [vmem:[%s10656_s8 + $0x2c8] sm:$0xf0] }
 0x2b0   :  { %3956 = vmatmul.bf16.vlgmr.msrb.gmra.mxu2 %v9694_v32  ;;  %3980 = vmatpush.bf16.msra.mxu3 %v5843_v15  ;;  %v5931_v15 = vor.u32 %v6993_v6, %v5928_v36  ;;  %v7060_v6 = vld [vmem:[%s10656_s8 + $0x370] sm:$0xf0]  ;;  %v6634_v36 = vld [vmem:[%s10656_s8 + $0x6d8] sm:$0xf]  ;;  %v7151_v53 = vld [vmem:[%s10656_s8 + $0x648] sm:$0xf0] }
 0x2b1   :  { %4008 = vmatpush.bf16.msra.mxu2 %v6291_v55  ;;  %v6379_v55 = vor.u32 %v7105_v9, %v6376_v10  ;;  %v7172_v9 = vld [vmem:[%s10656_s8 + $0x6f0] sm:$0xf0]  ;;  %v6958_v10 = vld [vmem:[%s10656_s8 + $0x44] sm:$0xf] }
 0x2b2   :  { %3996 = vmatpush.bf16.msra.mxu1 %v6011_v20  ;;  %v6099_v20 = vor.u32 %v7035_v13, %v6096_v14  ;;  %v7070_v14 = vld [vmem:[%s10656_s8 + $0x3c4] sm:$0xf]  ;;  %v6635_v18 = vor.u32 %v7172_v9, %v6634_v36  ;;  %v6983_v36 = vld [vmem:[%s10656_s8 + $0x108] sm:$0xf0]  ;;  %v6326_v9 = vld [vmem:[%s10656_s8 + $0x470] sm:$0xf] }
 0x2b3   :  { %4024 = vmatpush.bf16.msra.mxu0 %v6459_v8  ;;  %v7028_v8 = vld [vmem:[%s10656_s8 + $0x274] sm:$0xf] }
 0x2b4   :  { %3981 = vmatpush.bf16.msra.mxu3 %v5815_v27  ;;  %v6516_v27 = vld [vmem:[%s10656_s8 + $0x60c] sm:$0xf0] }
 0x2b5   :  { %4009 = vmatpush.bf16.msra.mxu2 %v6263_v33  ;;  %v6071_v33 = vor.u32 %v7028_v8, %v6068_v24  ;;  %v6519_v54 = vor.u32 %v7140_v26, %v6516_v27  ;;  %v6951_v8 = vld [vmem:[%s10656_s8 + $0xc] sm:$0xf]  ;;  %v5760_v24 = vld [vmem:[%s10656_s8 + $0x24] sm:$0xf0]  ;;  %v5962_v27 = vld [vmem:[%s10656_s8 + $0x198] sm:$0xf] }
 0x2b6   :  { %3997 = vmatpush.bf16.msra.mxu1 %v5983_v38  ;;  %v7021_v38 = vld [vmem:[%s10656_s8 + $0x23c] sm:$0xf]  ;;  %v6208_v26 = vld [vmem:[%s10656_s8 + $0x3a4] sm:$0xf0]  ;;  %v5763_v35 = vor.u32 %v6951_v8, %v5760_v24  ;;  %v7018_v24 = vld [vmem:[%s10656_s8 + $0x220] sm:$0xf0] }
 0x2b7   :  { %4025 = vmatpush.bf16.msra.mxu0 %v6431_v41  ;;  %v7133_v41 = vld [vmem:[%s10656_s8 + $0x5bc] sm:$0xf]  ;;  %v6043_v47 = vor.u32 %v7021_v38, %v6040_v39  ;;  %v7046_v38 = vld [vmem:[%s10656_s8 + $0x300] sm:$0xf0]  ;;  %v6018_v8 = vld [vmem:[%s10656_s8 + $0x208] sm:$0xf] }
 0x2b8   :  { %3982 = vmatpush.bf16.msra.mxu3 %v5787_v42  ;;  %v5844_v42 = vld [vmem:[%s10656_s8 + $0xcc] sm:$0xf0] }
 0x2b9   :  { %4010 = vmatpush.bf16.msra.mxu2 %v6235_v49  ;;  %3998 = vmatmul.bf16.vlgmr.msra.gmra.mxu1 %v9644_v3 }
 0x2ba   :  { %4046 = vmatpush.bf16.msrb.mxu1 %v6183_v44  ;;  %4026 = vmatmul.bf16.vlgmr.msra.gmra.mxu0 %v9652_v11  ;;  %v6488_v44 = vld [vmem:[%s10656_s8 + $0x5d4] sm:$0xf0] }
 0x2bb   :  { %4074 = vmatpush.bf16.msrb.mxu0 %v6631_v37  ;;  %v6972_v37 = vld [vmem:[%s10656_s8 + $0xb4] sm:$0xf]  ;;  %v6491_v49 = vor.u32 %v7133_v41, %v6488_v44  ;;  %v6578_v41 = vld [vmem:[%s10656_s8 + $0x668] sm:$0xf]  ;;  %v7158_v44 = vld [vmem:[%s10656_s8 + $0x680] sm:$0xf0] }
 0x2bc   :  { %3983 = vmatpush.bf16.msra.mxu3 %v5759_v62  ;;  %v5847_v46 = vor.u32 %v6972_v37, %v5844_v42  ;;  %v6264_v62 = vld [vmem:[%s10656_s8 + $0x414] sm:$0xf0]  ;;  %v5934_v37 = vld [vmem:[%s10656_s8 + $0x160] sm:$0xf]  ;;  %v6997_v42 = vld [vmem:[%s10656_s8 + $0x178] sm:$0xf0] }
 0x2bd   :  { %4011 = vmatpush.bf16.msra.mxu2 %v6207_v1  ;;  %v5984_v1 = vld [vmem:[%s10656_s8 + $0x1e4] sm:$0xf0] }
 0x2be   :  { %4047 = vmatpush.bf16.msrb.mxu1 %v6155_v57  ;;  %v6965_v57 = vld [vmem:[%s10656_s8 + $0x7c] sm:$0xf]  ;;  %v5987_v13 = vor.u32 %v7007_v63, %v5984_v1  ;;  %v6551_v63 = vor.u32 %v7151_v53, %v6550_v45  ;;  %v7032_v1 = vld [vmem:[%s10656_s8 + $0x290] sm:$0xf0] }
 0x2bf   :  { %4075 = vmatpush.bf16.msrb.mxu0 %v6603_v61  ;;  %3984 = vmatmul.bf16.vlgmr.msra.gmra.mxu3 %v9686_v28  ;;  %v7077_v61 = vld [vmem:[%s10656_s8 + $0x3fc] sm:$0xf]  ;;  %v5819_v4 = vor.u32 %v6965_v57, %v5816_v58  ;;  %v5906_v57 = vld [vmem:[%s10656_s8 + $0x128] sm:$0xf]  ;;  %v6990_v58 = vld [vmem:[%s10656_s8 + $0x140] sm:$0xf0] }
 0x2c0   :  { %4032 = vmatpush.bf16.msrb.mxu3 %v5959_v43  ;;  %4012 = vmatmul.bf16.vlgmr.msra.gmra.mxu2 %v9694_v32  ;;  %v7119_v43 = vld [vmem:[%s10656_s8 + $0x54c] sm:$0xf] }
 0x2c1   :  { %4060 = vmatpush.bf16.msrb.mxu2 %v6407_v5  ;;  %v6186_v5 = vld [vmem:[%s10656_s8 + $0x358] sm:$0xf]  ;;  %v6435_v16 = vor.u32 %v7119_v43, %v6432_v2  ;;  %v5907_v43 = vor.u32 %v6990_v58, %v5906_v57 }
 0x2c2   :  { %4048 = vmatpush.bf16.msrb.mxu1 %v6127_v7  ;;  %v6267_v7 = vor.u32 %v7077_v61, %v6264_v62  ;;  %v6187_v50 = vor.u32 %v7060_v6, %v6186_v5  ;;  %v6354_v61 = vld [vmem:[%s10656_s8 + $0x4a8] sm:$0xf]  ;;  %v7102_v62 = vld [vmem:[%s10656_s8 + $0x4c0] sm:$0xf0]  ;;  %v6522_v2 = vld [vmem:[%s10656_s8 + $0x5f8] sm:$0xf] }
 0x2c3   :  { %4076 = vmatpush.bf16.msrb.mxu0 %v6575_v12  ;;  %v5788_v12 = vld [vmem:[%s10656_s8 + $0x5c] sm:$0xf0]  ;;  %v6355_v5 = vor.u32 %v7102_v62, %v6354_v61  ;;  %v5878_v6 = vld [vmem:[%s10656_s8 + $0xf0] sm:$0xf]  ;;  %v7162_v61 = vld [vmem:[%s10656_s8 + $0x6a4] sm:$0xf] }
 0x2c4   :  { %4033 = vmatpush.bf16.msrb.mxu3 %v5931_v15  ;;  %v6236_v15 = vld [vmem:[%s10656_s8 + $0x3dc] sm:$0xf0]  ;;  %v5791_v19 = vor.u32 %v6958_v10, %v5788_v12  ;;  %v7095_v10 = vld [vmem:[%s10656_s8 + $0x488] sm:$0xf0] }
 0x2c5   :  { %4061 = vmatpush.bf16.msrb.mxu2 %v6379_v55  ;;  %v6158_v55 = vld [vmem:[%s10656_s8 + $0x320] sm:$0xf] }
 0x2c6   :  { %4049 = vmatpush.bf16.msrb.mxu1 %v6099_v20  ;;  %v7053_v20 = vld [vmem:[%s10656_s8 + $0x338] sm:$0xf0]  ;;  %v6608_v62 = vld [vmem:[%s10656_s8 + $0x6bc] sm:$0xf0] }
 0x2c7   :  { %4077 = vmatpush.bf16.msrb.mxu0 %v6547_v23  ;;  %v6239_v23 = vor.u32 %v7070_v14, %v6236_v15  ;;  %v6159_v30 = vor.u32 %v7053_v20, %v6158_v55  ;;  %v7025_v14 = vld [vmem:[%s10656_s8 + $0x258] sm:$0xf0]  ;;  %v5879_v15 = vor.u32 %v6983_v36, %v5878_v6  ;;  %v6327_v55 = vor.u32 %v7095_v10, %v6326_v9 }
 0x2c8   :  { %4034 = vmatpush.bf16.msrb.mxu3 %v5903_v25  ;;  %v7063_v25 = vld [vmem:[%s10656_s8 + $0x38c] sm:$0xf]  ;;  %v7113_v36 = vld [vmem:[%s10656_s8 + $0x51c] sm:$0xf]  ;;  %v6611_v9 = vor.u32 %v7162_v61, %v6608_v62  ;;  %v6300_v62 = vld [vmem:[%s10656_s8 + $0x454] sm:$0xf0] }
 0x2c9   :  { %4062 = vmatpush.bf16.msrb.mxu2 %v6351_v29  ;;  %v7004_v29 = vld [vmem:[%s10656_s8 + $0x1b0] sm:$0xf0]  ;;  %v6211_v39 = vor.u32 %v7063_v25, %v6208_v26  ;;  %v6466_v26 = vld [vmem:[%s10656_s8 + $0x588] sm:$0xf]  ;;  %v7085_v61 = vld [vmem:[%s10656_s8 + $0x43c] sm:$0xf] }
 0x2ca   :  { %4050 = vmatpush.bf16.msrb.mxu1 %v6071_v33  ;;  %v7116_v33 = vld [vmem:[%s10656_s8 + $0x530] sm:$0xf0] }
 0x2cb   :  { %4078 = vmatpush.bf16.msrb.mxu0 %v6519_v54  ;;  %v6130_v54 = vld [vmem:[%s10656_s8 + $0x2e8] sm:$0xf] }
 0x2cc   :  { %4035 = vmatpush.bf16.msrb.mxu3 %v5875_v40  ;;  %v5963_v40 = vor.u32 %v7004_v29, %v5962_v27  ;;  %v7130_v27 = vld [vmem:[%s10656_s8 + $0x5a0] sm:$0xf0]  ;;  %v6299_v29 = vor.u32 %v7088_v22, %v6298_v21  ;;  %v6384_v22 = vld [vmem:[%s10656_s8 + $0x4fc] sm:$0xf0] }
 0x2cd   :  { %4063 = vmatpush.bf16.msrb.mxu2 %v6323_v60  ;;  %v6411_v60 = vor.u32 %v7116_v33, %v6410_v31  ;;  %v6969_v31 = vld [vmem:[%s10656_s8 + $0x98] sm:$0xf0]  ;;  %v6019_v33 = vor.u32 %v7018_v24, %v6018_v8  ;;  %v7106_v21 = vld [vmem:[%s10656_s8 + $0x4e4] sm:$0xf]  ;;  %v7036_v8 = vld [vmem:[%s10656_s8 + $0x2b4] sm:$0xf] }
 0x2ce   :  { %4051 = vmatpush.bf16.msrb.mxu1 %v6043_v47  ;;  %v6131_v47 = vor.u32 %v7046_v38, %v6130_v54  ;;  %v5990_v54 = vld [vmem:[%s10656_s8 + $0x1d0] sm:$0xf]  ;;  %v6467_v38 = vor.u32 %v7130_v27, %v6466_v26  ;;  %v7148_v26 = vld [vmem:[%s10656_s8 + $0x634] sm:$0xf] }
 0x2cf   :  { %4079 = vmatpush.bf16.msrb.mxu0 %v6491_v49  ;;  %v6579_v49 = vor.u32 %v7158_v44, %v6578_v41  ;;  %v7123_v41 = vld [vmem:[%s10656_s8 + $0x568] sm:$0xf0]  ;;  %v6104_v24 = vld [vmem:[%s10656_s8 + $0x2cc] sm:$0xf0] }
 0x2d0   :  { %4036 = vmatpush.bf16.msrb.mxu3 %v5847_v46  ;;  %v5935_v46 = vor.u32 %v6997_v42, %v5934_v37  ;;  %v6188_v37 = vld [vmem:[%s10656_s8 + $0x374] sm:$0xf0]  ;;  %v7169_v42 = vld [vmem:[%s10656_s8 + $0x6dc] sm:$0xf]  ;;  %v6552_v27 = vld [vmem:[%s10656_s8 + $0x64c] sm:$0xf0] }
 0x2d1   :  { %4064 = vmatpush.bf16.msrb.mxu2 %v6295_v56  ;;  %v6383_v56 = vor.u32 %v7109_v48, %v6382_v17  ;;  %v6636_v17 = vld [vmem:[%s10656_s8 + $0x6f4] sm:$0xf0]  ;;  %v5794_v48 = vld [vmem:[%s10656_s8 + $0x48] sm:$0xf] }
 0x2d2   :  { %4052 = vmatpush.bf16.msrb.mxu1 %v6015_v59  ;;  %v6103_v59 = vor.u32 %v7039_v52, %v6102_v51  ;;  %v6242_v52 = vld [vmem:[%s10656_s8 + $0x3c8] sm:$0xf]  ;;  %v6639_v57 = vor.u32 %v7169_v42, %v6636_v17  ;;  %v5880_v42 = vld [vmem:[%s10656_s8 + $0x10c] sm:$0xf0]  ;;  %v7092_v17 = vld [vmem:[%s10656_s8 + $0x474] sm:$0xf] }
 0x2d3   :  { %4080 = vmatpush.bf16.msrb.mxu0 %v6463_v0  ;;  %v6074_v0 = vld [vmem:[%s10656_s8 + $0x278] sm:$0xf] }
 0x2d4   :  { %4037 = vmatpush.bf16.msrb.mxu3 %v5819_v4  ;;  %v7144_v4 = vld [vmem:[%s10656_s8 + $0x610] sm:$0xf0] }
 0x2d5   :  { %4065 = vmatpush.bf16.msrb.mxu2 %v6267_v7  ;;  %v6075_v7 = vor.u32 %v7032_v1, %v6074_v0  ;;  %v6523_v12 = vor.u32 %v7144_v4, %v6522_v2  ;;  %v5766_v0 = vld [vmem:[%s10656_s8 + $0x10] sm:$0xf]  ;;  %v6955_v1 = vld [vmem:[%s10656_s8 + $0x28] sm:$0xf0]  ;;  %v7001_v4 = vld [vmem:[%s10656_s8 + $0x19c] sm:$0xf] }
 0x2d6   :  { %4053 = vmatpush.bf16.msrb.mxu1 %v5987_v13  ;;  %v6046_v13 = vld [vmem:[%s10656_s8 + $0x240] sm:$0xf]  ;;  %v7067_v2 = vld [vmem:[%s10656_s8 + $0x3a8] sm:$0xf0]  ;;  %v5767_v10 = vor.u32 %v6955_v1, %v5766_v0  ;;  %v6020_v1 = vld [vmem:[%s10656_s8 + $0x224] sm:$0xf0] }
 0x2d7   :  { %4081 = vmatpush.bf16.msrb.mxu0 %v6435_v16  ;;  %v6494_v16 = vld [vmem:[%s10656_s8 + $0x5c0] sm:$0xf]  ;;  %v6047_v20 = vor.u32 %v7025_v14, %v6046_v13  ;;  %v6132_v13 = vld [vmem:[%s10656_s8 + $0x304] sm:$0xf0]  ;;  %v7015_v0 = vld [vmem:[%s10656_s8 + $0x20c] sm:$0xf] }
 0x2d8   :  { %4038 = vmatpush.bf16.msrb.mxu3 %v5791_v19  ;;  %v6976_v19 = vld [vmem:[%s10656_s8 + $0xd0] sm:$0xf0] }
 0x2d9   :  { %4066 = vmatpush.bf16.msrb.mxu2 %v6239_v23  ;;  %4054 = vmatmul.bf16.vlgmr.msrb.gmra.mxu1 %v9644_v3 }
 0x2da   :  { %4102 = vmatpush.bf16.msra.mxu1 %v6187_v50  ;;  %4082 = vmatmul.bf16.vlgmr.msrb.gmra.mxu0 %v9652_v11  ;;  %v7137_v50 = vld [vmem:[%s10656_s8 + $0x5d8] sm:$0xf0] }
 0x2db   :  { %4130 = vmatpush.bf16.msra.mxu0 %v6635_v18  ;;  %v5850_v18 = vld [vmem:[%s10656_s8 + $0xb8] sm:$0xf]  ;;  %v6495_v23 = vor.u32 %v7137_v50, %v6494_v16  ;;  %v7155_v16 = vld [vmem:[%s10656_s8 + $0x66c] sm:$0xf]  ;;  %v6580_v50 = vld [vmem:[%s10656_s8 + $0x684] sm:$0xf0] }
 0x2dc   :  { %4039 = vmatpush.bf16.msrb.mxu3 %v5763_v35  ;;  %v5851_v25 = vor.u32 %v6976_v19, %v5850_v18  ;;  %v7081_v35 = vld [vmem:[%s10656_s8 + $0x418] sm:$0xf0]  ;;  %v6994_v18 = vld [vmem:[%s10656_s8 + $0x164] sm:$0xf]  ;;  %v5936_v19 = vld [vmem:[%s10656_s8 + $0x17c] sm:$0xf0] }
 0x2dd   :  { %4067 = vmatpush.bf16.msrb.mxu2 %v6211_v39  ;;  %v7011_v39 = vld [vmem:[%s10656_s8 + $0x1e8] sm:$0xf0] }
 0x2de   :  { %4103 = vmatpush.bf16.msra.mxu1 %v6159_v30  ;;  %v5822_v30 = vld [vmem:[%s10656_s8 + $0x80] sm:$0xf]  ;;  %v5991_v51 = vor.u32 %v7011_v39, %v5990_v54  ;;  %v6555_v54 = vor.u32 %v7148_v26, %v6552_v27  ;;  %v6076_v39 = vld [vmem:[%s10656_s8 + $0x294] sm:$0xf0] }
 0x2df   :  { %4131 = vmatpush.bf16.msra.mxu0 %v6607_v34  ;;  %4040 = vmatmul.bf16.vlgmr.msrb.gmra.mxu3 %v9686_v28  ;;  %v6270_v34 = vld [vmem:[%s10656_s8 + $0x400] sm:$0xf]  ;;  %v5823_v44 = vor.u32 %v6969_v31, %v5822_v30  ;;  %v6987_v30 = vld [vmem:[%s10656_s8 + $0x12c] sm:$0xf]  ;;  %v5908_v31 = vld [vmem:[%s10656_s8 + $0x144] sm:$0xf0] }
 0x2e0   :  { %4088 = vmatpush.bf16.msra.mxu3 %v5963_v40  ;;  %4068 = vmatmul.bf16.vlgmr.msrb.gmra.mxu2 %v9694_v32  ;;  %v6438_v40 = vld [vmem:[%s10656_s8 + $0x550] sm:$0xf] }
 0x2e1   :  { %4116 = vmatpush.bf16.msra.mxu2 %v6411_v60  ;;  %v7057_v60 = vld [vmem:[%s10656_s8 + $0x35c] sm:$0xf]  ;;  %v6439_v45 = vor.u32 %v7123_v41, %v6438_v40  ;;  %v5911_v40 = vor.u32 %v6987_v30, %v5908_v31 }
 0x2e2   :  { %4104 = vmatpush.bf16.msra.mxu1 %v6131_v47  ;;  %v6271_v47 = vor.u32 %v7081_v35, %v6270_v34  ;;  %v6191_v53 = vor.u32 %v7057_v60, %v6188_v37  ;;  %v7099_v34 = vld [vmem:[%s10656_s8 + $0x4ac] sm:$0xf]  ;;  %v6356_v35 = vld [vmem:[%s10656_s8 + $0x4c4] sm:$0xf0]  ;;  %v7141_v41 = vld [vmem:[%s10656_s8 + $0x5fc] sm:$0xf] }
 0x2e3   :  { %4132 = vmatpush.bf16.msra.mxu0 %v6579_v49  ;;  %v6962_v49 = vld [vmem:[%s10656_s8 + $0x60] sm:$0xf0]  ;;  %v6359_v60 = vor.u32 %v7099_v34, %v6356_v35  ;;  %v6980_v37 = vld [vmem:[%s10656_s8 + $0xf4] sm:$0xf]  ;;  %v6614_v34 = vld [vmem:[%s10656_s8 + $0x6a8] sm:$0xf] }
 0x2e4   :  { %4089 = vmatpush.bf16.msra.mxu3 %v5935_v46  ;;  %v7074_v46 = vld [vmem:[%s10656_s8 + $0x3e0] sm:$0xf0]  ;;  %v5795_v58 = vor.u32 %v6962_v49, %v5794_v48  ;;  %v6328_v48 = vld [vmem:[%s10656_s8 + $0x48c] sm:$0xf0] }
 0x2e5   :  { %4117 = vmatpush.bf16.msra.mxu2 %v6383_v56  ;;  %v7050_v56 = vld [vmem:[%s10656_s8 + $0x324] sm:$0xf] }
 0x2e6   :  { %4105 = vmatpush.bf16.msra.mxu1 %v6103_v59  ;;  %v6160_v59 = vld [vmem:[%s10656_s8 + $0x33c] sm:$0xf0]  ;;  %v7166_v35 = vld [vmem:[%s10656_s8 + $0x6c0] sm:$0xf0] }
 0x2e7   :  { %4133 = vmatpush.bf16.msra.mxu0 %v6551_v63  ;;  %v6243_v63 = vor.u32 %v7074_v46, %v6242_v52  ;;  %v6163_v6 = vor.u32 %v7050_v56, %v6160_v59  ;;  %v6048_v52 = vld [vmem:[%s10656_s8 + $0x25c] sm:$0xf0]  ;;  %v5883_v46 = vor.u32 %v6980_v37, %v5880_v42  ;;  %v6331_v56 = vor.u32 %v7092_v17, %v6328_v48 }
 0x2e8   :  { %4090 = vmatpush.bf16.msra.mxu3 %v5907_v43  ;;  %v6214_v43 = vld [vmem:[%s10656_s8 + $0x390] sm:$0xf]  ;;  %v6418_v42 = vld [vmem:[%s10656_s8 + $0x520] sm:$0xf]  ;;  %v6615_v17 = vor.u32 %v7166_v35, %v6614_v34  ;;  %v6977_v34 = vld [vmem:[%s10656_s8 + $0xd8] sm:$0xf0] }
 0x2e9   :  { %4118 = vmatpush.bf16.msra.mxu2 %v6355_v5  ;;  %v5964_v5 = vld [vmem:[%s10656_s8 + $0x1b4] sm:$0xf0]  ;;  %v6215_v14 = vor.u32 %v7067_v2, %v6214_v43  ;;  %v7127_v2 = vld [vmem:[%s10656_s8 + $0x58c] sm:$0xf] }
 0x2ea   :  { %4106 = vmatpush.bf16.msra.mxu1 %v6075_v7  ;;  %v6412_v7 = vld [vmem:[%s10656_s8 + $0x534] sm:$0xf0] }
 0x2eb   :  { %4134 = vmatpush.bf16.msra.mxu0 %v6523_v12  ;;  %v7043_v12 = vld [vmem:[%s10656_s8 + $0x2ec] sm:$0xf] }
 0x2ec   :  { %4091 = vmatpush.bf16.msra.mxu3 %v5879_v15  ;;  %v5967_v15 = vor.u32 %v7001_v4, %v5964_v5  ;;  %v6468_v4 = vld [vmem:[%s10656_s8 + $0x5a4] sm:$0xf0]  ;;  %v6303_v5 = vor.u32 %v7085_v61, %v6300_v62  ;;  %v7110_v62 = vld [vmem:[%s10656_s8 + $0x500] sm:$0xf0] }
 0x2ed   :  { %4119 = vmatpush.bf16.msra.mxu2 %v6327_v55  ;;  %v6415_v55 = vor.u32 %v7113_v36, %v6412_v7  ;;  %v5824_v36 = vld [vmem:[%s10656_s8 + $0x9c] sm:$0xf0]  ;;  %v6023_v7 = vor.u32 %v7015_v0, %v6020_v1  ;;  %v6390_v61 = vld [vmem:[%s10656_s8 + $0x4e8] sm:$0xf]  ;;  %v6110_v0 = vld [vmem:[%s10656_s8 + $0x2b8] sm:$0xf] }
 0x2ee   :  { %4107 = vmatpush.bf16.msra.mxu1 %v6047_v20  ;;  %v6135_v20 = vor.u32 %v7043_v12, %v6132_v13  ;;  %v7008_v12 = vld [vmem:[%s10656_s8 + $0x1d4] sm:$0xf]  ;;  %v6471_v13 = vor.u32 %v7127_v2, %v6468_v4  ;;  %v6558_v2 = vld [vmem:[%s10656_s8 + $0x638] sm:$0xf] }
 0x2ef   :  { %4135 = vmatpush.bf16.msra.mxu0 %v6495_v23  ;;  %v6583_v23 = vor.u32 %v7155_v16, %v6580_v50  ;;  %v6440_v16 = vld [vmem:[%s10656_s8 + $0x56c] sm:$0xf0]  ;;  %v7040_v1 = vld [vmem:[%s10656_s8 + $0x2d0] sm:$0xf0] }
 0x2f0   :  { %4092 = vmatpush.bf16.msra.mxu3 %v5851_v25  ;;  %v5939_v25 = vor.u32 %v6994_v18, %v5936_v19  ;;  %v7061_v18 = vld [vmem:[%s10656_s8 + $0x378] sm:$0xf0]  ;;  %v6642_v19 = vld [vmem:[%s10656_s8 + $0x6e0] sm:$0xf]  ;;  %v7152_v4 = vld [vmem:[%s10656_s8 + $0x650] sm:$0xf0] }
 0x2f1   :  { %4120 = vmatpush.bf16.msra.mxu2 %v6299_v29  ;;  %v6387_v29 = vor.u32 %v7106_v21, %v6384_v22  ;;  %v7173_v21 = vld [vmem:[%s10656_s8 + $0x6f8] sm:$0xf0]  ;;  %v6959_v22 = vld [vmem:[%s10656_s8 + $0x4c] sm:$0xf] }
 0x2f2   :  { %4108 = vmatpush.bf16.msra.mxu1 %v6019_v33  ;;  %v6107_v33 = vor.u32 %v7036_v8, %v6104_v24  ;;  %v7071_v24 = vld [vmem:[%s10656_s8 + $0x3cc] sm:$0xf]  ;;  %v6643_v30 = vor.u32 %v7173_v21, %v6642_v19  ;;  %v6984_v19 = vld [vmem:[%s10656_s8 + $0x110] sm:$0xf0]  ;;  %v6334_v21 = vld [vmem:[%s10656_s8 + $0x478] sm:$0xf] }
 0x2f3   :  { %4136 = vmatpush.bf16.msra.mxu0 %v6467_v38  ;;  %v7029_v38 = vld [vmem:[%s10656_s8 + $0x27c] sm:$0xf] }
 0x2f4   :  { %4093 = vmatpush.bf16.msra.mxu3 %v5823_v44  ;;  %v6524_v44 = vld [vmem:[%s10656_s8 + $0x614] sm:$0xf0] }
 0x2f5   :  { %4121 = vmatpush.bf16.msra.mxu2 %v6271_v47  ;;  %v6079_v47 = vor.u32 %v7029_v38, %v6076_v39  ;;  %v6527_v49 = vor.u32 %v7141_v41, %v6524_v44  ;;  %v6952_v38 = vld [vmem:[%s10656_s8 + $0x14] sm:$0xf]  ;;  %v5768_v39 = vld [vmem:[%s10656_s8 + $0x2c] sm:$0xf0]  ;;  %v5970_v44 = vld [vmem:[%s10656_s8 + $0x1a0] sm:$0xf] }
 0x2f6   :  { %4109 = vmatpush.bf16.msra.mxu1 %v5991_v51  ;;  %v7022_v51 = vld [vmem:[%s10656_s8 + $0x244] sm:$0xf]  ;;  %v6216_v41 = vld [vmem:[%s10656_s8 + $0x3ac] sm:$0xf0]  ;;  %v5771_v48 = vor.u32 %v6952_v38, %v5768_v39  ;;  %v7089_v38 = vld [vmem:[%s10656_s8 + $0x458] sm:$0xf0] }
 0x2f7   :  { %4137 = vmatpush.bf16.msra.mxu0 %v6439_v45  ;;  %v7134_v45 = vld [vmem:[%s10656_s8 + $0x5c4] sm:$0xf]  ;;  %v6051_v59 = vor.u32 %v7022_v51, %v6048_v52  ;;  %v7047_v51 = vld [vmem:[%s10656_s8 + $0x308] sm:$0xf0] }
 0x2f8   :  { %4094 = vmatpush.bf16.msra.mxu3 %v5795_v58  ;;  %v5852_v58 = vld [vmem:[%s10656_s8 + $0xd4] sm:$0xf0] }
 0x2f9   :  { %4122 = vmatpush.bf16.msra.mxu2 %v6243_v63  ;;  %4110 = vmatmul.bf16.vlgmr.msra.gmra.mxu1 %v9644_v3 }
 0x2fa   :  { %4158 = vmatpush.bf16.msrb.mxu1 %v6191_v53  ;;  %4138 = vmatmul.bf16.vlgmr.msra.gmra.mxu0 %v9652_v11  ;;  %v6496_v53 = vld [vmem:[%s10656_s8 + $0x5dc] sm:$0xf0] }
 0x2fb   :  { %4186 = vmatpush.bf16.msrb.mxu0 %v6639_v57  ;;  %v6973_v57 = vld [vmem:[%s10656_s8 + $0xbc] sm:$0xf]  ;;  %v6499_v63 = vor.u32 %v7134_v45, %v6496_v53  ;;  %v6586_v45 = vld [vmem:[%s10656_s8 + $0x670] sm:$0xf]  ;;  %v7159_v53 = vld [vmem:[%s10656_s8 + $0x688] sm:$0xf0] }
 0x2fc   :  { %4095 = vmatpush.bf16.msra.mxu3 %v5767_v10  ;;  %v5855_v43 = vor.u32 %v6973_v57, %v5852_v58  ;;  %v6272_v10 = vld [vmem:[%s10656_s8 + $0x41c] sm:$0xf0]  ;;  %v5942_v57 = vld [vmem:[%s10656_s8 + $0x168] sm:$0xf]  ;;  %v6998_v58 = vld [vmem:[%s10656_s8 + $0x180] sm:$0xf0] }
 0x2fd   :  { %4123 = vmatpush.bf16.msra.mxu2 %v6215_v14  ;;  %v5992_v14 = vld [vmem:[%s10656_s8 + $0x1ec] sm:$0xf0] }
 0x2fe   :  { %4159 = vmatpush.bf16.msrb.mxu1 %v6163_v6  ;;  %v6966_v6 = vld [vmem:[%s10656_s8 + $0x84] sm:$0xf]  ;;  %v5995_v8 = vor.u32 %v7008_v12, %v5992_v14  ;;  %v6559_v12 = vor.u32 %v7152_v4, %v6558_v2  ;;  %v7033_v14 = vld [vmem:[%s10656_s8 + $0x298] sm:$0xf0]  ;;  %v6963_v2 = vld [vmem:[%s10656_s8 + $0x68] sm:$0xf0] }
 0x2ff   :  { %4187 = vmatpush.bf16.msrb.mxu0 %v6611_v9  ;;  %4096 = vmatmul.bf16.vlgmr.msra.gmra.mxu3 %v9686_v28  ;;  %v7078_v9 = vld [vmem:[%s10656_s8 + $0x404] sm:$0xf]  ;;  %v5827_v50 = vor.u32 %v6966_v6, %v5824_v36  ;;  %v5914_v6 = vld [vmem:[%s10656_s8 + $0x130] sm:$0xf]  ;;  %v6991_v36 = vld [vmem:[%s10656_s8 + $0x148] sm:$0xf0] }
 0x300   :  { %4144 = vmatpush.bf16.msrb.mxu3 %v5967_v15  ;;  %4124 = vmatmul.bf16.vlgmr.msra.gmra.mxu2 %v9694_v32  ;;  %v7120_v15 = vld [vmem:[%s10656_s8 + $0x554] sm:$0xf] }
 0x301   :  { %4172 = vmatpush.bf16.msrb.mxu2 %v6415_v55  ;;  %v6194_v55 = vld [vmem:[%s10656_s8 + $0x360] sm:$0xf]  ;;  %v6443_v26 = vor.u32 %v7120_v15, %v6440_v16  ;;  %v5915_v15 = vor.u32 %v6991_v36, %v5914_v6  ;;  %v6250_v6 = vld [vmem:[%s10656_s8 + $0x3d0] sm:$0xf]  ;;  %v7075_v36 = vld [vmem:[%s10656_s8 + $0x3e8] sm:$0xf0] }
 0x302   :  { %4160 = vmatpush.bf16.msrb.mxu1 %v6135_v20  ;;  %v6275_v20 = vor.u32 %v7078_v9, %v6272_v10  ;;  %v6195_v27 = vor.u32 %v7061_v18, %v6194_v55  ;;  %v6362_v9 = vld [vmem:[%s10656_s8 + $0x4b0] sm:$0xf]  ;;  %v7103_v10 = vld [vmem:[%s10656_s8 + $0x4c8] sm:$0xf0]  ;;  %v6530_v16 = vld [vmem:[%s10656_s8 + $0x600] sm:$0xf] }
 0x303   :  { %4188 = vmatpush.bf16.msrb.mxu0 %v6583_v23  ;;  %v5796_v23 = vld [vmem:[%s10656_s8 + $0x64] sm:$0xf0]  ;;  %v6363_v55 = vor.u32 %v7103_v10, %v6362_v9  ;;  %v5886_v18 = vld [vmem:[%s10656_s8 + $0xf8] sm:$0xf] }
 0x304   :  { %4145 = vmatpush.bf16.msrb.mxu3 %v5939_v25  ;;  %v6244_v25 = vld [vmem:[%s10656_s8 + $0x3e4] sm:$0xf0]  ;;  %v5799_v31 = vor.u32 %v6959_v22, %v5796_v23  ;;  %v7096_v22 = vld [vmem:[%s10656_s8 + $0x490] sm:$0xf0] }
 0x305   :  { %4173 = vmatpush.bf16.msrb.mxu2 %v6387_v29  ;;  %v6166_v29 = vld [vmem:[%s10656_s8 + $0x328] sm:$0xf] }
 0x306   :  { %4161 = vmatpush.bf16.msrb.mxu1 %v6107_v33  ;;  %v7054_v33 = vld [vmem:[%s10656_s8 + $0x340] sm:$0xf0] }
 0x307   :  { %4189 = vmatpush.bf16.msrb.mxu0 %v6555_v54  ;;  %v6247_v54 = vor.u32 %v7071_v24, %v6244_v25  ;;  %v6167_v37 = vor.u32 %v7054_v33, %v6166_v29  ;;  %v7026_v24 = vld [vmem:[%s10656_s8 + $0x260] sm:$0xf0]  ;;  %v5858_v33 = vld [vmem:[%s10656_s8 + $0xc0] sm:$0xf] }
 0x308   :  { %4146 = vmatpush.bf16.msrb.mxu3 %v5911_v40  ;;  %v7064_v40 = vld [vmem:[%s10656_s8 + $0x394] sm:$0xf]  ;;  %v7138_v29 = vld [vmem:[%s10656_s8 + $0x5e0] sm:$0xf0] }
 0x309   :  { %4174 = vmatpush.bf16.msrb.mxu2 %v6359_v60  ;;  %v7005_v60 = vld [vmem:[%s10656_s8 + $0x1b8] sm:$0xf0]  ;;  %v6219_v52 = vor.u32 %v7064_v40, %v6216_v41  ;;  %v6026_v41 = vld [vmem:[%s10656_s8 + $0x210] sm:$0xf] }
 0x30a   :  { %4162 = vmatpush.bf16.msrb.mxu1 %v6079_v47  ;;  %v7117_v47 = vld [vmem:[%s10656_s8 + $0x538] sm:$0xf0] }
 0x30b   :  { %4190 = vmatpush.bf16.msrb.mxu0 %v6527_v49  ;;  %v6138_v49 = vld [vmem:[%s10656_s8 + $0x2f0] sm:$0xf] }
 0x30c   :  { %4147 = vmatpush.bf16.msrb.mxu3 %v5883_v46  ;;  %v5971_v46 = vor.u32 %v7005_v60, %v5970_v44  ;;  %v7019_v44 = vld [vmem:[%s10656_s8 + $0x228] sm:$0xf0] }
 0x30d   :  { %4175 = vmatpush.bf16.msrb.mxu2 %v6331_v56  ;;  %v6419_v56 = vor.u32 %v7117_v47, %v6418_v42  ;;  %v6474_v42 = vld [vmem:[%s10656_s8 + $0x590] sm:$0xf]  ;;  %v7131_v47 = vld [vmem:[%s10656_s8 + $0x5a8] sm:$0xf0] }
 0x30e   :  { %4163 = vmatpush.bf16.msrb.mxu1 %v6051_v59  ;;  %v6139_v59 = vor.u32 %v7047_v51, %v6138_v49  ;;  %v6970_v49 = vld [vmem:[%s10656_s8 + $0xa0] sm:$0xf0] }
 0x30f   :  { %4191 = vmatpush.bf16.msrb.mxu0 %v6499_v63  ;;  %v6587_v63 = vor.u32 %v7159_v53, %v6586_v45  ;;  %v7082_v45 = vld [vmem:[%s10656_s8 + $0x420] sm:$0xf0] }
 0x310   :  { %4148 = vmatpush.bf16.msrb.mxu3 %v5855_v43  ;;  %v5943_v43 = vor.u32 %v6998_v58, %v5942_v57  ;;  %v6475_v57 = vor.u32 %v7131_v47, %v6474_v42  ;;  %v5998_v58 = vld [vmem:[%s10656_s8 + $0x1d8] sm:$0xf] }
 0x311   :  { %4176 = vmatpush.bf16.msrb.mxu2 %v6303_v5  ;;  %v6391_v5 = vor.u32 %v7110_v62, %v6390_v61  ;;  %v6446_v62 = vld [vmem:[%s10656_s8 + $0x558] sm:$0xf] }
 0x312   :  { %4164 = vmatpush.bf16.msrb.mxu1 %v6023_v7  ;;  %v6111_v7 = vor.u32 %v7040_v1, %v6110_v0 }
 0x313   :  { %4192 = vmatpush.bf16.msrb.mxu0 %v6471_v13  ;;  %v6082_v13 = vld [vmem:[%s10656_s8 + $0x280] sm:$0xf] }
 0x314   :  { %4149 = vmatpush.bf16.msrb.mxu3 %v5827_v50  ;;  %v7145_v50 = vld [vmem:[%s10656_s8 + $0x618] sm:$0xf0] }
 0x315   :  { %4177 = vmatpush.bf16.msrb.mxu2 %v6275_v20  ;;  %v6083_v20 = vor.u32 %v7033_v14, %v6082_v13  ;;  %v6531_v23 = vor.u32 %v7145_v50, %v6530_v16  ;;  %v6251_v13 = vor.u32 %v7075_v36, %v6250_v6  ;;  %v5774_v14 = vld [vmem:[%s10656_s8 + $0x18] sm:$0xf] }
 0x316   :  { %4165 = vmatpush.bf16.msrb.mxu1 %v5995_v8  ;;  %v6054_v8 = vld [vmem:[%s10656_s8 + $0x248] sm:$0xf]  ;;  %v3887_v25 = vpop.f32.mrf.mxu1 }
 0x317   :  { %4193 = vmatpush.bf16.msrb.mxu0 %v6443_v26  ;;  %v5887_v26 = vor.u32 %v6984_v19, %v5886_v18  ;;  %v6055_v35 = vor.u32 %v7026_v24, %v6054_v8  ;;  %v3915_v60 = vpop.f32.mrf.mxu0  ;;  %v7068_v18 = vld [vmem:[%s10656_s8 + $0x3b0] sm:$0xf0] }
 0x318   :  { %4150 = vmatpush.bf16.msrb.mxu3 %v5799_v31  ;;  %v6335_v31 = vor.u32 %v7096_v22, %v6334_v21 }
 0x319   :  { %4178 = vmatpush.bf16.msrb.mxu2 %v6247_v54  ;;  %4166 = vmatmul.bf16.vlgmr.msrb.gmra.mxu1 %v9644_v3  ;;  %v6306_v54 = vld [vmem:[%s10656_s8 + $0x440] sm:$0xf] }
 0x31a   :  { %4214 = vmatpush.bf16.msra.mxu1 %v6195_v27  ;;  %4194 = vmatmul.bf16.vlgmr.msrb.gmra.mxu0 %v9652_v11  ;;  %v6502_v27 = vld [vmem:[%s10656_s8 + $0x5c8] sm:$0xf] }
 0x31b   :  { %4242 = vmatpush.bf16.msra.mxu0 %v6643_v30  ;;  %v10555_v30 = vld [vmem:[%s10657_s9] sm:$0x7f]  ;;  %v6503_v39 = vor.u32 %v7138_v29, %v6502_v27 }
 0x31c   :  { %4151 = vmatpush.bf16.msrb.mxu3 %v5771_v48  ;;  %v2698_v40 = vperm.slane %v10555_v30, 0  ;;  %v5830_v48 = vld [vmem:[%s10656_s8 + $0x88] sm:$0xf] }
 0x31d   :  { %4179 = vmatpush.bf16.msrb.mxu2 %v6219_v52  ;;  %v6027_v52 = vor.u32 %v7019_v44, %v6026_v41  ;;  %v5831_v61 = vor.u32 %v6970_v49, %v5830_v48 }
 0x31e   :  { %4215 = vmatpush.bf16.msra.mxu1 %v6167_v37  ;;  %v5859_v37 = vor.u32 %v6977_v34, %v5858_v33  ;;  %v3889_v4 = vpop.f32.mrf.mxu1 }
 0x31f   :  { %4243 = vmatpush.bf16.msra.mxu0 %v6615_v17  ;;  %4152 = vmatmul.bf16.vlgmr.msrb.gmra.mxu3 %v9686_v28  ;;  %v6307_v17 = vor.u32 %v7089_v38, %v6306_v54  ;;  %v3917_v16 = vpop.f32.mrf.mxu0 }
 0x320   :  { %4200 = vmatpush.bf16.msra.mxu3 %v5971_v46  ;;  %4180 = vmatmul.bf16.vlgmr.msrb.gmra.mxu2 %v9694_v32  ;;  %v6278_v46 = vld [vmem:[%s10656_s8 + $0x408] sm:$0xf] }
 0x321   :  { %4228 = vmatpush.bf16.msra.mxu2 %v6419_v56  ;;  %v6279_v1 = vor.u32 %v7082_v45, %v6278_v46 }
 0x322   :  { %4216 = vmatpush.bf16.msra.mxu1 %v6139_v59  ;;  %v3873_v51 = vpop.f32.mrf.mxu3  ;;  %v7012_v59 = vld [vmem:[%s10656_s8 + $0x1f0] sm:$0xf0] }
 0x323   :  { %4244 = vmatpush.bf16.msra.mxu0 %v6587_v63  ;;  %v3874_v53 = vadd.f32 %v3873_v51, %v2698_v40  ;;  %v3901_v56 = vpop.f32.mrf.mxu2  ;;  %v7124_v63 = vld [vmem:[%s10656_s8 + $0x570] sm:$0xf0] }
 0x324   :  { %4201 = vmatpush.bf16.msra.mxu3 %v5943_v43  ;;  %v5802_v43 = vld [vmem:[%s10656_s8 + $0x50] sm:$0xf]  ;;  %v6447_v9 = vor.u32 %v7124_v63, %v6446_v62 }
 0x325   :  { %4229 = vmatpush.bf16.msra.mxu2 %v6391_v5  ;;  %v3888_v0 = vadd.f32 %v3887_v25, %v3874_v53  ;;  %v5999_v5 = vor.u32 %v7012_v59, %v5998_v58  ;;  %v5803_v10 = vor.u32 %v6963_v2, %v5802_v43  ;;  %v2699_v25 = vperm.slane %v10555_v30, 1 }
 0x326   :  { %4217 = vmatpush.bf16.msra.mxu1 %v6111_v7 }
 0x327   :  { %4245 = vmatpush.bf16.msra.mxu0 %v6559_v12  ;;  %v3902_v7 = vadd.f32 %v3901_v56, %v3888_v0  ;;  %v3971_v38 = vpop.f32.mrf.mxu0 }
 0x328   :  { %4202 = vmatpush.bf16.msra.mxu3 %v5915_v15  ;;  %v6956_v15 = vld [vmem:[%s10656_s8 + $0x30] sm:$0xf0] }
 0x329   :  { %4230 = vmatpush.bf16.msra.mxu2 %v6363_v55  ;;  %v3916_v12 = vadd.f32 %v3915_v60, %v3902_v7  ;;  %v6222_v55 = vld [vmem:[%s10656_s8 + $0x398] sm:$0xf]  ;;  %v5775_v22 = vor.u32 %v6956_v15, %v5774_v14  ;;  %s7292_s8 = smov [#allocation4]  }
 0x32a   :  { %4218 = vmatpush.bf16.msra.mxu1 %v6083_v20  ;;  %v3875_v50 = vpop.f32.mrf.mxu3  ;;  %v6223_v8 = vor.u32 %v7068_v18, %v6222_v55  ;;  %s4557_s26 = sshll.u32 %s7292_s8, 4  ;;  %s4558_s26 = int_to_ptr.vmem [resolvable:$true] %s4557_s26 }
 0x32b   :  { %4246 = vmatpush.bf16.msra.mxu0 %v6531_v23  ;;  %v6644_v19 = vmul.f32 -1.442695, %v3916_v12  ;;  %v3876_v20 = vadd.f32 %v3875_v50, %v2698_v40  ;;  %v3903_v21 = vpop.f32.mrf.mxu2  ;;  %4565 = dma.vmem_to_hbm [thread:$0]  %s4558_s26, 512, %s4560_s29, [#allocation5], %s7293_s30, %s7293_s30, %s7294_s6  }
 0x32c   :  { %4203 = vmatpush.bf16.msra.mxu3 %v5887_v26  ;;  %v3943_v26 = vpop.f32.mrf.mxu1 }
 0x32d   :  { %4231 = vmatpush.bf16.msra.mxu2 %v6335_v31  ;;  %7184 = vpow2.f32 %v6644_v19  ;;  %v3890_v23 = vadd.f32 %v3889_v4, %v3876_v20 }
 0x32e   :  { %4219 = vmatpush.bf16.msra.mxu1 %v6055_v35 }
 0x32f   :  { %4247 = vmatpush.bf16.msra.mxu0 %v6503_v39  ;;  %v3904_v24 = vadd.f32 %v3903_v21, %v3890_v23  ;;  %v3973_v49 = vpop.f32.mrf.mxu0 }
 0x330   :  { %4204 = vmatpush.bf16.msra.mxu3 %v5859_v37 }
 0x331   :  { %4232 = vmatpush.bf16.msra.mxu2 %v6307_v17  ;;  %v3918_v27 = vadd.f32 %v3917_v16, %v3904_v24 }
 0x332   :  { %4220 = vmatpush.bf16.msra.mxu1 %v6027_v52  ;;  %v3929_v29 = vpop.f32.mrf.mxu3  ;;  %v2700_v52 = vperm.slane %v10555_v30, 2 }
 0x333   :  { %4248 = vmatpush.bf16.msra.mxu0 %v6475_v57  ;;  %v7185_v31 = vpop.eup %7184  ;;  %v6651_v33 = vmul.f32 -1.442695, %v3918_v27  ;;  %v3930_v34 = vadd.f32 %v3929_v29, %v2699_v25  ;;  %v3957_v35 = vpop.f32.mrf.mxu2 }
 0x334   :  { %4205 = vmatpush.bf16.msra.mxu3 %v5831_v61  ;;  %v4298_v54 = vadd.f32 1.0, %v7185_v31  ;;  %v3945_v40 = vpop.f32.mrf.mxu1 }
 0x335   :  { %4233 = vmatpush.bf16.msra.mxu2 %v6279_v1  ;;  %7186 = vpow2.f32 %v6651_v33 }
 0x336   :  { %4221 = vmatpush.bf16.msra.mxu1 %v5999_v5  ;;  %7188 = vrcp.f32 %v4298_v54  ;;  %v4323_v46 = vand.u32 2147483648, %v4298_v54  ;;  %v4321_v53 = vand.u32 2147483647, %v4298_v54  ;;  %vm4317_vm2 = vweird.f32 %v4298_v54 }
 0x337   :  { %4249 = vmatpush.bf16.msra.mxu0 %v6447_v9 }
 0x338   :  { %4206 = vmatpush.bf16.msra.mxu3 %v5803_v10  ;;  %v4324_v0 = vor.u32 1.1754944e-38, %v4323_v46  ;;  %vm4322_vm4 = vcmp.eq.f32.partialorder %v4321_v53, 8.507059e+37  ;;  %v4027_v10 = vpop.f32.mrf.mxu0  ;;  %v2701_v46 = vperm.slane %v10555_v30, 3 }
 0x339   :  { %4234 = vmatpush.bf16.msra.mxu2 %v6251_v13  ;;  %4222 = vmatmul.bf16.vlgmr.msra.gmra.mxu1 %v9644_v3  ;;  %v3944_v3 = vadd.f32 %v3943_v26, %v3930_v34 }
 0x33a   :  { %4250 = vmatmul.bf16.vlgmr.msra.gmra.mxu0 %v9652_v11  ;;  %v3931_v41 = vpop.f32.mrf.mxu3 }
 0x33b   :  { %v3958_v11 = vadd.f32 %v3957_v35, %v3944_v3  ;;  %v7187_v44 = vpop.eup %7186  ;;  %v3932_v37 = vadd.f32 %v3931_v41, %v2699_v25  ;;  %v3959_v17 = vpop.f32.mrf.mxu2 }
 0x33c   :  { %4207 = vmatpush.bf16.msra.mxu3 %v5775_v22  ;;  %v7189_v42 = vpop.eup %7188  ;;  %v4305_v47 = vadd.f32 1.0, %v7187_v44  ;;  %v3999_v43 = vpop.f32.mrf.mxu1 }
 0x33d   :  { %4235 = vmatpush.bf16.msra.mxu2 %v6223_v8  ;;  %v3972_v39 = vadd.f32 %v3971_v38, %v3958_v11  ;;  %v4313_v48 = vmul.f32 %v7189_v42, %v4298_v54  ;;  %vm4318_vm1 = vweird.f32 %v7189_v42 }
 0x33e   :  { %vm4319_vm3 = vmor %vm4317_vm2, %vm4318_vm1  ;;  %v4428_v9 = vand.u32 2147483648, %v4305_v47  ;;  %v4426_v13 = vand.u32 2147483647, %v4305_v47  ;;  %vm4422_vm6 = vweird.f32 %v4305_v47 }
 0x33f   :  { %4208 = vmatmul.bf16.vlgmr.msra.gmra.mxu3 %v9686_v28  ;;  %v6645_v60 = vmul.f32 -1.442695, %v3972_v39  ;;  %v3946_v28 = vadd.f32 %v3945_v40, %v3932_v37  ;;  %v4314_v51 = vsub.f32 1.0, %v4313_v48 }
 0x340   :  { %4236 = vmatmul.bf16.vlgmr.msra.gmra.mxu2 %v9694_v32  ;;  %v4429_v20 = vor.u32 1.1754944e-38, %v4428_v9  ;;  %vm4427_vm8 = vcmp.eq.f32.partialorder %v4426_v13, 8.507059e+37  ;;  %v4029_v54 = vpop.f32.mrf.mxu0 }
 0x341   :  { %7190 = vpow2.f32 %v6645_v60  ;;  %v3960_v32 = vadd.f32 %v3959_v17, %v3946_v28  ;;  %v4315_v45 = vmul.f32 %v7189_v42, %v4314_v51 }
 0x342   :  { %7192 = vrcp.f32 %v4305_v47  ;;  %v3985_v57 = vpop.f32.mrf.mxu3 }
 0x343   :  { %v3974_v56 = vadd.f32 %v3973_v49, %v3960_v32  ;;  %v4316_v59 = vadd.f32 %v7189_v42, %v4315_v45  ;;  %v3986_v62 = vadd.f32 %v3985_v57, %v2700_v52  ;;  %v4013_v6 = vpop.f32.mrf.mxu2 }
 0x344   :  { %v4001_v25 = vpop.f32.mrf.mxu1 }
 0x345   :  { %v6652_v61 = vmul.f32 -1.442695, %v3974_v56  ;;  %v4320_v2 = vsel %vm4319_vm3, %v7189_v42, %v4316_v59  ;;  %v4000_v7 = vadd.f32 %v3999_v43, %v3986_v62 }
 0x346   :  { %v4325_v5 = vsel %vm4322_vm4, %v4324_v0, %v4320_v2 }
 0x347   :  { %v7191_v58 = vpop.eup %7190  ;;  %7194 = vpow2.f32 %v6652_v61  ;;  %4522 = vst [vmem:[#allocation2] sm:$0xff] %v4325_v5  ;;  %v4014_v14 = vadd.f32 %v4013_v6, %v4000_v7 }
 0x348   :  { %v7193_v63 = vpop.eup %7192  ;;  %v4299_v1 = vadd.f32 1.0, %v7191_v58 }
 0x349   :  { %v4418_v4 = vmul.f32 %v7193_v63, %v4305_v47  ;;  %vm4423_vm5 = vweird.f32 %v7193_v63  ;;  %v4028_v55 = vadd.f32 %v4027_v10, %v4014_v14 }
 0x34a   :  { %7196 = vrcp.f32 %v4299_v1  ;;  %v3987_v15 = vpop.f32.mrf.mxu3  ;;  %vm4424_vm7 = vmor %vm4422_vm6, %vm4423_vm5  ;;  %v4338_v29 = vand.u32 2147483648, %v4299_v1  ;;  %v4336_v34 = vand.u32 2147483647, %v4299_v1  ;;  %vm4332_vm10 = vweird.f32 %v4299_v1 }
 0x34b   :  { %v4419_v36 = vsub.f32 1.0, %v4418_v4  ;;  %v3988_v18 = vadd.f32 %v3987_v15, %v2700_v52  ;;  %v6646_v8 = vmul.f32 -1.442695, %v4028_v55  ;;  %v4015_v31 = vpop.f32.mrf.mxu2 }
 0x34c   :  { %v4339_v39 = vor.u32 1.1754944e-38, %v4338_v29  ;;  %vm4337_vm12 = vcmp.eq.f32.partialorder %v4336_v34, 8.507059e+37 }
 0x34d   :  { %v4420_v12 = vmul.f32 %v7193_v63, %v4419_v36  ;;  %v7195_v16 = vpop.eup %7194  ;;  %v4002_v27 = vadd.f32 %v4001_v25, %v3988_v18 }
 0x34e   :  { %v4306_v21 = vadd.f32 1.0, %v7195_v16 }
 0x34f   :  { %v4421_v50 = vadd.f32 %v7193_v63, %v4420_v12  ;;  %v4016_v35 = vadd.f32 %v4015_v31, %v4002_v27 }
 0x350   :  { %v7197_v19 = vpop.eup %7196  ;;  %7198 = vrcp.f32 %v4306_v21  ;;  %v4443_v17 = vand.u32 2147483648, %v4306_v21  ;;  %v4441_v28 = vand.u32 2147483647, %v4306_v21  ;;  %vm4437_vm14 = vweird.f32 %v4306_v21 }
 0x351   :  { %v4425_v22 = vsel %vm4424_vm7, %v7193_v63, %v4421_v50  ;;  %v4328_v23 = vmul.f32 %v7197_v19, %v4299_v1  ;;  %7200 = vpow2.f32 %v6646_v8  ;;  %vm4333_vm9 = vweird.f32 %v7197_v19 }
 0x352   :  { %v4430_v24 = vsel %vm4427_vm8, %v4429_v20, %v4425_v22  ;;  %v4030_v3 = vadd.f32 %v4029_v54, %v4016_v35  ;;  %vm4334_vm11 = vmor %vm4332_vm10, %vm4333_vm9  ;;  %v4444_v51 = vor.u32 1.1754944e-38, %v4443_v17  ;;  %vm4442_vm1 = vcmp.eq.f32.partialorder %v4441_v28, 8.507059e+37 }
 0x353   :  { %4529 = vst [vmem:[#allocation2 + $0x38] sm:$0xff] %v4430_v24  ;;  %v4329_v26 = vsub.f32 1.0, %v4328_v23 }
 0x354   :  { %v6653_v60 = vmul.f32 -1.442695, %v4030_v3 }
 0x355   :  { %v4330_v33 = vmul.f32 %v7197_v19, %v4329_v26 }
 0x356   :  { %v7199_v11 = vpop.eup %7198  ;;  %7202 = vpow2.f32 %v6653_v60  ;;  %v4055_v58 = vpop.f32.mrf.mxu1 }
 0x357   :  { %v4331_v38 = vadd.f32 %v7197_v19, %v4330_v33  ;;  %v7201_v40 = vpop.eup %7200  ;;  %v4433_v44 = vmul.f32 %v7199_v11, %v4306_v21  ;;  %vm4438_vm13 = vweird.f32 %v7199_v11  ;;  %v4083_v2 = vpop.f32.mrf.mxu0 }
 0x358   :  { %v4300_v42 = vadd.f32 1.0, %v7201_v40  ;;  %vm4439_vm15 = vmor %vm4437_vm14, %vm4438_vm13 }
 0x359   :  { %v4335_v41 = vsel %vm4334_vm11, %v7197_v19, %v4331_v38  ;;  %v4434_v47 = vsub.f32 1.0, %v4433_v44  ;;  %v2702_v38 = vperm.slane %v10555_v30, 4 }
 0x35a   :  { %v4340_v37 = vsel %vm4337_vm12, %v4339_v39, %v4335_v41  ;;  %7204 = vrcp.f32 %v4300_v42  ;;  %v4353_v0 = vand.u32 2147483648, %v4300_v42  ;;  %v4351_v43 = vand.u32 2147483647, %v4300_v42 }
 0x35b   :  { %4523 = vst [vmem:[#allocation2 + $0x8] sm:$0xff] %v4340_v37  ;;  %v4435_v48 = vmul.f32 %v7199_v11, %v4434_v47  ;;  %vm4347_vm3 = vweird.f32 %v4300_v42 }
 0x35c   :  { %v7203_v32 = vpop.eup %7202  ;;  %v4354_v7 = vor.u32 1.1754944e-38, %v4353_v0  ;;  %vm4352_vm5 = vcmp.eq.f32.partialorder %v4351_v43, 8.507059e+37 }
 0x35d   :  { %v4436_v49 = vadd.f32 %v7199_v11, %v4435_v48  ;;  %v4307_v56 = vadd.f32 1.0, %v7203_v32 }
 0x35e   :  { %v4057_v50 = vpop.f32.mrf.mxu1 }
 0x35f   :  { %v4440_v52 = vsel %vm4439_vm15, %v7199_v11, %v4436_v49  ;;  %7206 = vrcp.f32 %v4307_v56  ;;  %v4458_v18 = vand.u32 2147483648, %v4307_v56  ;;  %v4456_v21 = vand.u32 2147483647, %v4307_v56  ;;  %v4085_v24 = vpop.f32.mrf.mxu0 }
 0x360   :  { %v7205_v45 = vpop.eup %7204  ;;  %v4445_v53 = vsel %vm4442_vm1, %v4444_v51, %v4440_v52  ;;  %vm4452_vm7 = vweird.f32 %v4307_v56 }
 0x361   :  { %4530 = vst [vmem:[#allocation2 + $0x40] sm:$0xff] %v4445_v53  ;;  %v4343_v57 = vmul.f32 %v7205_v45, %v4300_v42  ;;  %vm4348_vm2 = vweird.f32 %v7205_v45  ;;  %v4459_v25 = vor.u32 1.1754944e-38, %v4458_v18  ;;  %vm4457_vm9 = vcmp.eq.f32.partialorder %v4456_v21, 8.507059e+37 }
 0x362   :  { %v4041_v59 = vpop.f32.mrf.mxu3  ;;  %vm4349_vm4 = vmor %vm4347_vm3, %vm4348_vm2 }
 0x363   :  { %v4344_v61 = vsub.f32 1.0, %v4343_v57  ;;  %v4042_v62 = vadd.f32 %v4041_v59, %v2701_v46  ;;  %v4069_v63 = vpop.f32.mrf.mxu2 }
 0x365   :  { %v4345_v1 = vmul.f32 %v7205_v45, %v4344_v61  ;;  %v4056_v4 = vadd.f32 %v4055_v58, %v4042_v62  ;;  %v7207_v36 = vpop.eup %7206 }
 0x366   :  { %v4448_v10 = vmul.f32 %v7207_v36, %v4307_v56  ;;  %vm4453_vm6 = vweird.f32 %v7207_v36 }
 0x367   :  { %v4346_v5 = vadd.f32 %v7205_v45, %v4345_v1  ;;  %v4070_v6 = vadd.f32 %v4069_v63, %v4056_v4  ;;  %vm4454_vm8 = vmor %vm4452_vm7, %vm4453_vm6 }
 0x368   :  { %v4449_v16 = vsub.f32 1.0, %v4448_v10 }
 0x369   :  { %v4350_v9 = vsel %vm4349_vm4, %v7205_v45, %v4346_v5  ;;  %v4084_v12 = vadd.f32 %v4083_v2, %v4070_v6 }
 0x36a   :  { %v4043_v13 = vpop.f32.mrf.mxu3  ;;  %v4355_v14 = vsel %vm4352_vm5, %v4354_v7, %v4350_v9  ;;  %v4450_v20 = vmul.f32 %v7207_v36, %v4449_v16 }
 0x36b   :  { %v4044_v15 = vadd.f32 %v4043_v13, %v2701_v46  ;;  %4524 = vst [vmem:[#allocation2 + $0x10] sm:$0xff] %v4355_v14  ;;  %v6647_v55 = vmul.f32 -1.442695, %v4084_v12  ;;  %v4071_v22 = vpop.f32.mrf.mxu2 }
 0x36c   :  { %v4451_v8 = vadd.f32 %v7207_v36, %v4450_v20 }
 0x36d   :  { %v4058_v19 = vadd.f32 %v4057_v50, %v4044_v15  ;;  %7208 = vpow2.f32 %v6647_v55  ;;  %v2703_v50 = vperm.slane %v10555_v30, 5 }
 0x36e   :  { %v4455_v27 = vsel %vm4454_vm8, %v7207_v36, %v4451_v8 }
 0x36f   :  { %v4072_v23 = vadd.f32 %v4071_v22, %v4058_v19  ;;  %v4460_v29 = vsel %vm4457_vm9, %v4459_v25, %v4455_v27 }
 0x370   :  { %4531 = vst [vmem:[#allocation2 + $0x48] sm:$0xff] %v4460_v29 }
 0x371   :  { %v4086_v26 = vadd.f32 %v4085_v24, %v4072_v23 }
 0x373   :  { %v6654_v31 = vmul.f32 -1.442695, %v4086_v26  ;;  %v7209_v33 = vpop.eup %7208 }
 0x374   :  { %v4301_v34 = vadd.f32 1.0, %v7209_v33 }
 0x375   :  { %7210 = vpow2.f32 %v6654_v31 }
 0x376   :  { %7212 = vrcp.f32 %v4301_v34  ;;  %v4111_v39 = vpop.f32.mrf.mxu1  ;;  %v4368_v60 = vand.u32 2147483648, %v4301_v34  ;;  %v4366_v47 = vand.u32 2147483647, %v4301_v34  ;;  %vm4362_vm11 = vweird.f32 %v4301_v34 }
 0x377   :  { %v4139_v48 = vpop.f32.mrf.mxu0 }
 0x378   :  { %v4369_v32 = vor.u32 1.1754944e-38, %v4368_v60  ;;  %vm4367_vm13 = vcmp.eq.f32.partialorder %v4366_v47, 8.507059e+37 }
 0x37b   :  { %v7211_v35 = vpop.eup %7210 }
 0x37c   :  { %v4308_v54 = vadd.f32 1.0, %v7211_v35  ;;  %v7213_v3 = vpop.eup %7212 }
 0x37d   :  { %v4358_v11 = vmul.f32 %v7213_v3, %v4301_v34  ;;  %vm4363_vm10 = vweird.f32 %v7213_v3 }
 0x37e   :  { %7214 = vrcp.f32 %v4308_v54  ;;  %vm4364_vm12 = vmor %vm4362_vm11, %vm4363_vm10  ;;  %v4473_v58 = vand.u32 2147483648, %v4308_v54  ;;  %v4471_v63 = vand.u32 2147483647, %v4308_v54  ;;  %v4113_v0 = vpop.f32.mrf.mxu1  ;;  %vm4467_vm15 = vweird.f32 %v4308_v54 }
 0x37f   :  { %v4359_v41 = vsub.f32 1.0, %v4358_v11  ;;  %v4141_v36 = vpop.f32.mrf.mxu0 }
 0x380   :  { %v4474_v4 = vor.u32 1.1754944e-38, %v4473_v58  ;;  %vm4472_vm2 = vcmp.eq.f32.partialorder %v4471_v63, 8.507059e+37 }
 0x381   :  { %v4360_v42 = vmul.f32 %v7213_v3, %v4359_v41 }
 0x382   :  { %v4097_v40 = vpop.f32.mrf.mxu3 }
 0x383   :  { %v4098_v44 = vadd.f32 %v4097_v40, %v2702_v38  ;;  %v4125_v37 = vpop.f32.mrf.mxu2  ;;  %v4361_v49 = vadd.f32 %v7213_v3, %v4360_v42 }
 0x384   :  { %v7215_v28 = vpop.eup %7214 }
 0x385   :  { %v4112_v17 = vadd.f32 %v4111_v39, %v4098_v44  ;;  %v4463_v52 = vmul.f32 %v7215_v28, %v4308_v54  ;;  %v4365_v46 = vsel %vm4364_vm12, %v7213_v3, %v4361_v49  ;;  %vm4468_vm14 = vweird.f32 %v7215_v28 }
 0x386   :  { %v4370_v53 = vsel %vm4367_vm13, %v4369_v32, %v4365_v46  ;;  %vm4469_vm1 = vmor %vm4467_vm15, %vm4468_vm14 }
 0x387   :  { %v4126_v51 = vadd.f32 %v4125_v37, %v4112_v17  ;;  %v4464_v56 = vsub.f32 1.0, %v4463_v52  ;;  %4525 = vst [vmem:[#allocation2 + $0x18] sm:$0xff] %v4370_v53 }
 0x389   :  { %v4140_v45 = vadd.f32 %v4139_v48, %v4126_v51  ;;  %v4465_v62 = vmul.f32 %v7215_v28, %v4464_v56 }
 0x38a   :  { %v4099_v57 = vpop.f32.mrf.mxu3 }
 0x38b   :  { %v6648_v59 = vmul.f32 -1.442695, %v4140_v45  ;;  %v4100_v61 = vadd.f32 %v4099_v57, %v2702_v38  ;;  %v4466_v43 = vadd.f32 %v7215_v28, %v4465_v62  ;;  %v4127_v2 = vpop.f32.mrf.mxu2 }
 0x38d   :  { %7216 = vpow2.f32 %v6648_v59  ;;  %v4114_v1 = vadd.f32 %v4113_v0, %v4100_v61  ;;  %v4470_v6 = vsel %vm4469_vm1, %v7215_v28, %v4466_v43  ;;  %v2704_v59 = vperm.slane %v10555_v30, 6 }
 0x38e   :  { %v4475_v7 = vsel %vm4472_vm2, %v4474_v4, %v4470_v6 }
 0x38f   :  { %v4128_v5 = vadd.f32 %v4127_v2, %v4114_v1  ;;  %4532 = vst [vmem:[#allocation2 + $0x50] sm:$0xff] %v4475_v7 }
 0x391   :  { %v4142_v9 = vadd.f32 %v4141_v36, %v4128_v5 }
 0x393   :  { %v7217_v10 = vpop.eup %7216  ;;  %v6655_v12 = vmul.f32 -1.442695, %v4142_v9 }
 0x394   :  { %v4302_v13 = vadd.f32 1.0, %v7217_v10 }
 0x395   :  { %7218 = vpow2.f32 %v6655_v12 }
 0x396   :  { %7220 = vrcp.f32 %v4302_v13  ;;  %v4167_v19 = vpop.f32.mrf.mxu1  ;;  %v4383_v21 = vand.u32 2147483648, %v4302_v13  ;;  %v4381_v8 = vand.u32 2147483647, %v4302_v13  ;;  %vm4377_vm4 = vweird.f32 %v4302_v13 }
 0x397   :  { %v4195_v27 = vpop.f32.mrf.mxu0 }
 0x398   :  { %v4384_v31 = vor.u32 1.1754944e-38, %v4383_v21  ;;  %vm4382_vm6 = vcmp.eq.f32.partialorder %v4381_v8, 8.507059e+37 }
 0x39b   :  { %v7219_v14 = vpop.eup %7218 }
 0x39c   :  { %v7221_v15 = vpop.eup %7220  ;;  %v4309_v16 = vadd.f32 1.0, %v7219_v14 }
 0x39d   :  { %v4373_v55 = vmul.f32 %v7221_v15, %v4302_v13  ;;  %vm4378_vm3 = vweird.f32 %v7221_v15 }
 0x39e   :  { %7222 = vrcp.f32 %v4309_v16  ;;  %vm4379_vm5 = vmor %vm4377_vm4, %vm4378_vm3  ;;  %v4488_v39 = vand.u32 2147483648, %v4309_v16  ;;  %v4486_v60 = vand.u32 2147483647, %v4309_v16  ;;  %v4169_v37 = vpop.f32.mrf.mxu1  ;;  %vm4482_vm8 = vweird.f32 %v4309_v16 }
 0x39f   :  { %v4374_v18 = vsub.f32 1.0, %v4373_v55  ;;  %v4197_v51 = vpop.f32.mrf.mxu0 }
 0x3a0   :  { %v4489_v48 = vor.u32 1.1754944e-38, %v4488_v39  ;;  %vm4487_vm10 = vcmp.eq.f32.partialorder %v4486_v60, 8.507059e+37 }
 0x3a1   :  { %v4375_v23 = vmul.f32 %v7221_v15, %v4374_v18 }
 0x3a2   :  { %v4153_v20 = vpop.f32.mrf.mxu3 }
 0x3a3   :  { %v4154_v22 = vadd.f32 %v4153_v20, %v2703_v50  ;;  %v4181_v24 = vpop.f32.mrf.mxu2  ;;  %v4376_v26 = vadd.f32 %v7221_v15, %v4375_v23 }
 0x3a4   :  { %v7223_v29 = vpop.eup %7222 }
 0x3a5   :  { %v4168_v25 = vadd.f32 %v4167_v19, %v4154_v22  ;;  %v4380_v34 = vsel %vm4379_vm5, %v7221_v15, %v4376_v26  ;;  %v4478_v35 = vmul.f32 %v7223_v29, %v4309_v16  ;;  %vm4483_vm7 = vweird.f32 %v7223_v29 }
 0x3a6   :  { %v4385_v54 = vsel %vm4382_vm6, %v4384_v31, %v4380_v34  ;;  %vm4484_vm9 = vmor %vm4482_vm8, %vm4483_vm7 }
 0x3a7   :  { %v4182_v33 = vadd.f32 %v4181_v24, %v4168_v25  ;;  %4526 = vst [vmem:[#allocation2 + $0x20] sm:$0xff] %v4385_v54  ;;  %v4479_v3 = vsub.f32 1.0, %v4478_v35 }
 0x3a9   :  { %v4196_v38 = vadd.f32 %v4195_v27, %v4182_v33  ;;  %v4480_v44 = vmul.f32 %v7223_v29, %v4479_v3 }
 0x3aa   :  { %v4155_v11 = vpop.f32.mrf.mxu3 }
 0x3ab   :  { %v6649_v40 = vmul.f32 -1.442695, %v4196_v38  ;;  %v4156_v41 = vadd.f32 %v4155_v11, %v2703_v50  ;;  %v4481_v47 = vadd.f32 %v7223_v29, %v4480_v44  ;;  %v4183_v17 = vpop.f32.mrf.mxu2 }
 0x3ad   :  { %7224 = vpow2.f32 %v6649_v40  ;;  %v4170_v42 = vadd.f32 %v4169_v37, %v4156_v41  ;;  %v4485_v49 = vsel %vm4484_vm9, %v7223_v29, %v4481_v47 }
 0x3ae   :  { %v4490_v32 = vsel %vm4487_vm10, %v4489_v48, %v4485_v49 }
 0x3af   :  { %v4184_v28 = vadd.f32 %v4183_v17, %v4170_v42  ;;  %4533 = vst [vmem:[#allocation2 + $0x58] sm:$0xff] %v4490_v32 }
 0x3b1   :  { %v4198_v52 = vadd.f32 %v4197_v51, %v4184_v28 }
 0x3b3   :  { %v7225_v46 = vpop.eup %7224  ;;  %v6656_v45 = vmul.f32 -1.442695, %v4198_v52 }
 0x3b4   :  { %v4303_v53 = vadd.f32 1.0, %v7225_v46 }
 0x3b5   :  { %7226 = vpow2.f32 %v6656_v45 }
 0x3b6   :  { %7228 = vrcp.f32 %v4303_v53  ;;  %v4223_v63 = vpop.f32.mrf.mxu1  ;;  %v4398_v1 = vand.u32 2147483648, %v4303_v53  ;;  %v4396_v4 = vand.u32 2147483647, %v4303_v53  ;;  %vm4392_vm12 = vweird.f32 %v4303_v53 }
 0x3b7   :  { %v4251_v7 = vpop.f32.mrf.mxu0 }
 0x3b8   :  { %v4399_v10 = vor.u32 1.1754944e-38, %v4398_v1  ;;  %vm4397_vm14 = vcmp.eq.f32.partialorder %v4396_v4, 8.507059e+37 }
 0x3bb   :  { %v7227_v56 = vpop.eup %7226 }
 0x3bc   :  { %v7229_v57 = vpop.eup %7228  ;;  %v4310_v58 = vadd.f32 1.0, %v7227_v56 }
 0x3bd   :  { %v4388_v61 = vmul.f32 %v7229_v57, %v4303_v53  ;;  %vm4393_vm11 = vweird.f32 %v7229_v57 }
 0x3be   :  { %7230 = vrcp.f32 %v4310_v58  ;;  %vm4394_vm13 = vmor %vm4392_vm12, %vm4393_vm11  ;;  %v4503_v55 = vand.u32 2147483648, %v4310_v58  ;;  %v4501_v21 = vand.u32 2147483647, %v4310_v58  ;;  %v4225_v22 = vpop.f32.mrf.mxu1  ;;  %vm4497_vm1 = vweird.f32 %v4310_v58 }
 0x3bf   :  { %v4389_v62 = vsub.f32 1.0, %v4388_v61  ;;  %v4253_v29 = vpop.f32.mrf.mxu0 }
 0x3c0   :  { %v4504_v25 = vor.u32 1.1754944e-38, %v4503_v55  ;;  %vm4502_vm3 = vcmp.eq.f32.partialorder %v4501_v21, 8.507059e+37 }
 0x3c1   :  { %v4390_v2 = vmul.f32 %v7229_v57, %v4389_v62 }
 0x3c2   :  { %v4209_v0 = vpop.f32.mrf.mxu3 }
 0x3c3   :  { %v4210_v43 = vadd.f32 %v4209_v0, %v2704_v59  ;;  %v4237_v5 = vpop.f32.mrf.mxu2  ;;  %v4391_v36 = vadd.f32 %v7229_v57, %v4390_v2 }
 0x3c4   :  { %v7231_v9 = vpop.eup %7230 }
 0x3c5   :  { %v4224_v6 = vadd.f32 %v4223_v63, %v4210_v43  ;;  %v4395_v30 = vsel %vm4394_vm13, %v7229_v57, %v4391_v36  ;;  %v4493_v13 = vmul.f32 %v7231_v9, %v4310_v58  ;;  %vm4498_vm15 = vweird.f32 %v7231_v9 }
 0x3c6   :  { %v4400_v14 = vsel %vm4397_vm14, %v4399_v10, %v4395_v30  ;;  %vm4499_vm2 = vmor %vm4497_vm1, %vm4498_vm15 }
 0x3c7   :  { %v4238_v12 = vadd.f32 %v4237_v5, %v4224_v6  ;;  %4527 = vst [vmem:[#allocation2 + $0x28] sm:$0xff] %v4400_v14  ;;  %v4494_v16 = vsub.f32 1.0, %v4493_v13 }
 0x3c9   :  { %v4252_v15 = vadd.f32 %v4251_v7, %v4238_v12  ;;  %v4495_v20 = vmul.f32 %v7231_v9, %v4494_v16 }
 0x3ca   :  { %v4211_v50 = vpop.f32.mrf.mxu3 }
 0x3cb   :  { %v6650_v18 = vmul.f32 -1.442695, %v4252_v15  ;;  %v4212_v19 = vadd.f32 %v4211_v50, %v2704_v59  ;;  %v4496_v8 = vadd.f32 %v7231_v9, %v4495_v20  ;;  %v4239_v24 = vpop.f32.mrf.mxu2 }
 0x3cd   :  { %7232 = vpow2.f32 %v6650_v18  ;;  %v4226_v23 = vadd.f32 %v4225_v22, %v4212_v19  ;;  %v4500_v27 = vsel %vm4499_vm2, %v7231_v9, %v4496_v8 }
 0x3ce   :  { %v4505_v31 = vsel %vm4502_vm3, %v4504_v25, %v4500_v27 }
 0x3cf   :  { %v4240_v26 = vadd.f32 %v4239_v24, %v4226_v23  ;;  %4534 = vst [vmem:[#allocation2 + $0x60] sm:$0xff] %v4505_v31 }
 0x3d1   :  { %v4254_v33 = vadd.f32 %v4253_v29, %v4240_v26 }
 0x3d3   :  { %v7233_v34 = vpop.eup %7232  ;;  %v6657_v35 = vmul.f32 -1.442695, %v4254_v33 }
 0x3d4   :  { %v4304_v54 = vadd.f32 1.0, %v7233_v34 }
 0x3d5   :  { %7234 = vpow2.f32 %v6657_v35 }
 0x3d6   :  { %7236 = vrcp.f32 %v4304_v54  ;;  %v4413_v41 = vand.u32 2147483648, %v4304_v54  ;;  %v4411_v60 = vand.u32 2147483647, %v4304_v54  ;;  %vm4407_vm5 = vweird.f32 %v4304_v54 }
 0x3d8   :  { %v4414_v47 = vor.u32 1.1754944e-38, %v4413_v41  ;;  %vm4412_vm7 = vcmp.eq.f32.partialorder %v4411_v60, 8.507059e+37 }
 0x3db   :  { %v7235_v38 = vpop.eup %7234 }
 0x3dc   :  { %v7237_v3 = vpop.eup %7236  ;;  %v4311_v11 = vadd.f32 1.0, %v7235_v38 }
 0x3dd   :  { %v4403_v39 = vmul.f32 %v7237_v3, %v4304_v54  ;;  %vm4408_vm4 = vweird.f32 %v7237_v3 }
 0x3de   :  { %7238 = vrcp.f32 %v4311_v11  ;;  %vm4409_vm6 = vmor %vm4407_vm5, %vm4408_vm4  ;;  %v4518_v51 = vand.u32 2147483648, %v4311_v11  ;;  %v4516_v52 = vand.u32 2147483647, %v4311_v11  ;;  %vm4512_vm9 = vweird.f32 %v4311_v11 }
 0x3df   :  { %v4404_v40 = vsub.f32 1.0, %v4403_v39 }
 0x3e0   :  { %v4519_v45 = vor.u32 1.1754944e-38, %v4518_v51  ;;  %vm4517_vm11 = vcmp.eq.f32.partialorder %v4516_v52, 8.507059e+37 }
 0x3e1   :  { %v4405_v44 = vmul.f32 %v7237_v3, %v4404_v40 }
 0x3e3   :  { %v4406_v37 = vadd.f32 %v7237_v3, %v4405_v44 }
 0x3e4   :  { %v7239_v42 = vpop.eup %7238 }
 0x3e5   :  { %v4410_v17 = vsel %vm4409_vm6, %v7237_v3, %v4406_v37  ;;  %v4508_v48 = vmul.f32 %v7239_v42, %v4311_v11  ;;  %vm4513_vm8 = vweird.f32 %v7239_v42 }
 0x3e6   :  { %v4415_v28 = vsel %vm4412_vm7, %v4414_v47, %v4410_v17  ;;  %vm4514_vm10 = vmor %vm4512_vm9, %vm4513_vm8 }
 0x3e7   :  { %4528 = vst.msk [vmem:[#allocation2 + $0x30] sm:$0xff] %vm1247_vm0, %v4415_v28  ;;  %v4509_v49 = vsub.f32 1.0, %v4508_v48 }
 0x3e9   :  { %v4510_v32 = vmul.f32 %v7239_v42, %v4509_v49 }
 0x3eb   :  { %v4511_v46 = vadd.f32 %v7239_v42, %v4510_v32 }
 0x3ed   :  { %v4515_v53 = vsel %vm4514_vm10, %v7239_v42, %v4511_v46 }
 0x3ee   :  { %v4520_v56 = vsel %vm4517_vm11, %v4519_v45, %v4515_v53 }
 0x3ef   :  { %4535 = vst.msk [vmem:[#allocation2 + $0x68] sm:$0xff] %vm1247_vm0, %v4520_v56 }
 0x3f0   :  { %4552 = dma.vmem_to_hbm [thread:$0]  %s4545_s12, 1792, %s4547_s5, [#allocation3], %s7296_s14, %s7296_s14, %s7297_s2  }
 0x3f1   :  { %7288 = dma.done.wait [#allocation3], 1792  }
 0x3f2   :  { %7289 = vsyncadd [#allocation3], 4294965504 }
 0x3f3   :  { %7290 = dma.done.wait [#allocation5], 512  }
 0x3f4   :  { %7291 = vsyncadd [#allocation5], 4294966784 }
 0x3f5   :  { %4574 = vsyncpa [#allocation3], 1 }
 0x3f6   :  { %4575 = vsyncpa [#allocation5], 1 }

</bundles_post_ra>
